<compile_context>
chip_gen: v6e
topology: v6e:2x2x1
jax: 0.10.0
libtpu: 0.0.40
codegen_flags: <defaults>
</compile_context>

<pallas_src>
import math

import jax
import jax.numpy as jnp
from jax.experimental import pallas as pl
from jax.experimental.pallas import tpu as pltpu


def _round_up(x, m):
    return ((x + m - 1) // m) * m


def _vmem_capacity_bytes():
    """Per-core VMEM capacity; conservative 64 MiB fallback (v7x per-TC size)."""
    try:
        return int(pltpu.get_tpu_info().vmem_capacity_bytes)
    except Exception:
        return 64 * 1024 * 1024


def _pick_tile_h(H, W, cp_in, cp_out, budget_bytes, max_tile_h=64):
    """Largest divisor of H that (a) keeps >= 2 row tiles when possible (so the
    t grid axis can still be split across v7x cores), (b) fits the estimated
    per-step VMEM budget, and (c) is <= max_tile_h (halo recompute is 2/TH, so
    TH in the 16..64 range is the sweet spot)."""
    def step_bytes(th):
        thp = th + 2
        return (2 * (th + 4) * (W + 2) * cp_in * 2      # x halo slab (2x buffered, bf16)
                + 2 * th * W * cp_out * 2               # output tile (2x buffered, bf16)
                + thp * (W + 2) * cp_out * 2            # padded h1 scratch (bf16)
                + 3 * thp * W * cp_out * 4)             # f32 temporaries (h1/h2/res)

    divisors = [d for d in range(1, H + 1) if H % d == 0]
    cands = [d for d in divisors if H // d >= 2] or divisors
    fitting = [d for d in cands if d <= max_tile_h and step_bytes(d) <= budget_bytes]
    return max(fitting) if fitting else min(cands)


def _gblock_kernel(x_ref, w1_ref, b1_ref, w2_ref, b2_ref, wr_ref, br_ref,
                   o_ref, h1_ref):
    # Shapes (Cp_in / Cp_out are lane-padded channel counts, multiples of 128):
    #   x_ref : (TH+4, W+2, Cp_in)   bf16  halo row slab for this tile
    #   w1_ref: (9*Cp_in,  Cp_out)   bf16  tap-major (dy, dx, cin) layout, VMEM resident
    #   w2_ref: (9*Cp_out, Cp_out)   bf16  VMEM resident
    #   wr_ref: (Cp_in,    Cp_out)   bf16  VMEM resident
    #   b*_ref: (1, Cp_out)          f32   VMEM resident
    #   o_ref : (TH, W, Cp_out)      bf16  one row tile of the output
    #   h1_ref: (TH+2, W+2, Cp_out)  bf16  padded c1 output staged for c2
    t = pl.program_id(1)
    n_t = pl.num_programs(1)
    TH, W, Cp_out = o_ref.shape
    Cp_in = x_ref.shape[-1]
    THp = TH + 2                      # c1 rows: TH interior + 1 halo row each side

    # ---- c1: 3x3 conv as 9 accumulating tap matmuls (K = Cp_in each),
    #      bf16 x bf16 -> f32 accumulation; no materialized im2col tensor. ----
    h1 = None
    for k in range(9):
        dy, dx = k // 3, k % 3
        tap = x_ref[dy:dy + THp, dx:dx + W, :].reshape(THp * W, Cp_in)
        part = jnp.dot(tap, w1_ref[k * Cp_in:(k + 1) * Cp_in, :],
                       preferred_element_type=jnp.float32)
        h1 = part if h1 is None else h1 + part
    h1 = h1 + b1_ref[...]
    h1 = jnp.where(h1 >= 0.0, h1, 0.2 * h1)                 # leaky_relu(0.2)

    # ---- residual: 1x1 conv (linear, act_alpha=-1) on the centre tap of x ----
    xc = x_ref[2:TH + 2, 1:W + 1, :].reshape(TH * W, Cp_in)
    res = jnp.dot(xc, wr_ref[...],
                  preferred_element_type=jnp.float32) + br_ref[...]

    # ---- stage h1 (bf16) into the padded scratch; border columns are re-zeroed
    #      EVERY step (the scratch persists across grid steps; do NOT guard the
    #      column zeroing with t == 0 -- wrong when t is core-sharded). ----
    h1_ref[:, 1:W + 1, :] = h1.reshape(THp, W, Cp_out).astype(jnp.bfloat16)
    h1_ref[:, 0:1, :] = jnp.zeros((THp, 1, Cp_out), jnp.bfloat16)
    h1_ref[:, W + 1:W + 2, :] = jnp.zeros((THp, 1, Cp_out), jnp.bfloat16)

    @pl.when(t == 0)                  # top halo row falls outside the image
    def _():
        h1_ref[0:1, :, :] = jnp.zeros((1, W + 2, Cp_out), jnp.bfloat16)

    @pl.when(t == n_t - 1)            # bottom halo row falls outside the image
    def _():
        h1_ref[THp - 1:THp, :, :] = jnp.zeros((1, W + 2, Cp_out), jnp.bfloat16)

    # ---- c2: 3x3 conv as 9 accumulating tap matmuls + leaky_relu(0.2) ----
    h2 = None
    for k in range(9):
        dy, dx = k // 3, k % 3
        tap = h1_ref[dy:dy + TH, dx:dx + W, :].reshape(TH * W, Cp_out)
        part = jnp.dot(tap, w2_ref[k * Cp_out:(k + 1) * Cp_out, :],
                       preferred_element_type=jnp.float32)
        h2 = part if h2 is None else h2 + part
    h2 = h2 + b2_ref[...]
    h2 = jnp.where(h2 >= 0.0, h2, 0.2 * h2)

    # ---- out = c2(c1(x)) + residual(x); add in f32, lane-dense bf16 store ----
    o_ref[...] = (h2 + res).reshape(TH, W, Cp_out).astype(o_ref.dtype)


def gblock_forward(x_nchw, params, *, tile_h=None, out_dtype=jnp.bfloat16):
    """x_nchw: (N, Cin, H, W) float32 (PyTorch layout). Returns (N, Cout, H, W)
    in `out_dtype` (bf16 by default: downstream GBlocks consume bf16 and it
    halves the kernel's HBM write traffic)."""
    w1, b1, w2, b2, wr, br = params
    N, Cin, H, W = x_nchw.shape
    Cout = w1.shape[-1]

    Cp_in = _round_up(Cin, 128)        # lane-dense channel padding
    Cp_out = _round_up(Cout, 128)

    # Per-generation VMEM budget: v5e/v6e have 128 MiB physical, v7x 64 MiB/TC.
    vmem_cap = _vmem_capacity_bytes()
    vmem_limit = min(int(0.75 * vmem_cap), 100 * 1024 * 1024)
    weight_bytes = (10 * Cp_in * Cp_out + 9 * Cp_out * Cp_out) * 2 + 3 * Cp_out * 4
    budget = max(int(0.8 * (vmem_limit - weight_bytes)), 1 << 20)

    if tile_h is None:
        TH = _pick_tile_h(H, W, Cp_in, Cp_out, budget)
    else:
        if H % tile_h != 0:
            raise ValueError(f"tile_h={tile_h} must divide H={H}")
        TH = tile_h
    n_t = H // TH

    # NCHW -> NHWC once at the API boundary; bf16 activations for the MXU.
    x = jnp.transpose(x_nchw, (0, 2, 3, 1)).astype(jnp.bfloat16)
    # 2 zero rows top/bottom, 1 zero col left/right ('same' pad for the two 3x3
    # convs), zero-pad channels up to Cp_in.
    x = jnp.pad(x, ((0, 0), (2, 2), (1, 1), (0, Cp_in - Cin)))
    # Non-overlapping (TH+4)-row halo slabs -> (N, n_t, TH+4, W+2, Cp_in).
    # Per-step x VMEM is now O(TH*W*Cp_in) (auto double-buffered / prefetched)
    # instead of the whole image; the duplicated halo rows cost 4/TH extra HBM,
    # a cheap trade for keeping both grid axes megacore-'parallel'.
    rows = (jnp.arange(n_t, dtype=jnp.int32)[:, None] * TH
            + jnp.arange(TH + 4, dtype=jnp.int32)[None, :])
    slabs = x[:, rows]

    # Weights: pad channels to lane multiples, fold the 3x3 taps into the leading
    # contraction dim (tap-major layout matching the kernel slices), cast bf16.
    w1p = jnp.pad(w1, ((0, 0), (0, 0), (0, Cp_in - Cin), (0, Cp_out - Cout)))
    w1p = w1p.reshape(9 * Cp_in, Cp_out).astype(jnp.bfloat16)
    w2p = jnp.pad(w2, ((0, 0), (0, 0), (0, Cp_out - Cout), (0, Cp_out - Cout)))
    w2p = w2p.reshape(9 * Cp_out, Cp_out).astype(jnp.bfloat16)
    wrp = jnp.pad(wr, ((0, Cp_in - Cin), (0, Cp_out - Cout))).astype(jnp.bfloat16)
    b1p = jnp.pad(b1, ((0, 0), (0, Cp_out - Cout))).astype(jnp.float32)
    b2p = jnp.pad(b2, ((0, 0), (0, Cp_out - Cout))).astype(jnp.float32)
    brp = jnp.pad(br, ((0, 0), (0, Cp_out - Cout))).astype(jnp.float32)

    # Grid-invariant weights/biases: whole-array VMEM residents (single copy,
    # no pointless double-buffering of operands whose block index never changes).
    resident = pl.BlockSpec(memory_space=pltpu.MemorySpace.VMEM)

    out_nhwc = pl.pallas_call(
        _gblock_kernel,
        out_shape=jax.ShapeDtypeStruct((N, H, W, Cp_out), out_dtype),
        grid_spec=pltpu.PrefetchScalarGridSpec(
            num_scalar_prefetch=0,
            grid=(N, n_t),
            in_specs=[
                # One halo slab per grid step (block index changes with (n, t),
                # so Pallas prefetches slab (n, t+1) while computing (n, t)).
                pl.BlockSpec((None, None, TH + 4, W + 2, Cp_in),
                             lambda n, t: (n, t, 0, 0, 0)),
                resident,  # w1
                resident,  # b1
                resident,  # w2
                resident,  # b2
                resident,  # wr
                resident,  # br
            ],
            out_specs=pl.BlockSpec((None, TH, W, Cp_out), lambda n, t: (n, t, 0, 0)),
            scratch_shapes=[pltpu.VMEM((TH + 2, W + 2, Cp_out), jnp.bfloat16)],
        ),
        compiler_params=pltpu.CompilerParams(
            dimension_semantics=("parallel", "parallel"),
            vmem_limit_bytes=vmem_limit,
        ),
    )(slabs, w1p, b1p, w2p, b2p, wrp, brp)

    # Strip the channel padding, return PyTorch NCHW layout.
    return jnp.transpose(out_nhwc[..., :Cout], (0, 3, 1, 2)).astype(out_dtype)


def init_params(key, ch_in, ch_out):
    """Deterministic synthetic params (HWIO weights). The equalized-LR scale
    sqrt(2/fan_in) is folded into the stored weights."""
    k1, k2, k3, k4, k5, k6 = jax.random.split(key, 6)
    w1 = jax.random.normal(k1, (3, 3, ch_in, ch_out), jnp.float32)
    w1 = w1 * math.sqrt(2.0 / (ch_in * 9))
    b1 = jax.random.normal(k4, (1, ch_out), jnp.float32) * 0.1
    w2 = jax.random.normal(k2, (3, 3, ch_out, ch_out), jnp.float32)
    w2 = w2 * math.sqrt(2.0 / (ch_out * 9))
    b2 = jax.random.normal(k5, (1, ch_out), jnp.float32) * 0.1
    wr = jax.random.normal(k3, (ch_in, ch_out), jnp.float32)
    wr = wr * math.sqrt(2.0 / ch_in)
    br = jax.random.normal(k6, (1, ch_out), jnp.float32) * 0.1
    return (w1, b1, w2, b2, wr, br)


def gblock_reference(x_nchw, params):
    """Pure-JAX f32 reference (lax conv) for the correctness check."""
    w1, b1, w2, b2, wr, br = params
    x = jnp.transpose(x_nchw, (0, 2, 3, 1))  # NHWC

    def conv(x, w, b, pad):
        y = jax.lax.conv_general_dilated(
            x, w, window_strides=(1, 1), padding=[(pad, pad), (pad, pad)],
            dimension_numbers=("NHWC", "HWIO", "NHWC"),
            preferred_element_type=jnp.float32)
        return y + b.reshape(1, 1, 1, -1)

    def lrelu(v):
        return jnp.where(v >= 0, v, 0.2 * v)

    h = lrelu(conv(x, w1, b1, 1))
    h = lrelu(conv(h, w2, b2, 1))
    r = conv(x, wr.reshape(1, 1, *wr.shape), br, 0)
    out = h + r
    return jnp.transpose(out, (0, 3, 1, 2))


if __name__ == "__main__":
    N, Cin, Cout, H, W = 2, 4, 8, 16, 16
    key = jax.random.PRNGKey(0)
    kx, kp = jax.random.split(key)
    x = jax.random.normal(kx, (N, Cin, H, W), jnp.float32)
    params = init_params(kp, Cin, Cout)

    # Auto tile selection (TH=8 here -> 2 row tiles) plus a forced 4-tile run so
    # the interior-tile path (neither border pl.when fires) is also exercised.
    out_auto = jax.block_until_ready(gblock_forward(x, params))
    out_4 = jax.block_until_ready(gblock_forward(x, params, tile_h=4))

    ref = gblock_reference(x, params)
    # The kernel stores bf16; compare against the f32 reference quantized the
    # same way.  Tolerance sized for bf16 MXU operands with f32 accumulation.
    ref_q = ref.astype(jnp.bfloat16).astype(jnp.float32)

    assert out_auto.shape == (N, Cout, H, W)
    assert out_auto.dtype == jnp.bfloat16
    for out in (out_auto, out_4):
        o32 = out.astype(jnp.float32)
        max_err = float(jnp.max(jnp.abs(o32 - ref_q)))
        assert jnp.allclose(o32, ref_q, rtol=5e-2, atol=5e-2), max_err

    print("KERNEL_OK")
</pallas_src>

<mosaic_0001>
module attributes {stable_mosaic.version = 11 : i64} {
  func.func @_gblock_kernel(%arg0: i32, %arg1: i32, %arg2: memref<1x1x12x18x128xbf16, #tpu.memory_space<vmem>>, %arg3: memref<1152x128xbf16, #tpu.memory_space<vmem>>, %arg4: memref<1x128xf32, #tpu.memory_space<vmem>>, %arg5: memref<1152x128xbf16, #tpu.memory_space<vmem>>, %arg6: memref<1x128xf32, #tpu.memory_space<vmem>>, %arg7: memref<128x128xbf16, #tpu.memory_space<vmem>>, %arg8: memref<1x128xf32, #tpu.memory_space<vmem>>, %arg9: memref<1x8x16x128xbf16, #tpu.memory_space<vmem>>, %arg10: memref<10x18x128xbf16, #tpu.memory_space<vmem>>) attributes {dimension_semantics = [#tpu.dimension_semantics<parallel>, #tpu.dimension_semantics<parallel>], iteration_bounds = array<i64: 2, 2>, scalar_prefetch = 0 : i64, scratch_operands = 1 : i64, tpu.core_type = #tpu.core_type<tc>, window_params = [{transform_indices = @transform_0, window_bounds = array<i64: 1, 1, 12, 18, 128>}, {pipeline_mode = #tpu.pipeline_mode<synchronous>, transform_indices = @transform_1, window_bounds = array<i64: 1152, 128>}, {pipeline_mode = #tpu.pipeline_mode<synchronous>, transform_indices = @transform_2, window_bounds = array<i64: 1, 128>}, {pipeline_mode = #tpu.pipeline_mode<synchronous>, transform_indices = @transform_3, window_bounds = array<i64: 1152, 128>}, {pipeline_mode = #tpu.pipeline_mode<synchronous>, transform_indices = @transform_4, window_bounds = array<i64: 1, 128>}, {pipeline_mode = #tpu.pipeline_mode<synchronous>, transform_indices = @transform_5, window_bounds = array<i64: 128, 128>}, {pipeline_mode = #tpu.pipeline_mode<synchronous>, transform_indices = @transform_6, window_bounds = array<i64: 1, 128>}, {transform_indices = @transform_7, window_bounds = array<i64: 1, 8, 16, 128>}]} {
    %c0 = arith.constant 0 : index
    %c0_0 = arith.constant 0 : index
    %c0_1 = arith.constant 0 : index
    %c0_2 = arith.constant 0 : index
    %c0_3 = arith.constant 0 : index
    %0 = vector.load %arg2[%c0, %c0_0, %c0_1, %c0_2, %c0_3] : memref<1x1x12x18x128xbf16, #tpu.memory_space<vmem>>, vector<1x1x10x16x128xbf16>
    %1 = vector.shape_cast %0 : vector<1x1x10x16x128xbf16> to vector<10x16x128xbf16>
    %2 = vector.shape_cast %1 : vector<10x16x128xbf16> to vector<160x128xbf16>
    %c0_4 = arith.constant 0 : index
    %c0_5 = arith.constant 0 : index
    %3 = vector.load %arg3[%c0_4, %c0_5] : memref<1152x128xbf16, #tpu.memory_space<vmem>>, vector<128x128xbf16>
    %cst = arith.constant dense<0.000000e+00> : vector<160x128xf32>
    %4 = tpu.matmul %2, %3, %cst {dimension_numbers = #tpu.dot_dimension_numbers<[1], [0], [0], [1], [0, 0, 1, 1], [], []>} : vector<160x128xbf16>, vector<128x128xbf16>, vector<160x128xf32> -> vector<160x128xf32>
    %c0_6 = arith.constant 0 : index
    %c0_7 = arith.constant 0 : index
    %c0_8 = arith.constant 0 : index
    %c1 = arith.constant 1 : index
    %c0_9 = arith.constant 0 : index
    %5 = vector.load %arg2[%c0_6, %c0_7, %c0_8, %c1, %c0_9] : memref<1x1x12x18x128xbf16, #tpu.memory_space<vmem>>, vector<1x1x10x16x128xbf16>
    %6 = vector.shape_cast %5 : vector<1x1x10x16x128xbf16> to vector<10x16x128xbf16>
    %7 = vector.shape_cast %6 : vector<10x16x128xbf16> to vector<160x128xbf16>
    %c128 = arith.constant 128 : index
    %c0_10 = arith.constant 0 : index
    %8 = vector.load %arg3[%c128, %c0_10] : memref<1152x128xbf16, #tpu.memory_space<vmem>>, vector<128x128xbf16>
    %cst_11 = arith.constant dense<0.000000e+00> : vector<160x128xf32>
    %9 = tpu.matmul %7, %8, %cst_11 {dimension_numbers = #tpu.dot_dimension_numbers<[1], [0], [0], [1], [0, 0, 1, 1], [], []>} : vector<160x128xbf16>, vector<128x128xbf16>, vector<160x128xf32> -> vector<160x128xf32>
    %10 = arith.addf %4, %9 : vector<160x128xf32>
    %c0_12 = arith.constant 0 : index
    %c0_13 = arith.constant 0 : index
    %c0_14 = arith.constant 0 : index
    %c2 = arith.constant 2 : index
    %c0_15 = arith.constant 0 : index
    %11 = vector.load %arg2[%c0_12, %c0_13, %c0_14, %c2, %c0_15] : memref<1x1x12x18x128xbf16, #tpu.memory_space<vmem>>, vector<1x1x10x16x128xbf16>
    %12 = vector.shape_cast %11 : vector<1x1x10x16x128xbf16> to vector<10x16x128xbf16>
    %13 = vector.shape_cast %12 : vector<10x16x128xbf16> to vector<160x128xbf16>
    %c256 = arith.constant 256 : index
    %c0_16 = arith.constant 0 : index
    %14 = vector.load %arg3[%c256, %c0_16] : memref<1152x128xbf16, #tpu.memory_space<vmem>>, vector<128x128xbf16>
    %cst_17 = arith.constant dense<0.000000e+00> : vector<160x128xf32>
    %15 = tpu.matmul %13, %14, %cst_17 {dimension_numbers = #tpu.dot_dimension_numbers<[1], [0], [0], [1], [0, 0, 1, 1], [], []>} : vector<160x128xbf16>, vector<128x128xbf16>, vector<160x128xf32> -> vector<160x128xf32>
    %16 = arith.addf %10, %15 : vector<160x128xf32>
    %c0_18 = arith.constant 0 : index
    %c0_19 = arith.constant 0 : index
    %c1_20 = arith.constant 1 : index
    %c0_21 = arith.constant 0 : index
    %c0_22 = arith.constant 0 : index
    %17 = vector.load %arg2[%c0_18, %c0_19, %c1_20, %c0_21, %c0_22] : memref<1x1x12x18x128xbf16, #tpu.memory_space<vmem>>, vector<1x1x10x16x128xbf16>
    %18 = vector.shape_cast %17 : vector<1x1x10x16x128xbf16> to vector<10x16x128xbf16>
    %19 = vector.shape_cast %18 : vector<10x16x128xbf16> to vector<160x128xbf16>
    %c384 = arith.constant 384 : index
    %c0_23 = arith.constant 0 : index
    %20 = vector.load %arg3[%c384, %c0_23] : memref<1152x128xbf16, #tpu.memory_space<vmem>>, vector<128x128xbf16>
    %cst_24 = arith.constant dense<0.000000e+00> : vector<160x128xf32>
    %21 = tpu.matmul %19, %20, %cst_24 {dimension_numbers = #tpu.dot_dimension_numbers<[1], [0], [0], [1], [0, 0, 1, 1], [], []>} : vector<160x128xbf16>, vector<128x128xbf16>, vector<160x128xf32> -> vector<160x128xf32>
    %22 = arith.addf %16, %21 : vector<160x128xf32>
    %c0_25 = arith.constant 0 : index
    %c0_26 = arith.constant 0 : index
    %c1_27 = arith.constant 1 : index
    %c1_28 = arith.constant 1 : index
    %c0_29 = arith.constant 0 : index
    %23 = vector.load %arg2[%c0_25, %c0_26, %c1_27, %c1_28, %c0_29] : memref<1x1x12x18x128xbf16, #tpu.memory_space<vmem>>, vector<1x1x10x16x128xbf16>
    %24 = vector.shape_cast %23 : vector<1x1x10x16x128xbf16> to vector<10x16x128xbf16>
    %25 = vector.shape_cast %24 : vector<10x16x128xbf16> to vector<160x128xbf16>
    %c512 = arith.constant 512 : index
    %c0_30 = arith.constant 0 : index
    %26 = vector.load %arg3[%c512, %c0_30] : memref<1152x128xbf16, #tpu.memory_space<vmem>>, vector<128x128xbf16>
    %cst_31 = arith.constant dense<0.000000e+00> : vector<160x128xf32>
    %27 = tpu.matmul %25, %26, %cst_31 {dimension_numbers = #tpu.dot_dimension_numbers<[1], [0], [0], [1], [0, 0, 1, 1], [], []>} : vector<160x128xbf16>, vector<128x128xbf16>, vector<160x128xf32> -> vector<160x128xf32>
    %28 = arith.addf %22, %27 : vector<160x128xf32>
    %c0_32 = arith.constant 0 : index
    %c0_33 = arith.constant 0 : index
    %c1_34 = arith.constant 1 : index
    %c2_35 = arith.constant 2 : index
    %c0_36 = arith.constant 0 : index
    %29 = vector.load %arg2[%c0_32, %c0_33, %c1_34, %c2_35, %c0_36] : memref<1x1x12x18x128xbf16, #tpu.memory_space<vmem>>, vector<1x1x10x16x128xbf16>
    %30 = vector.shape_cast %29 : vector<1x1x10x16x128xbf16> to vector<10x16x128xbf16>
    %31 = vector.shape_cast %30 : vector<10x16x128xbf16> to vector<160x128xbf16>
    %c640 = arith.constant 640 : index
    %c0_37 = arith.constant 0 : index
    %32 = vector.load %arg3[%c640, %c0_37] : memref<1152x128xbf16, #tpu.memory_space<vmem>>, vector<128x128xbf16>
    %cst_38 = arith.constant dense<0.000000e+00> : vector<160x128xf32>
    %33 = tpu.matmul %31, %32, %cst_38 {dimension_numbers = #tpu.dot_dimension_numbers<[1], [0], [0], [1], [0, 0, 1, 1], [], []>} : vector<160x128xbf16>, vector<128x128xbf16>, vector<160x128xf32> -> vector<160x128xf32>
    %34 = arith.addf %28, %33 : vector<160x128xf32>
    %c0_39 = arith.constant 0 : index
    %c0_40 = arith.constant 0 : index
    %c2_41 = arith.constant 2 : index
    %c0_42 = arith.constant 0 : index
    %c0_43 = arith.constant 0 : index
    %35 = vector.load %arg2[%c0_39, %c0_40, %c2_41, %c0_42, %c0_43] : memref<1x1x12x18x128xbf16, #tpu.memory_space<vmem>>, vector<1x1x10x16x128xbf16>
    %36 = vector.shape_cast %35 : vector<1x1x10x16x128xbf16> to vector<10x16x128xbf16>
    %37 = vector.shape_cast %36 : vector<10x16x128xbf16> to vector<160x128xbf16>
    %c768 = arith.constant 768 : index
    %c0_44 = arith.constant 0 : index
    %38 = vector.load %arg3[%c768, %c0_44] : memref<1152x128xbf16, #tpu.memory_space<vmem>>, vector<128x128xbf16>
    %cst_45 = arith.constant dense<0.000000e+00> : vector<160x128xf32>
    %39 = tpu.matmul %37, %38, %cst_45 {dimension_numbers = #tpu.dot_dimension_numbers<[1], [0], [0], [1], [0, 0, 1, 1], [], []>} : vector<160x128xbf16>, vector<128x128xbf16>, vector<160x128xf32> -> vector<160x128xf32>
    %40 = arith.addf %34, %39 : vector<160x128xf32>
    %c0_46 = arith.constant 0 : index
    %c0_47 = arith.constant 0 : index
    %c2_48 = arith.constant 2 : index
    %c1_49 = arith.constant 1 : index
    %c0_50 = arith.constant 0 : index
    %41 = vector.load %arg2[%c0_46, %c0_47, %c2_48, %c1_49, %c0_50] : memref<1x1x12x18x128xbf16, #tpu.memory_space<vmem>>, vector<1x1x10x16x128xbf16>
    %42 = vector.shape_cast %41 : vector<1x1x10x16x128xbf16> to vector<10x16x128xbf16>
    %43 = vector.shape_cast %42 : vector<10x16x128xbf16> to vector<160x128xbf16>
    %c896 = arith.constant 896 : index
    %c0_51 = arith.constant 0 : index
    %44 = vector.load %arg3[%c896, %c0_51] : memref<1152x128xbf16, #tpu.memory_space<vmem>>, vector<128x128xbf16>
    %cst_52 = arith.constant dense<0.000000e+00> : vector<160x128xf32>
    %45 = tpu.matmul %43, %44, %cst_52 {dimension_numbers = #tpu.dot_dimension_numbers<[1], [0], [0], [1], [0, 0, 1, 1], [], []>} : vector<160x128xbf16>, vector<128x128xbf16>, vector<160x128xf32> -> vector<160x128xf32>
    %46 = arith.addf %40, %45 : vector<160x128xf32>
    %c0_53 = arith.constant 0 : index
    %c0_54 = arith.constant 0 : index
    %c2_55 = arith.constant 2 : index
    %c2_56 = arith.constant 2 : index
    %c0_57 = arith.constant 0 : index
    %47 = vector.load %arg2[%c0_53, %c0_54, %c2_55, %c2_56, %c0_57] : memref<1x1x12x18x128xbf16, #tpu.memory_space<vmem>>, vector<1x1x10x16x128xbf16>
    %48 = vector.shape_cast %47 : vector<1x1x10x16x128xbf16> to vector<10x16x128xbf16>
    %49 = vector.shape_cast %48 : vector<10x16x128xbf16> to vector<160x128xbf16>
    %c1024 = arith.constant 1024 : index
    %c0_58 = arith.constant 0 : index
    %50 = vector.load %arg3[%c1024, %c0_58] : memref<1152x128xbf16, #tpu.memory_space<vmem>>, vector<128x128xbf16>
    %cst_59 = arith.constant dense<0.000000e+00> : vector<160x128xf32>
    %51 = tpu.matmul %49, %50, %cst_59 {dimension_numbers = #tpu.dot_dimension_numbers<[1], [0], [0], [1], [0, 0, 1, 1], [], []>} : vector<160x128xbf16>, vector<128x128xbf16>, vector<160x128xf32> -> vector<160x128xf32>
    %52 = arith.addf %46, %51 : vector<160x128xf32>
    %c0_60 = arith.constant 0 : index
    %c0_61 = arith.constant 0 : index
    %53 = vector.load %arg4[%c0_60, %c0_61] : memref<1x128xf32, #tpu.memory_space<vmem>>, vector<1x128xf32>
    %54 = vector.broadcast %53 : vector<1x128xf32> to vector<160x128xf32>
    %55 = arith.addf %52, %54 : vector<160x128xf32>
    %cst_62 = arith.constant 0.000000e+00 : f32
    %56 = vector.broadcast %cst_62 : f32 to vector<160x128xf32>
    %57 = arith.cmpf oge, %55, %56 : vector<160x128xf32>
    %cst_63 = arith.constant 2.000000e-01 : f32
    %58 = vector.broadcast %cst_63 : f32 to vector<160x128xf32>
    %59 = arith.mulf %58, %55 : vector<160x128xf32>
    %60 = arith.select %57, %55, %59 : vector<160x128xi1>, vector<160x128xf32>
    %c0_64 = arith.constant 0 : index
    %c0_65 = arith.constant 0 : index
    %c2_66 = arith.constant 2 : index
    %c1_67 = arith.constant 1 : index
    %c0_68 = arith.constant 0 : index
    %61 = vector.load %arg2[%c0_64, %c0_65, %c2_66, %c1_67, %c0_68] : memref<1x1x12x18x128xbf16, #tpu.memory_space<vmem>>, vector<1x1x8x16x128xbf16>
    %62 = vector.shape_cast %61 : vector<1x1x8x16x128xbf16> to vector<8x16x128xbf16>
    %63 = vector.shape_cast %62 : vector<8x16x128xbf16> to vector<128x128xbf16>
    %c0_69 = arith.constant 0 : index
    %c0_70 = arith.constant 0 : index
    %64 = vector.load %arg7[%c0_69, %c0_70] : memref<128x128xbf16, #tpu.memory_space<vmem>>, vector<128x128xbf16>
    %cst_71 = arith.constant dense<0.000000e+00> : vector<128x128xf32>
    %65 = tpu.matmul %63, %64, %cst_71 {dimension_numbers = #tpu.dot_dimension_numbers<[1], [0], [0], [1], [0, 0, 1, 1], [], []>} : vector<128x128xbf16>, vector<128x128xbf16>, vector<128x128xf32> -> vector<128x128xf32>
    %c0_72 = arith.constant 0 : index
    %c0_73 = arith.constant 0 : index
    %66 = vector.load %arg8[%c0_72, %c0_73] : memref<1x128xf32, #tpu.memory_space<vmem>>, vector<1x128xf32>
    %67 = vector.broadcast %66 : vector<1x128xf32> to vector<128x128xf32>
    %68 = arith.addf %65, %67 : vector<128x128xf32>
    %69 = vector.shape_cast %60 : vector<160x128xf32> to vector<10x16x128xf32>
    %70 = arith.truncf %69 : vector<10x16x128xf32> to vector<10x16x128xbf16>
    %c0_74 = arith.constant 0 : index
    %c1_75 = arith.constant 1 : index
    %c0_76 = arith.constant 0 : index
    %71 = vector.load %arg10[%c0_74, %c1_75, %c0_76] : memref<10x18x128xbf16, #tpu.memory_space<vmem>>, vector<10x16x128xbf16>
    tpu.vector_store %arg10[%c0_74, %c1_75, %c0_76], %70 {strides = array<i32>} : memref<10x18x128xbf16, #tpu.memory_space<vmem>>, vector<10x16x128xbf16>,
    %cst_77 = arith.constant 0.000000e+00 : bf16
    %72 = vector.broadcast %cst_77 : bf16 to vector<10x1x128xbf16>
    %c0_78 = arith.constant 0 : index
    %c0_79 = arith.constant 0 : index
    %c0_80 = arith.constant 0 : index
    %73 = vector.load %arg10[%c0_78, %c0_79, %c0_80] : memref<10x18x128xbf16, #tpu.memory_space<vmem>>, vector<10x1x128xbf16>
    tpu.vector_store %arg10[%c0_78, %c0_79, %c0_80], %72 {strides = array<i32>} : memref<10x18x128xbf16, #tpu.memory_space<vmem>>, vector<10x1x128xbf16>,
    %cst_81 = arith.constant 0.000000e+00 : bf16
    %74 = vector.broadcast %cst_81 : bf16 to vector<10x1x128xbf16>
    %c0_82 = arith.constant 0 : index
    %c17 = arith.constant 17 : index
    %c0_83 = arith.constant 0 : index
    %75 = vector.load %arg10[%c0_82, %c17, %c0_83] : memref<10x18x128xbf16, #tpu.memory_space<vmem>>, vector<10x1x128xbf16>
    tpu.vector_store %arg10[%c0_82, %c17, %c0_83], %74 {strides = array<i32>} : memref<10x18x128xbf16, #tpu.memory_space<vmem>>, vector<10x1x128xbf16>,
    %c0_i32 = arith.constant 0 : i32
    %76 = arith.cmpi eq, %arg1, %c0_i32 : i32
    %77 = arith.extui %76 : i1 to i32
    %c0_i32_84 = arith.constant 0 : i32
    %78 = arith.cmpi ne, %77, %c0_i32_84 : i32
    scf.if %78 {
      %cst_148 = arith.constant 0.000000e+00 : bf16
      %140 = vector.broadcast %cst_148 : bf16 to vector<1x18x128xbf16>
      %c0_149 = arith.constant 0 : index
      %c0_150 = arith.constant 0 : index
      %c0_151 = arith.constant 0 : index
      %141 = vector.load %arg10[%c0_149, %c0_150, %c0_151] : memref<10x18x128xbf16, #tpu.memory_space<vmem>>, vector<1x18x128xbf16>
      tpu.vector_store %arg10[%c0_149, %c0_150, %c0_151], %140 {strides = array<i32>} : memref<10x18x128xbf16, #tpu.memory_space<vmem>>, vector<1x18x128xbf16>,
    } else {
    }
    %c1_i32 = arith.constant 1 : i32
    %79 = arith.cmpi eq, %arg1, %c1_i32 : i32
    %80 = arith.extui %79 : i1 to i32
    %c0_i32_85 = arith.constant 0 : i32
    %81 = arith.cmpi ne, %80, %c0_i32_85 : i32
    scf.if %81 {
      %cst_148 = arith.constant 0.000000e+00 : bf16
      %140 = vector.broadcast %cst_148 : bf16 to vector<1x18x128xbf16>
      %c9 = arith.constant 9 : index
      %c0_149 = arith.constant 0 : index
      %c0_150 = arith.constant 0 : index
      %141 = vector.load %arg10[%c9, %c0_149, %c0_150] : memref<10x18x128xbf16, #tpu.memory_space<vmem>>, vector<1x18x128xbf16>
      tpu.vector_store %arg10[%c9, %c0_149, %c0_150], %140 {strides = array<i32>} : memref<10x18x128xbf16, #tpu.memory_space<vmem>>, vector<1x18x128xbf16>,
    } else {
    }
    %c0_86 = arith.constant 0 : index
    %c0_87 = arith.constant 0 : index
    %c0_88 = arith.constant 0 : index
    %82 = vector.load %arg10[%c0_86, %c0_87, %c0_88] : memref<10x18x128xbf16, #tpu.memory_space<vmem>>, vector<8x16x128xbf16>
    %83 = vector.shape_cast %82 : vector<8x16x128xbf16> to vector<128x128xbf16>
    %c0_89 = arith.constant 0 : index
    %c0_90 = arith.constant 0 : index
    %84 = vector.load %arg5[%c0_89, %c0_90] : memref<1152x128xbf16, #tpu.memory_space<vmem>>, vector<128x128xbf16>
    %cst_91 = arith.constant dense<0.000000e+00> : vector<128x128xf32>
    %85 = tpu.matmul %83, %84, %cst_91 {dimension_numbers = #tpu.dot_dimension_numbers<[1], [0], [0], [1], [0, 0, 1, 1], [], []>} : vector<128x128xbf16>, vector<128x128xbf16>, vector<128x128xf32> -> vector<128x128xf32>
    %c0_92 = arith.constant 0 : index
    %c1_93 = arith.constant 1 : index
    %c0_94 = arith.constant 0 : index
    %86 = vector.load %arg10[%c0_92, %c1_93, %c0_94] : memref<10x18x128xbf16, #tpu.memory_space<vmem>>, vector<8x16x128xbf16>
    %87 = vector.shape_cast %86 : vector<8x16x128xbf16> to vector<128x128xbf16>
    %c128_95 = arith.constant 128 : index
    %c0_96 = arith.constant 0 : index
    %88 = vector.load %arg5[%c128_95, %c0_96] : memref<1152x128xbf16, #tpu.memory_space<vmem>>, vector<128x128xbf16>
    %cst_97 = arith.constant dense<0.000000e+00> : vector<128x128xf32>
    %89 = tpu.matmul %87, %88, %cst_97 {dimension_numbers = #tpu.dot_dimension_numbers<[1], [0], [0], [1], [0, 0, 1, 1], [], []>} : vector<128x128xbf16>, vector<128x128xbf16>, vector<128x128xf32> -> vector<128x128xf32>
    %90 = arith.addf %85, %89 : vector<128x128xf32>
    %c0_98 = arith.constant 0 : index
    %c2_99 = arith.constant 2 : index
    %c0_100 = arith.constant 0 : index
    %91 = vector.load %arg10[%c0_98, %c2_99, %c0_100] : memref<10x18x128xbf16, #tpu.memory_space<vmem>>, vector<8x16x128xbf16>
    %92 = vector.shape_cast %91 : vector<8x16x128xbf16> to vector<128x128xbf16>
    %c256_101 = arith.constant 256 : index
    %c0_102 = arith.constant 0 : index
    %93 = vector.load %arg5[%c256_101, %c0_102] : memref<1152x128xbf16, #tpu.memory_space<vmem>>, vector<128x128xbf16>
    %cst_103 = arith.constant dense<0.000000e+00> : vector<128x128xf32>
    %94 = tpu.matmul %92, %93, %cst_103 {dimension_numbers = #tpu.dot_dimension_numbers<[1], [0], [0], [1], [0, 0, 1, 1], [], []>} : vector<128x128xbf16>, vector<128x128xbf16>, vector<128x128xf32> -> vector<128x128xf32>
    %95 = arith.addf %90, %94 : vector<128x128xf32>
    %c1_104 = arith.constant 1 : index
    %c0_105 = arith.constant 0 : index
    %c0_106 = arith.constant 0 : index
    %96 = vector.load %arg10[%c1_104, %c0_105, %c0_106] : memref<10x18x128xbf16, #tpu.memory_space<vmem>>, vector<8x16x128xbf16>
    %97 = vector.shape_cast %96 : vector<8x16x128xbf16> to vector<128x128xbf16>
    %c384_107 = arith.constant 384 : index
    %c0_108 = arith.constant 0 : index
    %98 = vector.load %arg5[%c384_107, %c0_108] : memref<1152x128xbf16, #tpu.memory_space<vmem>>, vector<128x128xbf16>
    %cst_109 = arith.constant dense<0.000000e+00> : vector<128x128xf32>
    %99 = tpu.matmul %97, %98, %cst_109 {dimension_numbers = #tpu.dot_dimension_numbers<[1], [0], [0], [1], [0, 0, 1, 1], [], []>} : vector<128x128xbf16>, vector<128x128xbf16>, vector<128x128xf32> -> vector<128x128xf32>
    %100 = arith.addf %95, %99 : vector<128x128xf32>
    %c1_110 = arith.constant 1 : index
    %c1_111 = arith.constant 1 : index
    %c0_112 = arith.constant 0 : index
    %101 = vector.load %arg10[%c1_110, %c1_111, %c0_112] : memref<10x18x128xbf16, #tpu.memory_space<vmem>>, vector<8x16x128xbf16>
    %102 = vector.shape_cast %101 : vector<8x16x128xbf16> to vector<128x128xbf16>
    %c512_113 = arith.constant 512 : index
    %c0_114 = arith.constant 0 : index
    %103 = vector.load %arg5[%c512_113, %c0_114] : memref<1152x128xbf16, #tpu.memory_space<vmem>>, vector<128x128xbf16>
    %cst_115 = arith.constant dense<0.000000e+00> : vector<128x128xf32>
    %104 = tpu.matmul %102, %103, %cst_115 {dimension_numbers = #tpu.dot_dimension_numbers<[1], [0], [0], [1], [0, 0, 1, 1], [], []>} : vector<128x128xbf16>, vector<128x128xbf16>, vector<128x128xf32> -> vector<128x128xf32>
    %105 = arith.addf %100, %104 : vector<128x128xf32>
    %c1_116 = arith.constant 1 : index
    %c2_117 = arith.constant 2 : index
    %c0_118 = arith.constant 0 : index
    %106 = vector.load %arg10[%c1_116, %c2_117, %c0_118] : memref<10x18x128xbf16, #tpu.memory_space<vmem>>, vector<8x16x128xbf16>
    %107 = vector.shape_cast %106 : vector<8x16x128xbf16> to vector<128x128xbf16>
    %c640_119 = arith.constant 640 : index
    %c0_120 = arith.constant 0 : index
    %108 = vector.load %arg5[%c640_119, %c0_120] : memref<1152x128xbf16, #tpu.memory_space<vmem>>, vector<128x128xbf16>
    %cst_121 = arith.constant dense<0.000000e+00> : vector<128x128xf32>
    %109 = tpu.matmul %107, %108, %cst_121 {dimension_numbers = #tpu.dot_dimension_numbers<[1], [0], [0], [1], [0, 0, 1, 1], [], []>} : vector<128x128xbf16>, vector<128x128xbf16>, vector<128x128xf32> -> vector<128x128xf32>
    %110 = arith.addf %105, %109 : vector<128x128xf32>
    %c2_122 = arith.constant 2 : index
    %c0_123 = arith.constant 0 : index
    %c0_124 = arith.constant 0 : index
    %111 = vector.load %arg10[%c2_122, %c0_123, %c0_124] : memref<10x18x128xbf16, #tpu.memory_space<vmem>>, vector<8x16x128xbf16>
    %112 = vector.shape_cast %111 : vector<8x16x128xbf16> to vector<128x128xbf16>
    %c768_125 = arith.constant 768 : index
    %c0_126 = arith.constant 0 : index
    %113 = vector.load %arg5[%c768_125, %c0_126] : memref<1152x128xbf16, #tpu.memory_space<vmem>>, vector<128x128xbf16>
    %cst_127 = arith.constant dense<0.000000e+00> : vector<128x128xf32>
    %114 = tpu.matmul %112, %113, %cst_127 {dimension_numbers = #tpu.dot_dimension_numbers<[1], [0], [0], [1], [0, 0, 1, 1], [], []>} : vector<128x128xbf16>, vector<128x128xbf16>, vector<128x128xf32> -> vector<128x128xf32>
    %115 = arith.addf %110, %114 : vector<128x128xf32>
    %c2_128 = arith.constant 2 : index
    %c1_129 = arith.constant 1 : index
    %c0_130 = arith.constant 0 : index
    %116 = vector.load %arg10[%c2_128, %c1_129, %c0_130] : memref<10x18x128xbf16, #tpu.memory_space<vmem>>, vector<8x16x128xbf16>
    %117 = vector.shape_cast %116 : vector<8x16x128xbf16> to vector<128x128xbf16>
    %c896_131 = arith.constant 896 : index
    %c0_132 = arith.constant 0 : index
    %118 = vector.load %arg5[%c896_131, %c0_132] : memref<1152x128xbf16, #tpu.memory_space<vmem>>, vector<128x128xbf16>
    %cst_133 = arith.constant dense<0.000000e+00> : vector<128x128xf32>
    %119 = tpu.matmul %117, %118, %cst_133 {dimension_numbers = #tpu.dot_dimension_numbers<[1], [0], [0], [1], [0, 0, 1, 1], [], []>} : vector<128x128xbf16>, vector<128x128xbf16>, vector<128x128xf32> -> vector<128x128xf32>
    %120 = arith.addf %115, %119 : vector<128x128xf32>
    %c2_134 = arith.constant 2 : index
    %c2_135 = arith.constant 2 : index
    %c0_136 = arith.constant 0 : index
    %121 = vector.load %arg10[%c2_134, %c2_135, %c0_136] : memref<10x18x128xbf16, #tpu.memory_space<vmem>>, vector<8x16x128xbf16>
    %122 = vector.shape_cast %121 : vector<8x16x128xbf16> to vector<128x128xbf16>
    %c1024_137 = arith.constant 1024 : index
    %c0_138 = arith.constant 0 : index
    %123 = vector.load %arg5[%c1024_137, %c0_138] : memref<1152x128xbf16, #tpu.memory_space<vmem>>, vector<128x128xbf16>
    %cst_139 = arith.constant dense<0.000000e+00> : vector<128x128xf32>
    %124 = tpu.matmul %122, %123, %cst_139 {dimension_numbers = #tpu.dot_dimension_numbers<[1], [0], [0], [1], [0, 0, 1, 1], [], []>} : vector<128x128xbf16>, vector<128x128xbf16>, vector<128x128xf32> -> vector<128x128xf32>
    %125 = arith.addf %120, %124 : vector<128x128xf32>
    %c0_140 = arith.constant 0 : index
    %c0_141 = arith.constant 0 : index
    %126 = vector.load %arg6[%c0_140, %c0_141] : memref<1x128xf32, #tpu.memory_space<vmem>>, vector<1x128xf32>
    %127 = vector.broadcast %126 : vector<1x128xf32> to vector<128x128xf32>
    %128 = arith.addf %125, %127 : vector<128x128xf32>
    %cst_142 = arith.constant 0.000000e+00 : f32
    %129 = vector.broadcast %cst_142 : f32 to vector<128x128xf32>
    %130 = arith.cmpf oge, %128, %129 : vector<128x128xf32>
    %cst_143 = arith.constant 2.000000e-01 : f32
    %131 = vector.broadcast %cst_143 : f32 to vector<128x128xf32>
    %132 = arith.mulf %131, %128 : vector<128x128xf32>
    %133 = arith.select %130, %128, %132 : vector<128x128xi1>, vector<128x128xf32>
    %134 = arith.addf %133, %68 : vector<128x128xf32>
    %135 = vector.shape_cast %134 : vector<128x128xf32> to vector<8x16x128xf32>
    %136 = arith.truncf %135 : vector<8x16x128xf32> to vector<8x16x128xbf16>
    %c0_144 = arith.constant 0 : index
    %c0_145 = arith.constant 0 : index
    %c0_146 = arith.constant 0 : index
    %c0_147 = arith.constant 0 : index
    %137 = vector.load %arg9[%c0_144, %c0_145, %c0_146, %c0_147] : memref<1x8x16x128xbf16, #tpu.memory_space<vmem>>, vector<1x8x16x128xbf16>
    %138 = vector.shape_cast %137 : vector<1x8x16x128xbf16> to vector<8x16x128xbf16>
    %139 = vector.shape_cast %136 : vector<8x16x128xbf16> to vector<1x8x16x128xbf16>
    tpu.vector_store %arg9[%c0_144, %c0_145, %c0_146, %c0_147], %139 {strides = array<i32>} : memref<1x8x16x128xbf16, #tpu.memory_space<vmem>>, vector<1x8x16x128xbf16>,
    return
  }
  func.func @transform_0(%arg0: i32, %arg1: i32) -> (i32, i32, i32, i32, i32) {
    %c0_i32 = arith.constant 0 : i32
    %c0_i32_0 = arith.constant 0 : i32
    %c0_i32_1 = arith.constant 0 : i32
    %c0_i32_2 = arith.constant 0 : i32
    return %arg0, %arg1, %c0_i32, %c0_i32_0, %c0_i32_1 : i32, i32, i32, i32, i32
  }
  func.func @transform_1(%arg0: i32, %arg1: i32) -> (i32, i32) {
    %c0_i32 = arith.constant 0 : i32
    %c0_i32_0 = arith.constant 0 : i32
    %c0_i32_1 = arith.constant 0 : i32
    return %c0_i32, %c0_i32_0 : i32, i32
  }
  func.func @transform_2(%arg0: i32, %arg1: i32) -> (i32, i32) {
    %c0_i32 = arith.constant 0 : i32
    %c0_i32_0 = arith.constant 0 : i32
    %c0_i32_1 = arith.constant 0 : i32
    return %c0_i32, %c0_i32_0 : i32, i32
  }
  func.func @transform_3(%arg0: i32, %arg1: i32) -> (i32, i32) {
    %c0_i32 = arith.constant 0 : i32
    %c0_i32_0 = arith.constant 0 : i32
    %c0_i32_1 = arith.constant 0 : i32
    return %c0_i32, %c0_i32_0 : i32, i32
  }
  func.func @transform_4(%arg0: i32, %arg1: i32) -> (i32, i32) {
    %c0_i32 = arith.constant 0 : i32
    %c0_i32_0 = arith.constant 0 : i32
    %c0_i32_1 = arith.constant 0 : i32
    return %c0_i32, %c0_i32_0 : i32, i32
  }
  func.func @transform_5(%arg0: i32, %arg1: i32) -> (i32, i32) {
    %c0_i32 = arith.constant 0 : i32
    %c0_i32_0 = arith.constant 0 : i32
    %c0_i32_1 = arith.constant 0 : i32
    return %c0_i32, %c0_i32_0 : i32, i32
  }
  func.func @transform_6(%arg0: i32, %arg1: i32) -> (i32, i32) {
    %c0_i32 = arith.constant 0 : i32
    %c0_i32_0 = arith.constant 0 : i32
    %c0_i32_1 = arith.constant 0 : i32
    return %c0_i32, %c0_i32_0 : i32, i32
  }
  func.func @transform_7(%arg0: i32, %arg1: i32) -> (i32, i32, i32, i32) {
    %c0_i32 = arith.constant 0 : i32
    %c0_i32_0 = arith.constant 0 : i32
    %c0_i32_1 = arith.constant 0 : i32
    return %arg0, %arg1, %c0_i32, %c0_i32_0 : i32, i32, i32, i32
  }
}

</mosaic_0001>

<bundles_post_ra>
// kernel: tpu_custom_call.1
= control target key start
LH: loop header
LB: loop body
LE: loop exit
PB: predicated region body
PF: predicated region fallthrough
CT: control target
= control target key end

     0   :  { %s12237_s0 = inlined_call_operand.vmem [shape: bf16[2,2,12,18,128], index: 0, kind: input, shape index: {}]   ;;  %s12238_s1 = inlined_call_operand.vmem [shape: bf16[1152,128], index: 1, kind: input, shape index: {}]   ;;  %s12239_s2 = inlined_call_operand.vmem [shape: f32[1,128], index: 2, kind: input, shape index: {}]   ;;  %s12240_s3 = inlined_call_operand.hbm [shape: bf16[1152,128], index: 3, kind: input, shape index: {}]   ;;  %s12241_s4 = inlined_call_operand.vmem [shape: f32[1,128], index: 4, kind: input, shape index: {}]   ;;  %s12242_s5 = inlined_call_operand.vmem [shape: bf16[128,128], index: 5, kind: input, shape index: {}]   ;;  %s12243_s6 = inlined_call_operand.vmem [shape: f32[1,128], index: 6, kind: input, shape index: {}]   ;;  %s12244_s7 = inlined_call_operand.hbm [shape: bf16[2,16,16,128], index: 7, kind: output, shape index: {}]  }
   0x1   :  { %12253 = sst [smem:[#allocation41_spill]] %s12240_s3 }
   0x2   :  { %12 = vsyncpa [#allocation4], 0 }
   0x3   :  { %13 = vsyncpa [#allocation5], 0 }
   0x4   :  { %15 = vsyncpa [#allocation5 + $0x1], 0  ;;  %s9797_s24 = smov 0   ;;  %s9799_s25 = smov 0  }
   0x5   :  { %s9801_s26 = smov 0   ;;  %s9803_s27 = smov 0  }
   0x6   :  { %s9805_s28 = smov 0   ;;  %s9807_s29 = smov 0  }
   0x7   :  { %s9809_s30 = smov 0   ;;  %s9811_s8 = smov 0  }
   0x8 LB: > { %s7686_s9 = sadd.s32 4294967295, %s9747_s8   ;;  %s7687_s10 = sadd.s32 4294967294, %s9747_s8   ;;  %s9747_s8 = sphi %s9811_s8, %s21_s8   ;;  %s9743_s30 = sphi %s9809_s30, %s12374_s30   ;;  %s9739_s29 = sphi %s9807_s29, %s12373_s29   ;;  %s9735_s28 = sphi %s9805_s28, %s12372_s28   ;;  %s9731_s27 = sphi %s9803_s27, %s12371_s27   ;;  %s9727_s26 = sphi %s9801_s26, %s12370_s26   ;;  %s9723_s25 = sphi %s9799_s25, %s12369_s25   ;;  %s9719_s24 = sphi %s9797_s24, %s12368_s24  }
   0x9   : > { %s30_s11 = sadd.s32 1, %s9739_s29  ;;  %s33_s12 = sadd.s32 1, %s9743_s30 }
   0xa   : > { %p31_p0 = scmp.ge.s32.totalorder %s30_s11, 2  ;;  %s196_s13 = sadd.s32 1, %s9727_s26 }
   0xb   : > { %p206_p1 = scmp.ne.s32.totalorder %s9727_s26, %s9723_s25  ;;  %p207_p2 = scmp.eq.s32.totalorder %s7686_s9, 3 }
   0xc   : > { %s12376_s11 = smov (%p31_p0, %s30_s11), 0  ;;  %s12378_s12 = smov (!%p31_p0, %s33_s12), %s9743_s30 }
   0xd   : > { %12254 = sst [smem:[#allocation9_spill]] %s12376_s11  ;;  %s192_s14 = ssub.s32 %s9739_s29, %s12376_s11 }
   0xe   : > { %p9849_p3 = por %p207_p2, %p206_p1  ;;  %p35_p4 = scmp.ge.s32.totalorder %s12378_s12, 2 }
   0xf   : > { %p212_p5 = scmp.ne.s32.totalorder %s9723_s25, %s9719_s24  ;;  %p213_p6 = scmp.eq.s32.totalorder %s7687_s10, 3 }
  0x10   : > { %p7688_p7 = scmp.ge.s32.totalorder %s9747_s8, 1  ;;  %s12380_s12 = smov (%p35_p4, %s12378_s12), 0 }
  0x11   : > { %12256 = sst [smem:[#allocation10_spill]] %s12380_s12  ;;  %p9858_p8 = por %p213_p6, %p212_p5 }
  0x12   : > { %p220_p9 = scmp.lt.s32.totalorder %s9747_s8, 5  ;;  %s191_s17 = ssub.s32 %s9743_s30, %s12380_s12 }
  0x13   : > { %s193_s18 = sor.u32 %s192_s14, %s191_s17  ;;  %p9869_p12 = scmp.eq.s32.totalorder %s7686_s9, 0 }
  0x14   : > { %p9865_p10 = pnand %p7688_p7, %p220_p9  ;;  %p194_p11 = scmp.eq.s32.totalorder %s193_s18, 0 }
  0x15   : > { %s9749_s22 = smov [#allocation3]  }
  0x16   : > { %p9337_p13 = pneg %p9865_p10  ;;  %s238_s23 = sshll.u32 %s9749_s22, 4  ;;  %s239_s23 = int_to_ptr.vmem [resolvable:$true] %s238_s23 }
  0x17   : > { %s9876_s21 = scalar_select %p194_p11, %s9727_s26, %s196_s13  }
  0x18   : > { %p9880_p0 = pnand %p9869_p12, %p9337_p13  ;;  %s9636_s9 = scalar_lea.vmem %s239_s23, 9216 }
  0x19   : > { %p9637_p2 = scmp.ne.s32.totalorder %s239_s23, %s9636_s9  ;;  %p9644_p6 = scmp.lt.s32.totalorder %s239_s23, %s239_s23 }
  0x1a   : > { %p9627_p1 = pneg %p9880_p0  ;;  %p9645_p7 = scmp.lt.s32.totalorder %s9636_s9, %s9636_s9 }
  0x1c   : > { %p9639_p4 = pnand %p9637_p2, %p9627_p1  ;;  %p9646_p9 = por %p9645_p7, %p9644_p6 }
  0x1e   : > { %p9640_p5 = pneg %p9639_p4 }
  0x20   : > { %p9647_p11 = pnand %p9646_p9, %p9640_p5 }
  0x22   : > { %9650 = shalt.err (!%p9647_p11)
}
  0x23   : > { %s9750_s13 = smov 64   ;;  %s9751_s14 = smov 4  }
  0x24   : > { %s12261_s3 = sld [smem:[#allocation41_spill]] }
  0x26   : > { %275 = sbr.rel (%p9865_p10) target bundleno = 950 (0x3b6), region = 48 }
  0x2a   : > { %9340 = dma.hbm_to_vmem [thread:$0]  (!%p9880_p0), %s12261_s3, 9216, %s239_s23, [#allocation4], %s9750_s13, %s9750_s13, %s9751_s14  }
  0x2b   : > { %9710 = dma.done.wait (%p9869_p12), [#allocation4], 9216  }
  0x2c   : > { %9712 = vsyncadd (%p9869_p12), [#allocation4], 4294958080  ;;  %s12245_s22 = sand.u32 1, %s9723_s25   ;;  %p311_p13 = scmp.lt.s32.totalorder %s9735_s28, 1  ;;  %v9419_v0 = vld [vmem:[%s12238_s1 + $0x78] sm:$0xff]   ;;  %v9421_v2 = vld [vmem:[%s12238_s1 + $0x70] sm:$0xff]  }
  0x2d   : > { %s9900_s10 = sshll.u32 %s12245_s22, 6  ;;  %p313_p0 = scmp.lt.s32.totalorder %s9731_s27, 1  ;;  %v9420_v1 = vld [vmem:[%s12238_s1 + $0x38] sm:$0xff]   ;;  %8669 = vmatprep.subr.bf16.mxu0 %v9419_v0  ;;  %v9422_v3 = vld [vmem:[%s12238_s1 + $0x30] sm:$0xff]   ;;  %v9423_v4 = vld [vmem:[%s12238_s1 + $0x68] sm:$0xff]   ;;  %v12262_v39 = vmov 0 }
  0x2e   : > { %s312_s19 = scalar_select %p311_p13, %s9735_s28, 1  ;;  %8705 = vmatprep.subr.bf16.mxu1 %v9420_v1  ;;  %8670 = vmatpush3.bf16.msra.mxu0 %v9419_v0  ;;  %v9424_v5 = vld [vmem:[%s12238_s1 + $0x28] sm:$0xff]   ;;  %v9425_v6 = vld [vmem:[%s12238_s1 + $0x60] sm:$0xff]   ;;  %vm368_vm0 = vsmask.f32 3328  ;;  %v9427_v8 = vld [vmem:[%s12238_s1 + $0x58] sm:$0xff]  }
  0x2f   : > { %s314_s23 = scalar_select %p313_p0, %s9731_s27, 1  ;;  %8706 = vmatpush3.bf16.msra.mxu1 %v9420_v1  ;;  %8671 = vmatprep.subr.bf16.mxu0 %v9421_v2  ;;  %v9426_v7 = vld [vmem:[%s12238_s1 + $0x20] sm:$0xff]   ;;  %vm369_vm1 = vsmask.f32 7440  ;;  %v9428_v9 = vld [vmem:[%s12238_s1 + $0x18] sm:$0xff]   ;;  %v9429_v10 = vld [vmem:[%s12238_s1 + $0x50] sm:$0xff]  }
  0x30   : > { %s9330_s3 = smul.u32 72, %s312_s19  ;;  %8707 = vmatprep.subr.bf16.mxu1 %v9422_v3  ;;  %v9430_v11 = vld [vmem:[%s12238_s1 + $0x10] sm:$0xff]   ;;  %v9431_v20 = vld [vmem:[%s12238_s1 + $0x48] sm:$0xff]   ;;  %v9433_v38 = vld [vmem:[%s12238_s1 + $0x40] sm:$0xff]   ;;  %vm1079_vm3 = vcmask 1042432   ;;  %vm1080_vm4 = vcmask 1046532  }
  0x31   : > { %s9329_s11 = smul.u32 36, %s314_s23  ;;  %v9432_v33 = vld [vmem:[%s12238_s1 + $0x8] sm:$0xff]   ;;  %vm9983_vm2 = vmor %vm368_vm0, %vm369_vm1  ;;  %v9434_v53 = vld [vmem:[%s12238_s1] sm:$0xff]   ;;  %vm4419_vm6 = vcmask 1043456   ;;  %vm4420_vm7 = vsmask.f32 7938 }
  0x32   : > { %8672 = vmatpush3.bf16.msra.mxu0 %v9421_v2  ;;  %v12263_v39 = vsel %vm9983_vm2, 4294967295, %v12262_v39  ;;  %vm10210_vm5 = vmor %vm1079_vm3, %vm1080_vm4  ;;  %vm4216_vm9 = vsmask.f32 256  ;;  %vm4426_vm10 = vcmask 1040384   ;;  %vm4217_vm11 = vsmask.f32 4368 }
  0x33   : > { %s317_s19 = sadd.s32 %s9330_s3, %s9329_s11  ;;  %8708 = vmatpush3.bf16.msra.mxu1 %v9422_v3  ;;  %8673 = vmatprep.subr.bf16.mxu0 %v9423_v4  ;;  %12264 = vst [vmem:[#allocation11_spill] sm:$0xff] %v12263_v39  ;;  %vm11278_vm14 = vmand %vm4419_vm6, %vm4420_vm7  ;;  %p8069_p10 = scmp.ne.s32.totalorder %s9731_s27, 0 }
  0x34   : > { %8709 = vmatprep.subr.bf16.mxu1 %v9424_v5  ;;  %s7694_s23 = sshll.u32 %s317_s19, 2  ;;  %vm11287_vm1 = vmand %vm4426_vm10, %vm4216_vm9  ;;  %s11551_s19 = scalar_lea.vmem [#allocation6], %s9900_s10 }
  0x35   : > { %s9939_s17 = scalar_lea.vmem %s12237_s0, %s7694_s23  ;;  %vm11297_vm3 = vmor %vm4216_vm9, %vm4217_vm11 }
  0x36   : > { %8674 = vmatpush3.bf16.msra.mxu0 %v9423_v4  ;;  %v322_v12 = vld [vmem:[%s9939_s17] sm:$0xf]  ;;  %v9949_v13 = vld [vmem:[%s9939_s17 + $0x4] sm:$0xf]  ;;  %v9952_v14 = vld [vmem:[%s9939_s17 + $0x8] sm:$0x1] }
  0x37   : > { %8710 = vmatpush3.bf16.msra.mxu1 %v9424_v5  ;;  %8675 = vmatprep.subr.bf16.mxu0 %v9425_v6  ;;  %v372_v15 = vshrl.u32 %v322_v12, 16  ;;  %v375_v16 = vshll.u32 %v322_v12, 16  ;;  %v381_v17 = vshll.u32 %v9949_v13, 16  ;;  %v385_v18 = vshrl.u32 %v9949_v13, 16  ;;  %v9957_v19 = vld [vmem:[%s9939_s17 + $0xc] sm:$0xf] }
  0x38   : > { %8711 = vmatprep.subr.bf16.mxu1 %v9426_v7  ;;  %v391_v21 = vshll.u32 %v9952_v14, 16  ;;  %v7713_v22 = vcombine.low %v322_v12, %v9949_v13  ;;  %v9965_v23 = vld [vmem:[%s9939_s17 + $0x10] sm:$0xf]  ;;  %v9968_v24 = vld [vmem:[%s9939_s17 + $0x14] sm:$0x1]  ;;  %v396_v30 = vshrl.u32 %v9957_v19, 16 }
  0x39   : > { %v374_v25 = vrot.slane %v372_v15, 4  ;;  %v377_v26 = vrot.slane %v375_v16, 5  ;;  %v383_v27 = vrot.slane %v381_v17, 5  ;;  %v387_v28 = vrot.slane %v385_v18, 4  ;;  %v9988_v47 = vld [vmem:[%s9939_s17 + $0x18] sm:$0xf] }
  0x3a   : > { %8676 = vmatpush3.bf16.msra.mxu0 %v9425_v6  ;;  %v393_v29 = vrot.slane %v391_v21, 5  ;;  %v399_v31 = vshll.u32 %v9957_v19, 16  ;;  %v405_v32 = vshll.u32 %v9965_v23, 16  ;;  %8721 = vmatprep.mubr.bf16.mxu1 %v7713_v22  ;;  %v409_v36 = vshrl.u32 %v9965_v23, 16  ;;  %v9991_v49 = vld [vmem:[%s9939_s17 + $0x1c] sm:$0xf] }
  0x3b   : > { %8712 = vmatpush3.bf16.msra.mxu1 %v9426_v7  ;;  %8677 = vmatprep.subr.bf16.mxu0 %v9427_v8  ;;  %v378_v34 = vor.u32 %v377_v26, %v374_v25  ;;  %v388_v35 = vor.u32 %v387_v28, %v383_v27  ;;  %v415_v37 = vshll.u32 %v9968_v24, 16  ;;  %v398_v40 = vrot.slane %v396_v30, 4  ;;  %v9994_v50 = vld [vmem:[%s9939_s17 + $0x20] sm:$0x1]  ;;  %v10007_v58 = vld [vmem:[%s9939_s17 + $0x24] sm:$0xf] }
  0x3c   : > { %8713 = vmatprep.subr.bf16.mxu1 %v9428_v9  ;;  %v401_v41 = vrot.slane %v399_v31, 5  ;;  %v407_v42 = vrot.slane %v405_v32, 5  ;;  %v411_v45 = vrot.slane %v409_v36, 4  ;;  %v420_v51 = vshrl.u32 %v9988_v47, 16  ;;  %v10010_v59 = vld [vmem:[%s9939_s17 + $0x28] sm:$0xf] }
  0x3d   : > { %v379_v43 = vrot.slane %v378_v34, 4  ;;  %v389_v44 = vrot.slane %v388_v35, 4  ;;  %v417_v46 = vrot.slane %v415_v37, 5  ;;  %v423_v52 = vshll.u32 %v9988_v47, 16  ;;  %v10013_v0 = vld [vmem:[%s9939_s17 + $0x2c] sm:$0x1] }
  0x3e   : > { %8678 = vmatpush3.bf16.msra.mxu0 %v9427_v8  ;;  %v402_v48 = vor.u32 %v401_v41, %v398_v40  ;;  %v412_v56 = vor.u32 %v411_v45, %v407_v42  ;;  %v429_v57 = vshll.u32 %v9991_v49, 16  ;;  %v422_v62 = vrot.slane %v420_v51, 4  ;;  %v9437_v7 = vld [vmem:[%s12238_s1 + $0xb8] sm:$0xff]   ;;  %v10044_v32 = vld [vmem:[%s9939_s17 + $0x30] sm:$0xf] }
  0x3f   : > { %8714 = vmatpush3.bf16.msra.mxu1 %v9428_v9  ;;  %8679 = vmatprep.subr.bf16.mxu0 %v9429_v10  ;;  %v384_v54 = vsel %vm9983_vm2, %v379_v43, %v383_v27  ;;  %v394_v55 = vsel %vm9983_vm2, %v389_v44, %v393_v29  ;;  %v425_v63 = vrot.slane %v423_v52, 5  ;;  %v433_v3 = vshrl.u32 %v9991_v49, 16  ;;  %v9442_v16 = vld [vmem:[%s12238_s1 + $0xf8] sm:$0xff]   ;;  %v9438_v27 = vld [vmem:[%s12238_s1 + $0xb0] sm:$0xff]  }
  0x40   : > { %8715 = vmatprep.subr.bf16.mxu1 %v9430_v11  ;;  %v7695_v60 = vcombine.low %v384_v54, %v394_v55  ;;  %v403_v61 = vrot.slane %v402_v48, 4  ;;  %v413_v1 = vrot.slane %v412_v56, 4  ;;  %v431_v2 = vrot.slane %v429_v57, 5  ;;  %v10053_v40 = vld [vmem:[%s9939_s17 + $0x38] sm:$0x1] }
  0x41   : > { %v439_v4 = vshll.u32 %v9994_v50, 16  ;;  %v7714_v6 = vcombine.low %v9957_v19, %v9965_v23  ;;  %v426_v8 = vor.u32 %v425_v63, %v422_v62  ;;  %v444_v9 = vshrl.u32 %v10007_v58, 16  ;;  %v10063_v51 = vld [vmem:[%s9939_s17 + $0x3c] sm:$0xf]  ;;  %v10069_v57 = vld [vmem:[%s9939_s17 + $0x40] sm:$0xf] }
  0x42   : > { %8680 = vmatpush3.bf16.msra.mxu0 %v9429_v10  ;;  %v408_v5 = vsel %vm9983_vm2, %v403_v61, %v407_v42  ;;  %8685 = vmatprep.mubr.bf16.mxu0 %v7695_v60  ;;  %v418_v10 = vsel %vm9983_vm2, %v413_v1, %v417_v46  ;;  %v447_v15 = vshll.u32 %v10007_v58, 16  ;;  %v457_v25 = vshrl.u32 %v10010_v59, 16  ;;  %v10074_v1 = vld [vmem:[%s9939_s17 + $0x44] sm:$0x1] }
  0x43   : > { %8716 = vmatpush3.bf16.msra.mxu1 %v9430_v11  ;;  %8681 = vmatprep.subr.bf16.mxu0 %v9431_v20  ;;  %v435_v11 = vrot.slane %v433_v3, 4  ;;  %v441_v12 = vrot.slane %v439_v4, 5  ;;  %v7696_v17 = vcombine.low %v408_v5, %v418_v10  ;;  %v427_v18 = vrot.slane %v426_v8, 4  ;;  %v9445_v5 = vld [vmem:[%s12238_s1 + $0xa0] sm:$0xff]  }
  0x44   : > { %8717 = vmatprep.subr.bf16.mxu1 %v9432_v33  ;;  %v446_v19 = vrot.slane %v444_v9, 4  ;;  %v449_v22 = vrot.slane %v447_v15, 5  ;;  %v463_v26 = vshll.u32 %v10013_v0, 16  ;;  %v7715_v29 = vcombine.low %v9988_v47, %v9991_v49 }
  0x45   : > { %v436_v21 = vor.u32 %v435_v11, %v431_v2  ;;  %v432_v28 = vsel %vm9983_vm2, %v427_v18, %v431_v2  ;;  %v7716_v31 = vcombine.low %v10007_v58, %v10010_v59  ;;  %v459_v36 = vrot.slane %v457_v25, 4  ;;  %v9447_v2 = vld [vmem:[%s12238_s1 + $0xe8] sm:$0xff]   ;;  %v9449_v18 = vld [vmem:[%s12238_s1 + $0xe0] sm:$0xff]  }
  0x46   : > { %8682 = vmatpush3.bf16.msra.mxu0 %v9431_v20  ;;  %v453_v20 = vshll.u32 %v10010_v59, 16  ;;  %v450_v35 = vor.u32 %v449_v22, %v446_v19  ;;  %v465_v37 = vrot.slane %v463_v26, 5  ;;  %v468_v41 = vshrl.u32 %v10044_v32, 16 }
  0x47   : > { %8718 = vmatpush3.bf16.msra.mxu1 %v9432_v33  ;;  %8683 = vmatprep.subr.bf16.mxu0 %v9433_v38  ;;  %v10047_v33 = vld [vmem:[%s9939_s17 + $0x34] sm:$0xf]  ;;  %v437_v34 = vrot.slane %v436_v21, 4  ;;  %v471_v42 = vshll.u32 %v10044_v32, 16  ;;  %v487_v48 = vshll.u32 %v10053_v40, 16  ;;  %v501_v10 = vshll.u32 %v10069_v57, 16 }
  0x48   : > { %8719 = vmatprep.subr.bf16.mxu1 %v9434_v53  ;;  %v455_v30 = vrot.slane %v453_v20, 5  ;;  %v477_v43 = vshll.u32 %v10047_v33, 16  ;;  %v481_v44 = vshrl.u32 %v10047_v33, 16  ;;  %v451_v46 = vrot.slane %v450_v35, 4 }
  0x49   : > { %v442_v45 = vsel %vm9983_vm2, %v437_v34, %v441_v12  ;;  %v470_v54 = vrot.slane %v468_v41, 4  ;;  %v473_v55 = vrot.slane %v471_v42, 5  ;;  %v489_v63 = vrot.slane %v487_v48, 5  ;;  %v10120_v41 = vld [vmem:[%s9939_s17 + $0x58] sm:$0xf] }
  0x4a   : > { %8684 = vmatpush3.bf16.msra.mxu0 %v9433_v38  ;;  %v9443_v38 = vld [vmem:[%s12238_s1 + $0xf0] sm:$0xff]   ;;  %v460_v47 = vor.u32 %v459_v36, %v455_v30  ;;  %v7697_v52 = vcombine.low %v432_v28, %v442_v45  ;;  %v479_v56 = vrot.slane %v477_v43, 5  ;;  %v456_v60 = vsel %vm9983_vm2, %v451_v46, %v455_v30  ;;  %v9448_v28 = vld [vmem:[%s12238_s1 + $0x98] sm:$0xff]   ;;  %v10105_v30 = vld [vmem:[%s9939_s17 + $0x4c] sm:$0xf] }
  0x4b   : > { %8720 = vmatpush3.bf16.msra.mxu1 %v9434_v53  ;;  %8741 = vmatprep.subr.bf16.mxu0 %v9437_v7  ;;  %v9441_v53 = vld [vmem:[%s12238_s1 + $0xa8] sm:$0xff]   ;;  %v483_v62 = vrot.slane %v481_v44, 4  ;;  %v474_v3 = vor.u32 %v473_v55, %v470_v54  ;;  %v7717_v4 = vcombine.low %v10044_v32, %v10047_v33  ;;  %v505_v11 = vshrl.u32 %v10069_v57, 16  ;;  %v10108_v32 = vld [vmem:[%s9939_s17 + $0x50] sm:$0x1]  ;;  %v9453_v45 = vld [vmem:[%s12238_s1 + $0xd8] sm:$0xff]  }
  0x4c   : > { %8777 = vmatprep.subr.bf16.mxu1 %v9442_v16  ;;  %v461_v61 = vrot.slane %v460_v47, 4  ;;  %v503_v20 = vrot.slane %v501_v10, 5  ;;  %v511_v22 = vshll.u32 %v10074_v1, 16  ;;  %v525_v58 = vshll.u32 %v10105_v30, 16 }
  0x4d   : > { %8686 = vmatmul.mubr.bf16.vlgmr.msra.gmra.mxu0 %v7696_v17  ;;  %v484_v9 = vor.u32 %v483_v62, %v479_v56  ;;  %v475_v15 = vrot.slane %v474_v3, 4  ;;  %v507_v21 = vrot.slane %v505_v11, 4  ;;  %v529_v48 = vshrl.u32 %v10105_v30, 16 }
  0x4e   : > { %8722 = vmatmul.mubr.bf16.vlgmr.msra.gmra.mxu1 %v7714_v6  ;;  %8742 = vmatpush3.bf16.msra.mxu0 %v9437_v7  ;;  %v492_v6 = vshrl.u32 %v10063_v51, 16  ;;  %v495_v7 = vshll.u32 %v10063_v51, 16  ;;  %v466_v8 = vsel %vm9983_vm2, %v461_v61, %v465_v37  ;;  %v513_v36 = vrot.slane %v511_v22, 5 }
  0x4f   : > { %8743 = vmatprep.subr.bf16.mxu0 %v9438_v27  ;;  %8725 = vmatprep.mubr.bf16.mxu1 %v7715_v29  ;;  %v7698_v12 = vcombine.low %v456_v60, %v466_v8  ;;  %v485_v19 = vrot.slane %v484_v9, 4  ;;  %v480_v25 = vsel %vm9983_vm2, %v475_v15, %v479_v56  ;;  %v10102_v29 = vld [vmem:[%s9939_s17 + $0x48] sm:$0xf]  ;;  %v508_v35 = vor.u32 %v507_v21, %v503_v20  ;;  %v338_v21 = vld [vmem:[%s9939_s17 + $0x60] sm:$0xf] }
  0x50   : > { %8778 = vmatpush3.bf16.msra.mxu1 %v9442_v16  ;;  %8689 = vmatprep.mubr.bf16.mxu0 %v7697_v52  ;;  %v494_v16 = vrot.slane %v492_v6, 4  ;;  %v497_v17 = vrot.slane %v495_v7, 5  ;;  %v516_v37 = vshrl.u32 %v10102_v29, 16  ;;  %v519_v44 = vshll.u32 %v10102_v29, 16 }
  0x51   : > { %8779 = vmatprep.subr.bf16.mxu1 %v9443_v38  ;;  %v490_v34 = vsel %vm9983_vm2, %v485_v19, %v489_v63  ;;  %v509_v46 = vrot.slane %v508_v35, 4  ;;  %v527_v54 = vrot.slane %v525_v58, 5  ;;  %v7719_v55 = vcombine.low %v10102_v29, %v10105_v30  ;;  %v9452_v63 = vld [vmem:[%s12238_s1 + $0x90] sm:$0xff]   ;;  %v10159_v29 = vld [vmem:[%s9939_s17 + $0x64] sm:$0xf] }
  0x52   : > { %8744 = vmatpush3.bf16.msra.mxu0 %v9438_v27  ;;  %v498_v26 = vor.u32 %v497_v17, %v494_v16  ;;  %v7718_v27 = vcombine.low %v10063_v51, %v10069_v57  ;;  %v7699_v42 = vcombine.low %v480_v25, %v490_v34  ;;  %v518_v47 = vrot.slane %v516_v37, 4  ;;  %v9454_v16 = vld [vmem:[%s12238_s1 + $0x88] sm:$0xff]   ;;  %v9455_v17 = vld [vmem:[%s12238_s1 + $0xd0] sm:$0xff]  }
  0x53   : > { %8745 = vmatprep.subr.bf16.mxu0 %v9441_v53  ;;  %v535_v51 = vshll.u32 %v10108_v32, 16  ;;  %v514_v56 = vsel %vm9983_vm2, %v509_v46, %v513_v36  ;;  %v531_v60 = vrot.slane %v529_v48, 4  ;;  %v549_v6 = vshll.u32 %v10120_v41, 16  ;;  %v10162_v34 = vld [vmem:[%s9939_s17 + $0x68] sm:$0x1] }
  0x54   : > { %8780 = vmatpush3.bf16.msra.mxu1 %v9443_v38  ;;  %v10117_v38 = vld [vmem:[%s9939_s17 + $0x54] sm:$0xf]  ;;  %v499_v43 = vrot.slane %v498_v26, 4  ;;  %v1084_v22 = vrot.slane %v9949_v13, 5  ;;  %v573_v37 = vshll.u32 %v10159_v29, 16 }
  0x55   : > { %8690 = vmatmul.mubr.bf16.gmra.mxu0 %v7698_v12  ;;  %8781 = vmatprep.subr.bf16.mxu1 %v9447_v2  ;;  %v537_v61 = vrot.slane %v535_v51, 5  ;;  %v540_v62 = vshrl.u32 %v10117_v38, 16  ;;  %v532_v7 = vor.u32 %v531_v60, %v527_v54  ;;  %v551_v12 = vrot.slane %v549_v6, 5  ;;  %v10175_v48 = vld [vmem:[%s9939_s17 + $0x74] sm:$0x1]  ;;  %v9458_v51 = vld [vmem:[%s12238_s1 + $0xc8] sm:$0xff]  }
  0x56   : > { %8726 = vmatmul.mubr.bf16.gmra.mxu1 %v7716_v31  ;;  %8746 = vmatpush3.bf16.msra.mxu0 %v9441_v53  ;;  %v10125_v31 = vld [vmem:[%s9939_s17 + $0x5c] sm:$0x1]  ;;  %v504_v52 = vsel %vm9983_vm2, %v499_v43, %v503_v20  ;;  %v521_v53 = vrot.slane %v519_v44, 5  ;;  %v7720_v15 = vcombine.low %v10117_v38, %v10120_v41  ;;  %v10172_v43 = vld [vmem:[%s9939_s17 + $0x70] sm:$0xf]  ;;  %v7721_v60 = vcombine.low %v338_v21, %v10159_v29 }
  0x57   : > { %8729 = vmatprep.mubr.bf16.mxu1 %v7717_v4  ;;  %8747 = vmatprep.subr.bf16.mxu0 %v9445_v5  ;;  %v543_v4 = vshll.u32 %v10117_v38, 16  ;;  %v542_v8 = vrot.slane %v540_v62, 4  ;;  %v559_v9 = vshll.u32 %v10125_v31, 16  ;;  %v577_v38 = vshrl.u32 %v10159_v29, 16  ;;  %v9459_v62 = vld [vmem:[%s12238_s1 + $0x80] sm:$0xff]  }
  0x58   : > { %8782 = vmatpush3.bf16.msra.mxu1 %v9447_v2  ;;  %8693 = vmatprep.mubr.bf16.mxu0 %v7699_v42  ;;  %v7700_v2 = vcombine.low %v504_v52, %v514_v56  ;;  %v522_v3 = vor.u32 %v521_v53, %v518_v47  ;;  %v10169_v42 = vld [vmem:[%s9939_s17 + $0x6c] sm:$0xf]  ;;  %v575_v52 = vrot.slane %v573_v37, 5  ;;  %v1086_v37 = vrot.slane %v1084_v22, 4 }
  0x59   : > { %8783 = vmatprep.subr.bf16.mxu1 %v9449_v18  ;;  %v545_v11 = vrot.slane %v543_v4, 5  ;;  %v561_v20 = vrot.slane %v559_v9, 5  ;;  %v579_v53 = vrot.slane %v577_v38, 4  ;;  %v591_v4 = vshll.u32 %v10169_v42, 16  ;;  %v9460_v9 = vld [vmem:[%s12238_s1 + $0xc0] sm:$0xff]  }
  0x5a   : > { %8748 = vmatpush3.bf16.msra.mxu0 %v9445_v5  ;;  %v553_v5 = vshrl.u32 %v10120_v41, 16  ;;  %v523_v10 = vrot.slane %v522_v3, 4 }
  0x5b   : > { %8749 = vmatprep.subr.bf16.mxu0 %v9448_v28  ;;  %v546_v26 = vor.u32 %v545_v11, %v542_v8  ;;  %v593_v11 = vrot.slane %v591_v4, 5  ;;  %v9463_v4 = vld [vmem:[%s9939_s17 + $0x18] sm:$0xff]  }
  0x5c   : > { %8784 = vmatpush3.bf16.msra.mxu1 %v9449_v18  ;;  %v533_v18 = vrot.slane %v532_v7, 4  ;;  %v555_v19 = vrot.slane %v553_v5, 4  ;;  %v528_v25 = vsel %vm9983_vm2, %v523_v10, %v527_v54  ;;  %v583_v54 = vshll.u32 %v10162_v34, 16 }
  0x5d   : > { %8694 = vmatmul.mubr.bf16.gmra.mxu0 %v7700_v2  ;;  %8785 = vmatprep.subr.bf16.mxu1 %v9453_v45  ;;  %v547_v58 = vrot.slane %v546_v26, 4  ;;  %v580_v2 = vor.u32 %v579_v53, %v575_v52  ;;  %v597_v5 = vshll.u32 %v10172_v43, 16  ;;  %v1098_v53 = vrot.slane %v9991_v49, 5 }
  0x5e   : > { %8730 = vmatmul.mubr.bf16.gmra.mxu1 %v7718_v27  ;;  %8750 = vmatpush3.bf16.msra.mxu0 %v9448_v28  ;;  %v564_v27 = vshrl.u32 %v338_v21, 16  ;;  %v567_v28 = vshll.u32 %v338_v21, 16  ;;  %v538_v35 = vsel %vm9983_vm2, %v533_v18, %v537_v61  ;;  %v556_v36 = vor.u32 %v555_v19, %v551_v12  ;;  %v1049_v18 = vld [vmem:[%s9939_s17] sm:$0xe] }
  0x5f   : > { %8733 = vmatprep.mubr.bf16.mxu1 %v7719_v55  ;;  %8751 = vmatprep.subr.bf16.mxu0 %v9452_v63  ;;  %v7701_v44 = vcombine.low %v528_v25, %v538_v35  ;;  %v552_v55 = vsel %vm9983_vm2, %v547_v58, %v551_v12  ;;  %v588_v61 = vshrl.u32 %v10169_v42, 16  ;;  %v585_v3 = vrot.slane %v583_v54, 5 }
  0x60   : > { %8786 = vmatpush3.bf16.msra.mxu1 %v9453_v45  ;;  %v566_v46 = vrot.slane %v564_v27, 4  ;;  %v569_v47 = vrot.slane %v567_v28, 5  ;;  %v557_v45 = vrot.slane %v556_v36, 4  ;;  %v581_v10 = vrot.slane %v580_v2, 4  ;;  %v1050_v28 = vld [vmem:[%s9939_s17 + $0xc] sm:$0xe] }
  0x61   : > { %8787 = vmatprep.subr.bf16.mxu1 %v9455_v17  ;;  %8697 = vmatprep.mubr.bf16.mxu0 %v7701_v44  ;;  %v590_v8 = vrot.slane %v588_v61, 4  ;;  %v601_v12 = vshrl.u32 %v10172_v43, 16  ;;  %v1087_v19 = vrot.slane %v9952_v14, 5  ;;  %v599_v21 = vrot.slane %v597_v5, 5 }
  0x62   : > { %8752 = vmatpush3.bf16.msra.mxu0 %v9452_v63  ;;  %v570_v56 = vor.u32 %v569_v47, %v566_v46  ;;  %v562_v63 = vsel %vm9983_vm2, %v557_v45, %v561_v20  ;;  %v7731_v25 = vrot.slane %v1049_v18, 9  ;;  %v12265_v14 = vmov 0  ;;  %v9462_v45 = vld [vmem:[%s9939_s17 + $0xc] sm:$0xff]  }
  0x63   : > { %8753 = vmatprep.subr.bf16.mxu0 %v9454_v16  ;;  %v7702_v6 = vcombine.low %v552_v55, %v562_v63  ;;  %v594_v26 = vor.u32 %v593_v11, %v590_v8  ;;  %v603_v27 = vrot.slane %v601_v12, 4  ;;  %v12266_v14 = vsel %vm10210_vm5, 4294967295, %v12265_v14  ;;  %v9469_v11 = vld [vmem:[%s12238_s1 + $0x170] sm:$0xff]  }
  0x64   : > { %8788 = vmatpush3.bf16.msra.mxu1 %v9455_v17  ;;  %v571_v7 = vrot.slane %v570_v56, 4  ;;  %v607_v17 = vshll.u32 %v10175_v48, 16  ;;  %12267 = vst [vmem:[#allocation12_spill] sm:$0xff] %v12266_v14  ;;  %v7722_v58 = vcombine.low %v10169_v42, %v10172_v43  ;;  %v1091_v46 = vrot.slane %v9965_v23, 5  ;;  %v1053_v12 = vld [vmem:[%s9939_s17 + $0x30] sm:$0xe] }
  0x65   : > { %8789 = vmatprep.subr.bf16.mxu1 %v9458_v51  ;;  %8698 = vmatmul.mubr.bf16.gmra.mxu0 %v7702_v6  ;;  %v595_v38 = vrot.slane %v594_v26, 4  ;;  %v604_v44 = vor.u32 %v603_v27, %v599_v21  ;;  %v1085_v47 = vsel %vm10210_vm5, %v7731_v25, %v1084_v22  ;;  %v1094_v42 = vrot.slane %v9968_v24, 5  ;;  %v1052_v22 = vld [vmem:[%s9939_s17 + $0x24] sm:$0xe]  ;;  %v9464_v18 = vld [vmem:[%s12238_s1 + $0x130] sm:$0xff]   ;;  %v9467_v27 = vld [vmem:[%s12238_s1 + $0x128] sm:$0xff]  }
  0x66   : > { %8734 = vmatmul.mubr.bf16.gmra.mxu1 %v7720_v15  ;;  %8754 = vmatpush3.bf16.msra.mxu0 %v9454_v16  ;;  %v576_v20 = vsel %vm9983_vm2, %v571_v7, %v575_v52  ;;  %v10204_v15 = vld [vmem:[%s12238_s1 + $0x138] sm:$0xff]   ;;  %v586_v16 = vsel %vm9983_vm2, %v581_v10, %v585_v3  ;;  %v609_v36 = vrot.slane %v607_v17, 5  ;;  %v7732_v13 = vrot.slane %v1050_v28, 9  ;;  %v9466_v26 = vld [vmem:[%s9939_s17 + $0x30] sm:$0xff]  }
  0x67   : > { %8737 = vmatprep.mubr.bf16.mxu1 %v7721_v60  ;;  %8755 = vmatprep.subr.bf16.mxu0 %v9459_v62  ;;  %v7703_v35 = vcombine.low %v576_v20, %v586_v16  ;;  %v1051_v52 = vld [vmem:[%s9939_s17 + $0x18] sm:$0xe]  ;;  %v600_v23 = vsel %vm9983_vm2, %v595_v38, %v599_v21  ;;  %v605_v54 = vrot.slane %v604_v44, 4  ;;  %v1101_v55 = vrot.slane %v9994_v50, 5  ;;  %v1055_v38 = vld [vmem:[%s9939_s17 + $0x48] sm:$0xe] }
  0x68   : > { %8790 = vmatpush3.bf16.msra.mxu1 %v9458_v51  ;;  %v1088_v51 = vsel %vm10210_vm5, %v1086_v37, %v1087_v19  ;;  %v1093_v61 = vrot.slane %v1091_v46, 4  ;;  %v1100_v24 = vrot.slane %v1098_v53, 4  ;;  %v1105_v63 = vrot.slane %v10010_v59, 5  ;;  %v9468_v50 = vld [vmem:[%s12238_s1 + $0x178] sm:$0xff]  }
  0x69   : > { %8791 = vmatprep.subr.bf16.mxu1 %v9460_v9  ;;  %8701 = vmatprep.mubr.bf16.mxu0 %v7703_v35  ;;  %v610_v56 = vsel %vm9983_vm2, %v605_v54, %v609_v36  ;;  %v7741_v60 = vcombine.low %v1085_v47, %v1088_v51  ;;  %v1092_v2 = vsel %vm10210_vm5, %v7732_v13, %v1091_v46  ;;  %v7734_v6 = vrot.slane %v1052_v22, 9  ;;  %v1054_v19 = vld [vmem:[%s9939_s17 + $0x3c] sm:$0xe]  ;;  %v1056_v47 = vld [vmem:[%s9939_s17 + $0x54] sm:$0xe] }
  0x6a   : > { %8756 = vmatpush3.bf16.msra.mxu0 %v9459_v62  ;;  %v7733_v62 = vrot.slane %v1051_v52, 9  ;;  %v7704_v49 = vcombine.low %v600_v23, %v610_v56  ;;  %v1095_v3 = vsel %vm10210_vm5, %v1093_v61, %v1094_v42  ;;  %v1108_v7 = vrot.slane %v10013_v0, 5  ;;  %v9471_v35 = vld [vmem:[%s9939_s17 + $0x3c] sm:$0xff]  }
  0x6b   : > { %8813 = vmatprep.subr.bf16.mxu0 %v10204_v15  ;;  %v1102_v8 = vsel %vm10210_vm5, %v1100_v24, %v1101_v55  ;;  %v1107_v5 = vrot.slane %v1105_v63, 4  ;;  %v1112_v10 = vrot.slane %v10047_v33, 5  ;;  %v1119_v17 = vrot.slane %v10069_v57, 5  ;;  %v9473_v57 = vld [vmem:[%s12238_s1 + $0x168] sm:$0xff]   ;;  %v9470_v42 = vld [vmem:[%s12238_s1 + $0x120] sm:$0xff]   ;;  %v9479_v22 = vld [vmem:[%s12238_s1 + $0x158] sm:$0xff]  }
  0x6c   : > { %8792 = vmatpush3.bf16.msra.mxu1 %v9460_v9  ;;  %v1099_v59 = vsel %vm10210_vm5, %v7733_v62, %v1098_v53  ;;  %v9465_v9 = vld [vmem:[%s9939_s17 + $0x24] sm:$0xff]   ;;  %v7742_v0 = vcombine.low %v1092_v2, %v1095_v3  ;;  %v1115_v21 = vrot.slane %v10053_v40, 5  ;;  %v1126_v33 = vrot.slane %v10105_v30, 5  ;;  %v1057_v56 = vld [vmem:[%s9939_s17 + $0x60] sm:$0xe] }
  0x6d   : > { %8702 = vmatmul.mubr.bf16.gmra.mxu0 %v7704_v49  ;;  %8849 = vmatprep.subr.bf16.mxu1 %v9468_v50  ;;  %v7743_v20 = vcombine.low %v1099_v59, %v1102_v8  ;;  %v7735_v25 = vrot.slane %v1053_v12, 9  ;;  %v1114_v16 = vrot.slane %v1112_v10, 4  ;;  %v7736_v28 = vrot.slane %v1054_v19, 9  ;;  %v9472_v55 = vld [vmem:[%s9939_s17 + $0x48] sm:$0xff]   ;;  %v9476_v49 = vld [vmem:[%s9939_s17 + $0x54] sm:$0xff]  }
  0x6e   : > { %8738 = vmatmul.mubr.bf16.gmra.mxu1 %v7722_v58  ;;  %8757 = vmatprep.mubr.bf16.mxu0 %v7741_v60  ;;  %v1121_v40 = vrot.slane %v1119_v17, 4  ;;  %v1122_v30 = vrot.slane %v10074_v1, 5  ;;  %v1106_v36 = vsel %vm10210_vm5, %v7734_v6, %v1105_v63  ;;  %v1109_v37 = vsel %vm10210_vm5, %v1107_v5, %v1108_v7  ;;  %v9474_v60 = vld [vmem:[%s12238_s1 + $0x118] sm:$0xff]   ;;  %v9477_v5 = vld [vmem:[%s12238_s1 + $0x110] sm:$0xff]   ;;  %v7797_v12 = vld [vmem:[%s9939_s17 + $0xc] sm:$0xf] }
  0x6f   : > { %8793 = vmatprep.mubr.bf16.mxu1 %v9462_v45  ;;  %v1128_v44 = vrot.slane %v1126_v33, 4  ;;  %v1129_v58 = vrot.slane %v10108_v32, 5  ;;  %v1113_v46 = vsel %vm10210_vm5, %v7735_v25, %v1112_v10  ;;  %v1116_v1 = vsel %vm10210_vm5, %v1114_v16, %v1115_v21  ;;  %v9478_v21 = vld [vmem:[%s9939_s17 + $0x60] sm:$0xff]  }
  0x70   : > { %v1133_v51 = vrot.slane %v10120_v41, 5  ;;  %v7744_v45 = vcombine.low %v1106_v36, %v1109_v37  ;;  %v7737_v52 = vrot.slane %v1055_v38, 9  ;;  %v1140_v32 = vrot.slane %v10159_v29, 5  ;;  %v7801_v36 = vld [vmem:[%s9939_s17 + $0x1c] sm:$0xf] }
  0x71   : > { %v7745_v53 = vcombine.low %v1113_v46, %v1116_v1  ;;  %v1136_v23 = vrot.slane %v10125_v31, 5  ;;  %v7738_v41 = vrot.slane %v1056_v47, 9  ;;  %v1120_v13 = vsel %vm10210_vm5, %v7736_v28, %v1119_v17  ;;  %v10347_v17 = vld [vmem:[%s9939_s17 + $0x10] sm:$0xf]  ;;  %v10373_v37 = vld [vmem:[%s9939_s17 + $0x20] sm:$0x1] }
  0x72   : > { %v1135_v54 = vrot.slane %v1133_v51, 4  ;;  %v1123_v29 = vsel %vm10210_vm5, %v1121_v40, %v1122_v30  ;;  %v1147_v31 = vrot.slane %v10172_v43, 5  ;;  %v1127_v61 = vsel %vm10210_vm5, %v7737_v52, %v1126_v33  ;;  %v9484_v33 = vld [vmem:[%s12238_s1 + $0x148] sm:$0xff]   ;;  %v9486_v52 = vld [vmem:[%s12238_s1 + $0x140] sm:$0xff]  }
  0x73   : > { %v1130_v62 = vsel %vm10210_vm5, %v1128_v44, %v1129_v58  ;;  %v1142_v24 = vrot.slane %v1140_v32, 4  ;;  %v1143_v63 = vrot.slane %v10162_v34, 5  ;;  %v7739_v43 = vrot.slane %v1057_v56, 9  ;;  %v9482_v1 = vld [vmem:[%s9939_s17 + $0x6c] sm:$0xff]  }
  0x74   : > { %v1149_v3 = vrot.slane %v1147_v31, 4  ;;  %v7746_v6 = vcombine.low %v1120_v13, %v1123_v29  ;;  %v7747_v7 = vcombine.low %v1127_v61, %v1130_v62  ;;  %v10317_v59 = vsel %vm10210_vm5, %v7738_v41, %v1133_v51  ;;  %v9485_v62 = vld [vmem:[%s12238_s1 + $0x100] sm:$0xff]  }
  0x75   : > { %8758 = vmatmul.mubr.bf16.vlgmr.msra.gmra.mxu0 %v7742_v0  ;;  %v10321_v34 = vsel %vm10210_vm5, %v1135_v54, %v1136_v23  ;;  %v10328_v8 = vsel %vm10210_vm5, %v1142_v24, %v1143_v63  ;;  %v10350_v0 = vld [vmem:[%s9939_s17 + $0x14] sm:$0x1]  ;;  %v1701_v19 = vshll.u32 %v7797_v12, 16  ;;  %v1707_v25 = vshll.u32 %v10347_v17, 16  ;;  %v7845_v23 = vld [vmem:[%s9939_s17 + $0xc] sm:$0xe] }
  0x76   : > { %8794 = vmatmul.mubr.bf16.vlgmr.msra.gmra.mxu1 %v9463_v4  ;;  %8814 = vmatpush3.bf16.msra.mxu0 %v10204_v15  ;;  %v9475_v15 = vld [vmem:[%s12238_s1 + $0x160] sm:$0xff]   ;;  %v1150_v4 = vrot.slane %v10175_v48, 5  ;;  %v9481_v48 = vld [vmem:[%s12238_s1 + $0x150] sm:$0xff]   ;;  %v1711_v16 = vshrl.u32 %v10347_v17, 16  ;;  %v1731_v51 = vshll.u32 %v7801_v36, 16  ;;  %v2216_v41 = vrot.slane %v10347_v17, 5 }
  0x77   : > { %8797 = vmatprep.mubr.bf16.mxu1 %v9465_v9  ;;  %8850 = vmatpush3.bf16.msra.mxu1 %v9468_v50  ;;  %v1058_v50 = vld [vmem:[%s9939_s17 + $0x6c] sm:$0xe]  ;;  %v10335_v9 = vsel %vm10210_vm5, %v7739_v43, %v1140_v32  ;;  %v1709_v38 = vrot.slane %v1707_v25, 5  ;;  %v9483_v43 = vld [vmem:[%s9939_s17 + $0x78] sm:$0xff]   ;;  %v10412_v17 = vld [vmem:[%s9939_s17 + $0x2c] sm:$0x1] }
  0x78   : > { %8851 = vmatprep.subr.bf16.mxu1 %v9469_v11  ;;  %8761 = vmatprep.mubr.bf16.mxu0 %v7743_v20  ;;  %v7740_v2 = vrot.slane %v1058_v50, 9  ;;  %v7748_v20 = vcombine.low %v10317_v59, %v10321_v34  ;;  %v7749_v28 = vcombine.low %v10335_v9, %v10328_v8  ;;  %v1713_v44 = vrot.slane %v1711_v16, 4  ;;  %v10399_v59 = vld [vmem:[%s12238_s1 + $0x1f8] sm:$0xff]  }
  0x79   : > { %8815 = vmatprep.subr.bf16.mxu0 %v9464_v18  ;;  %v1733_v29 = vrot.slane %v1731_v51, 5  ;;  %v2218_v61 = vrot.slane %v2216_v41, 4  ;;  %v2219_v50 = vrot.slane %v10350_v0, 5 }
  0x7a   : > { %8816 = vmatpush3.bf16.msra.mxu0 %v9464_v18  ;;  %v10339_v10 = vsel %vm10210_vm5, %v7740_v2, %v1147_v31  ;;  %v1698_v18 = vshrl.u32 %v7797_v12, 16  ;;  %v1714_v32 = vor.u32 %v1713_v44, %v1709_v38  ;;  %v10409_v12 = vld [vmem:[%s9939_s17 + $0x28] sm:$0xf] }
  0x7b   : > { %8852 = vmatpush3.bf16.msra.mxu1 %v9469_v11  ;;  %8817 = vmatprep.subr.bf16.mxu0 %v9467_v27  ;;  %v10343_v11 = vsel %vm10210_vm5, %v1149_v3, %v1150_v4  ;;  %v2220_v9 = vsel %vm10210_vm5, %v2218_v61, %v2219_v50 }
  0x7c   : > { %8853 = vmatprep.subr.bf16.mxu1 %v9473_v57  ;;  %v7750_v40 = vcombine.low %v10339_v10, %v10343_v11  ;;  %v1700_v30 = vrot.slane %v1698_v18, 4  ;;  %v1715_v56 = vrot.slane %v1714_v32, 4  ;;  %v2233_v10 = vrot.slane %v10412_v17, 5 }
  0x7d   : > { %8762 = vmatmul.mubr.bf16.gmra.mxu0 %v7744_v45  ;;  %v1735_v45 = vshrl.u32 %v7801_v36, 16 }
  0x7e   : > { %8798 = vmatmul.mubr.bf16.gmra.mxu1 %v9466_v26  ;;  %8818 = vmatpush3.bf16.msra.mxu0 %v9467_v27  ;;  %v1717_v26 = vshll.u32 %v10350_v0, 16  ;;  %v10365_v27 = vld [vmem:[%s12238_s1 + $0x108] sm:$0xff]  }
  0x7f   : > { %8801 = vmatprep.mubr.bf16.mxu1 %v9471_v35  ;;  %8854 = vmatpush3.bf16.msra.mxu1 %v9473_v57  ;;  %v7800_v57 = vld [vmem:[%s9939_s17 + $0x18] sm:$0xf]  ;;  %v1703_v35 = vrot.slane %v1701_v19, 5 }
  0x80   : > { %8855 = vmatprep.subr.bf16.mxu1 %v9475_v15  ;;  %8765 = vmatprep.mubr.bf16.mxu0 %v7745_v53  ;;  %v1719_v58 = vrot.slane %v1717_v26, 5  ;;  %v1722_v46 = vshrl.u32 %v7800_v57, 16  ;;  %v1725_v47 = vshll.u32 %v7800_v57, 16 }
  0x81   : > { %8819 = vmatprep.subr.bf16.mxu0 %v9470_v42 }
  0x82   : > { %8820 = vmatpush3.bf16.msra.mxu0 %v9470_v42  ;;  %v1724_v53 = vrot.slane %v1722_v46, 4  ;;  %v1741_v42 = vshll.u32 %v10373_v37, 16  ;;  %v1727_v13 = vrot.slane %v1725_v47, 5  ;;  %v1720_v2 = vsel %vm9983_vm2, %v1715_v56, %v1719_v58 }
  0x83   : > { %8856 = vmatpush3.bf16.msra.mxu1 %v9475_v15  ;;  %8821 = vmatprep.subr.bf16.mxu0 %v9474_v60  ;;  %v1704_v15 = vor.u32 %v1703_v35, %v1700_v30  ;;  %v1755_v35 = vshll.u32 %v10409_v12, 16  ;;  %v1765_v46 = vshll.u32 %v10412_v17, 16 }
  0x84   : > { %8857 = vmatprep.subr.bf16.mxu1 %v9479_v22  ;;  %v1743_v31 = vrot.slane %v1741_v42, 5  ;;  %v1728_v24 = vor.u32 %v1727_v13, %v1724_v53  ;;  %v7848_v13 = vld [vmem:[%s9939_s17 + $0x30] sm:$0xe] }
  0x85   : > { %8766 = vmatmul.mubr.bf16.gmra.mxu0 %v7746_v6  ;;  %v1705_v54 = vrot.slane %v1704_v15, 4  ;;  %v2223_v6 = vrot.slane %v7801_v36, 5  ;;  %v1759_v36 = vshrl.u32 %v10409_v12, 16  ;;  %v7858_v11 = vrot.slane %v7848_v13, 9 }
  0x86   : > { %8802 = vmatmul.mubr.bf16.gmra.mxu1 %v9472_v55  ;;  %8822 = vmatpush3.bf16.msra.mxu0 %v9474_v60  ;;  %v1737_v55 = vrot.slane %v1735_v45, 4  ;;  %v7855_v60 = vrot.slane %v7845_v23, 9 }
  0x87   : > { %8805 = vmatprep.mubr.bf16.mxu1 %v9476_v49  ;;  %8858 = vmatpush3.bf16.msra.mxu1 %v9479_v22  ;;  %v7846_v22 = vld [vmem:[%s9939_s17 + $0x18] sm:$0xe]  ;;  %v1710_v49 = vsel %vm9983_vm2, %v1705_v54, %v1709_v38  ;;  %v2225_v19 = vrot.slane %v2223_v6, 4  ;;  %v1761_v15 = vrot.slane %v1759_v36, 4  ;;  %v7849_v36 = vld [vmem:[%s9939_s17 + $0x3c] sm:$0xe] }
  0x88   : > { %8859 = vmatprep.subr.bf16.mxu1 %v9481_v48  ;;  %8769 = vmatprep.mubr.bf16.mxu0 %v7747_v7  ;;  %v1738_v63 = vor.u32 %v1737_v55, %v1733_v29  ;;  %v2217_v3 = vsel %vm10210_vm5, %v7855_v60, %v2216_v41  ;;  %v7856_v4 = vrot.slane %v7846_v22, 9  ;;  %v7803_v7 = vld [vmem:[%s9939_s17 + $0x24] sm:$0xf]  ;;  %v7827_v34 = vcombine.low %v1710_v49, %v1720_v2  ;;  %v7809_v49 = vld [vmem:[%s9939_s17 + $0x3c] sm:$0xf] }
  0x89   : > { %8823 = vmatprep.subr.bf16.mxu0 %v9477_v5  ;;  %v7865_v0 = vcombine.low %v2217_v3, %v2220_v9  ;;  %v1746_v26 = vshrl.u32 %v7803_v7, 16  ;;  %v1749_v57 = vshll.u32 %v7803_v7, 16  ;;  %v9491_v3 = vld [vmem:[%s12238_s1 + $0x1f0] sm:$0xff]   ;;  %v1794_v17 = vshrl.u32 %v7809_v49, 16 }
  0x8a   : > { %8824 = vmatpush3.bf16.msra.mxu0 %v9477_v5  ;;  %v1739_v8 = vrot.slane %v1738_v63, 4  ;;  %v10404_v5 = vld [vmem:[%s12238_s1 + $0x1b8] sm:$0xff]   ;;  %v10417_v18 = vsel %vm10210_vm5, %v7856_v4, %v2223_v6  ;;  %v10462_v4 = vld [vmem:[%s9939_s17 + $0x40] sm:$0xf] }
  0x8b   : > { %8860 = vmatpush3.bf16.msra.mxu1 %v9481_v48  ;;  %8825 = vmatprep.subr.bf16.mxu0 %v10365_v27  ;;  %v1729_v48 = vrot.slane %v1728_v24, 4  ;;  %v1748_v44 = vrot.slane %v1746_v26, 4  ;;  %v1751_v58 = vrot.slane %v1749_v57, 5  ;;  %v10486_v26 = vld [vmem:[%s9939_s17 + $0x50] sm:$0x1] }
  0x8c   : > { %8861 = vmatprep.subr.bf16.mxu1 %v9484_v33  ;;  %v1744_v16 = vsel %vm9983_vm2, %v1739_v8, %v1743_v31  ;;  %v10467_v8 = vld [vmem:[%s9939_s17 + $0x44] sm:$0x1] }
  0x8d   : > { %8770 = vmatmul.mubr.bf16.gmra.mxu0 %v7748_v20  ;;  %v2226_v20 = vrot.slane %v10373_v37, 5  ;;  %v1734_v25 = vsel %vm9983_vm2, %v1729_v48, %v1733_v29  ;;  %v7847_v37 = vld [vmem:[%s9939_s17 + $0x24] sm:$0xe]  ;;  %v1752_v45 = vor.u32 %v1751_v58, %v1748_v44  ;;  %v1813_v44 = vshll.u32 %v10467_v8, 16 }
  0x8e   : > { %8806 = vmatmul.mubr.bf16.gmra.mxu1 %v9478_v21  ;;  %8773 = vmatprep.mubr.bf16.mxu0 %v7749_v28  ;;  %v7806_v21 = vld [vmem:[%s9939_s17 + $0x30] sm:$0xf]  ;;  %v10431_v28 = vcombine.low %v1734_v25, %v1744_v16  ;;  %v7857_v56 = vrot.slane %v7847_v37, 9  ;;  %v9493_v37 = vld [vmem:[%s12238_s1 + $0x1e8] sm:$0xff]  }
  0x8f   : > { %8809 = vmatprep.mubr.bf16.mxu1 %v9482_v1  ;;  %8862 = vmatpush3.bf16.msra.mxu1 %v9484_v33  ;;  %v10422_v33 = vld [vmem:[%s9939_s17 + $0x34] sm:$0xf]  ;;  %v2227_v30 = vsel %vm10210_vm5, %v2225_v19, %v2226_v20  ;;  %v1757_v1 = vrot.slane %v1755_v35, 5  ;;  %v1770_v47 = vshrl.u32 %v7806_v21, 16  ;;  %v1773_v51 = vshll.u32 %v7806_v21, 16 }
  0x90   : > { %8863 = vmatprep.subr.bf16.mxu1 %v9486_v52  ;;  %8826 = vmatpush3.bf16.msra.mxu0 %v10365_v27  ;;  %v10429_v27 = vld [vmem:[%s9939_s17 + $0x38] sm:$0x1]  ;;  %v7866_v38 = vcombine.low %v10417_v18, %v2227_v30  ;;  %v1779_v32 = vshll.u32 %v10422_v33, 16  ;;  %v1783_v53 = vshrl.u32 %v10422_v33, 16  ;;  %v1753_v29 = vrot.slane %v1752_v45, 4  ;;  %v9488_v20 = vld [vmem:[%s12238_s1 + $0x1b0] sm:$0xff]  }
  0x91   : > { %8827 = vmatprep.subr.bf16.mxu0 %v9485_v62  ;;  %v1762_v42 = vor.u32 %v1761_v15, %v1757_v1  ;;  %v1772_v23 = vrot.slane %v1770_v47, 4  ;;  %v1775_v41 = vrot.slane %v1773_v51, 5  ;;  %v1789_v54 = vshll.u32 %v10429_v27, 16  ;;  %v7812_v18 = vld [vmem:[%s9939_s17 + $0x48] sm:$0xf] }
  0x92   : > { %v1781_v55 = vrot.slane %v1779_v32, 5  ;;  %v1785_v22 = vrot.slane %v1783_v53, 4  ;;  %v1758_v24 = vsel %vm9983_vm2, %v1753_v29, %v1757_v1  ;;  %v2240_v48 = vrot.slane %v10429_v27, 5  ;;  %v10475_v19 = vld [vmem:[%s9939_s17 + $0x4c] sm:$0xf] }
  0x93   : > { %8864 = vmatpush3.bf16.msra.mxu1 %v9486_v52  ;;  %v1767_v52 = vrot.slane %v1765_v46, 5  ;;  %v1763_v31 = vrot.slane %v1762_v42, 4  ;;  %v1776_v60 = vor.u32 %v1775_v41, %v1772_v23  ;;  %v1791_v61 = vrot.slane %v1789_v54, 5  ;;  %v9495_v41 = vld [vmem:[%s12238_s1 + $0x1e0] sm:$0xff]  }
  0x94   : > { %8921 = vmatprep.subr.bf16.mxu1 %v10399_v59  ;;  %8828 = vmatpush3.bf16.msra.mxu0 %v9485_v62  ;;  %v2230_v62 = vrot.slane %v10409_v12, 5  ;;  %v1786_v63 = vor.u32 %v1785_v22, %v1781_v55  ;;  %v1796_v27 = vrot.slane %v1794_v17, 4  ;;  %v1803_v35 = vshll.u32 %v10462_v4, 16  ;;  %v7850_v22 = vld [vmem:[%s9939_s17 + $0x48] sm:$0xe] }
  0x95   : > { %8885 = vmatprep.subr.bf16.mxu0 %v10404_v5  ;;  %8774 = vmatmul.mubr.bf16.gmra.mxu0 %v7750_v40  ;;  %v1768_v40 = vsel %vm9983_vm2, %v1763_v31, %v1767_v52  ;;  %v1777_v50 = vrot.slane %v1776_v60, 4  ;;  %v1818_v58 = vshrl.u32 %v7812_v18, 16  ;;  %v1821_v47 = vshll.u32 %v7812_v18, 16 }
  0x96   : > { %8810 = vmatmul.mubr.bf16.gmra.mxu1 %v9483_v43  ;;  %8829 = vmatprep.mubr.bf16.mxu0 %v7827_v34  ;;  %v2231_v43 = vsel %vm10210_vm5, %v7857_v56, %v2230_v62  ;;  %v2232_v2 = vrot.slane %v2230_v62, 4  ;;  %v7829_v6 = vcombine.low %v1758_v24, %v1768_v40  ;;  %v1787_v7 = vrot.slane %v1786_v63, 4  ;;  %v7815_v62 = vld [vmem:[%s9939_s17 + $0x54] sm:$0xf]  ;;  %v9492_v24 = vld [vmem:[%s12238_s1 + $0x1a0] sm:$0xff]  }
  0x97   : > { %8865 = vmatprep.mubr.bf16.mxu1 %v7865_v0  ;;  %v2237_v34 = vrot.slane %v10422_v33, 5  ;;  %v1782_v9 = vsel %vm9983_vm2, %v1777_v50, %v1781_v55  ;;  %v1797_v0 = vshll.u32 %v7809_v49, 16  ;;  %v1805_v15 = vrot.slane %v1803_v35, 5  ;;  %v10520_v40 = vld [vmem:[%s9939_s17 + $0x58] sm:$0xf] }
  0x98   : > { %v2234_v12 = vsel %vm10210_vm5, %v2232_v2, %v2233_v10  ;;  %v1792_v21 = vsel %vm9983_vm2, %v1787_v7, %v1791_v61  ;;  %v1815_v45 = vrot.slane %v1813_v44, 5  ;;  %v1820_v52 = vrot.slane %v1818_v58, 4  ;;  %v10523_v50 = vld [vmem:[%s9939_s17 + $0x5c] sm:$0x1] }
  0x99   : > { %v7867_v33 = vcombine.low %v2231_v43, %v2234_v12  ;;  %v2238_v25 = vsel %vm10210_vm5, %v7858_v11, %v2237_v34  ;;  %v2239_v16 = vrot.slane %v2237_v34, 4  ;;  %v7830_v57 = vcombine.low %v1782_v9, %v1792_v21  ;;  %v9497_v7 = vld [vmem:[%s12238_s1 + $0x1d8] sm:$0xff]  }
  0x9a   : > { %v1799_v30 = vrot.slane %v1797_v0, 5  ;;  %v1827_v32 = vshll.u32 %v10475_v19, 16  ;;  %v1823_v42 = vrot.slane %v1821_v47, 5  ;;  %v1837_v23 = vshll.u32 %v10486_v26, 16 }
  0x9b   : > { %v7859_v29 = vrot.slane %v7849_v36, 9  ;;  %v2244_v55 = vrot.slane %v10462_v4, 5  ;;  %v2247_v11 = vrot.slane %v10467_v8, 5  ;;  %v2254_v8 = vrot.slane %v10486_v26, 5  ;;  %v10546_v26 = vld [vmem:[%s9939_s17 + $0x68] sm:$0x1] }
  0x9c   : > { %v1800_v1 = vor.u32 %v1799_v30, %v1796_v27  ;;  %v1829_v13 = vrot.slane %v1827_v32, 5  ;;  %v1824_v31 = vor.u32 %v1823_v42, %v1820_v52  ;;  %v1839_v61 = vrot.slane %v1837_v23, 5  ;;  %v9496_v32 = vld [vmem:[%s12238_s1 + $0x190] sm:$0xff]  }
  0x9d   : > { %8830 = vmatmul.mubr.bf16.vlgmr.msra.gmra.mxu0 %v10431_v28  ;;  %v9489_v28 = vld [vmem:[%s12238_s1 + $0x1a8] sm:$0xff]   ;;  %v2245_v63 = vsel %vm10210_vm5, %v7859_v29, %v2244_v55  ;;  %v2246_v10 = vrot.slane %v2244_v55, 4  ;;  %v1842_v9 = vshrl.u32 %v7815_v62, 16  ;;  %v1851_v30 = vshll.u32 %v10520_v40, 16 }
  0x9e   : > { %8866 = vmatmul.mubr.bf16.vlgmr.msra.gmra.mxu1 %v7866_v38  ;;  %v2241_v38 = vsel %vm10210_vm5, %v2239_v16, %v2240_v48  ;;  %8886 = vmatpush3.bf16.msra.mxu0 %v10404_v5  ;;  %v1801_v53 = vrot.slane %v1800_v1, 4  ;;  %v1831_v5 = vshrl.u32 %v10475_v19, 16  ;;  %v1825_v43 = vrot.slane %v1824_v31, 4 }
  0x9f   : > { %8922 = vmatpush3.bf16.msra.mxu1 %v10399_v59  ;;  %8869 = vmatprep.mubr.bf16.mxu1 %v7867_v33  ;;  %v1807_v59 = vshrl.u32 %v10462_v4, 16  ;;  %v7868_v46 = vcombine.low %v2238_v25, %v2241_v38  ;;  %v2251_v4 = vrot.slane %v10475_v19, 5  ;;  %v2248_v48 = vsel %vm10210_vm5, %v2246_v10, %v2247_v11  ;;  %v10538_v19 = vld [vmem:[%s9939_s17 + $0x64] sm:$0xf]  ;;  %v9494_v33 = vld [vmem:[%s12238_s1 + $0x198] sm:$0xff]   ;;  %v9498_v10 = vld [vmem:[%s12238_s1 + $0x188] sm:$0xff]  }
  0xa0   : > { %8923 = vmatprep.subr.bf16.mxu1 %v9491_v3  ;;  %8833 = vmatprep.mubr.bf16.mxu0 %v7829_v6  ;;  %v1806_v56 = vsel %vm9983_vm2, %v1801_v53, %v1805_v15  ;;  %v1833_v60 = vrot.slane %v1831_v5, 4  ;;  %v7818_v6 = vld [vmem:[%s9939_s17 + $0x60] sm:$0xf]  ;;  %v1830_v17 = vsel %vm9983_vm2, %v1825_v43, %v1829_v13  ;;  %v7869_v18 = vcombine.low %v2245_v63, %v2248_v48  ;;  %v7821_v11 = vld [vmem:[%s9939_s17 + $0x6c] sm:$0xf] }
  0xa1   : > { %8887 = vmatprep.subr.bf16.mxu0 %v9488_v20  ;;  %v1809_v51 = vrot.slane %v1807_v59, 4  ;;  %v2253_v21 = vrot.slane %v2251_v4, 4  ;;  %v1844_v25 = vrot.slane %v1842_v9, 4  ;;  %v1845_v16 = vshll.u32 %v7815_v62, 16  ;;  %v7824_v9 = vld [vmem:[%s9939_s17 + $0x78] sm:$0xf] }
  0xa2   : > { %8888 = vmatpush3.bf16.msra.mxu0 %v9488_v20  ;;  %v1834_v2 = vor.u32 %v1833_v60, %v1829_v13  ;;  %v1855_v35 = vshrl.u32 %v10520_v40, 16  ;;  %v1861_v36 = vshll.u32 %v10523_v50, 16  ;;  %v1866_v58 = vshrl.u32 %v7818_v6, 16 }
  0xa3   : > { %8924 = vmatpush3.bf16.msra.mxu1 %v9491_v3  ;;  %v1810_v54 = vor.u32 %v1809_v51, %v1805_v15  ;;  %8889 = vmatprep.subr.bf16.mxu0 %v9489_v28  ;;  %v7860_v3 = vrot.slane %v7850_v22, 9  ;;  %v2255_v59 = vsel %vm10210_vm5, %v2253_v21, %v2254_v8  ;;  %v1847_v44 = vrot.slane %v1845_v16, 5  ;;  %v7852_v22 = vld [vmem:[%s9939_s17 + $0x60] sm:$0xe]  ;;  %v10604_v16 = vld [vmem:[%s9939_s17 + $0x80] sm:$0x1] }
  0xa4   : > { %8925 = vmatprep.subr.bf16.mxu1 %v9493_v37  ;;  %v1835_v0 = vrot.slane %v1834_v2, 4  ;;  %v1853_v1 = vrot.slane %v1851_v30, 5  ;;  %v1857_v15 = vrot.slane %v1855_v35, 4  ;;  %v1863_v47 = vrot.slane %v1861_v36, 5 }
  0xa5   : > { %v1811_v49 = vrot.slane %v1810_v54, 4  ;;  %8834 = vmatmul.mubr.bf16.gmra.mxu0 %v7830_v57  ;;  %v2252_v20 = vsel %vm10210_vm5, %v7860_v3, %v2251_v4  ;;  %v7851_v57 = vld [vmem:[%s9939_s17 + $0x54] sm:$0xe]  ;;  %v1868_v51 = vrot.slane %v1866_v58, 4  ;;  %v1875_v52 = vshll.u32 %v10538_v19, 16 }
  0xa6   : > { %8870 = vmatmul.mubr.bf16.gmra.mxu1 %v7868_v46  ;;  %8890 = vmatpush3.bf16.msra.mxu0 %v9489_v28  ;;  %v1840_v27 = vsel %vm9983_vm2, %v1835_v0, %v1839_v61  ;;  %v7870_v46 = vcombine.low %v2252_v20, %v2255_v59  ;;  %v1848_v28 = vor.u32 %v1847_v44, %v1844_v25  ;;  %v1879_v42 = vshrl.u32 %v10538_v19, 16  ;;  %v10586_v4 = vld [vmem:[%s9939_s17 + $0x70] sm:$0xf] }
  0xa7   : > { %8926 = vmatpush3.bf16.msra.mxu1 %v9493_v37  ;;  %v1816_v34 = vsel %vm9983_vm2, %v1811_v49, %v1815_v45  ;;  %8891 = vmatprep.subr.bf16.mxu0 %v9492_v24  ;;  %v9499_v37 = vld [vmem:[%s12238_s1 + $0x1d0] sm:$0xff]   ;;  %v7832_v38 = vcombine.low %v1830_v17, %v1840_v27  ;;  %v1869_v45 = vshll.u32 %v7818_v6, 16  ;;  %v1858_v53 = vor.u32 %v1857_v15, %v1853_v1 }
  0xa8   : > { %8927 = vmatprep.subr.bf16.mxu1 %v9495_v41  ;;  %v7831_v12 = vcombine.low %v1806_v56, %v1816_v34  ;;  %8873 = vmatprep.mubr.bf16.mxu1 %v7869_v18  ;;  %v1885_v5 = vshll.u32 %v10546_v26, 16  ;;  %v7861_v23 = vrot.slane %v7851_v57, 9  ;;  %v1849_v54 = vrot.slane %v1848_v28, 4  ;;  %v10589_v6 = vld [vmem:[%s9939_s17 + $0x74] sm:$0x1]  ;;  %v9501_v57 = vld [vmem:[%s12238_s1 + $0x180] sm:$0xff]  }
  0xa9   : > { %v1871_v13 = vrot.slane %v1869_v45, 5  ;;  %v1877_v29 = vrot.slane %v1875_v52, 5  ;;  %v2258_v55 = vrot.slane %v10520_v40, 5  ;;  %v1859_v56 = vrot.slane %v1858_v53, 4  ;;  %v9502_v40 = vld [vmem:[%s12238_s1 + $0x1c0] sm:$0xff]  }
  0xaa   : > { %8837 = vmatprep.mubr.bf16.mxu0 %v7831_v12  ;;  %8892 = vmatpush3.bf16.msra.mxu0 %v9492_v24  ;;  %v1881_v31 = vrot.slane %v1879_v42, 4  ;;  %v1887_v60 = vrot.slane %v1885_v5, 5  ;;  %v2261_v61 = vrot.slane %v10523_v50, 5  ;;  %v1854_v62 = vsel %vm9983_vm2, %v1849_v54, %v1853_v1 }
  0xab   : > { %8928 = vmatpush3.bf16.msra.mxu1 %v9495_v41  ;;  %8893 = vmatprep.subr.bf16.mxu0 %v9494_v33  ;;  %v9500_v41 = vld [vmem:[%s12238_s1 + $0x1c8] sm:$0xff]   ;;  %v1872_v49 = vor.u32 %v1871_v13, %v1868_v51  ;;  %v2259_v24 = vsel %vm10210_vm5, %v7861_v23, %v2258_v55  ;;  %v2260_v63 = vrot.slane %v2258_v55, 4  ;;  %v1864_v50 = vsel %vm9983_vm2, %v1859_v56, %v1863_v47  ;;  %v7854_v47 = vld [vmem:[%s9939_s17 + $0x78] sm:$0xe] }
  0xac   : > { %8929 = vmatprep.subr.bf16.mxu1 %v9497_v7  ;;  %v1882_v43 = vor.u32 %v1881_v31, %v1877_v29  ;;  %v7862_v2 = vrot.slane %v7852_v22, 9  ;;  %v2265_v3 = vrot.slane %v10538_v19, 5  ;;  %v2268_v8 = vrot.slane %v10546_v26, 5  ;;  %v10598_v19 = vld [vmem:[%s9939_s17 + $0x7c] sm:$0xf] }
  0xad   : > { %8838 = vmatmul.mubr.bf16.gmra.mxu0 %v7832_v38  ;;  %v1873_v34 = vrot.slane %v1872_v49, 4  ;;  %v2262_v48 = vsel %vm10210_vm5, %v2260_v63, %v2261_v61  ;;  %v1890_v21 = vshrl.u32 %v7821_v11, 16  ;;  %v1899_v25 = vshll.u32 %v10586_v4, 16  ;;  %v7853_v26 = vld [vmem:[%s9939_s17 + $0x6c] sm:$0xe] }
  0xae   : > { %8874 = vmatmul.mubr.bf16.gmra.mxu1 %v7870_v46  ;;  %8894 = vmatpush3.bf16.msra.mxu0 %v9494_v33  ;;  %v1883_v12 = vrot.slane %v1882_v43, 4  ;;  %v7871_v17 = vcombine.low %v2259_v24, %v2262_v48  ;;  %v2266_v0 = vsel %vm10210_vm5, %v7862_v2, %v2265_v3  ;;  %v2267_v18 = vrot.slane %v2265_v3, 4  ;;  %v7921_v24 = vld [vmem:[%s9939_s17 + $0x18] sm:$0xf]  ;;  %v10640_v43 = vld [vmem:[%s9939_s17 + $0x20] sm:$0x1] }
  0xaf   : > { %8930 = vmatpush3.bf16.msra.mxu1 %v9497_v7  ;;  %8895 = vmatprep.subr.bf16.mxu0 %v9496_v32  ;;  %v7833_v7 = vcombine.low %v1854_v62, %v1864_v50  ;;  %v1878_v20 = vsel %vm9983_vm2, %v1873_v34, %v1877_v29  ;;  %v1893_v33 = vshll.u32 %v7821_v11, 16  ;;  %v1903_v35 = vshrl.u32 %v10586_v4, 16  ;;  %v10637_v50 = vld [vmem:[%s9939_s17 + $0x1c] sm:$0xf]  ;;  %v10645_v34 = vld [vmem:[%s9939_s17 + $0x28] sm:$0xf] }
  0xb0   : > { %8931 = vmatprep.subr.bf16.mxu1 %v9499_v37  ;;  %v1888_v27 = vsel %vm9983_vm2, %v1883_v12, %v1887_v60  ;;  %8877 = vmatprep.mubr.bf16.mxu1 %v7871_v17  ;;  %v2269_v30 = vsel %vm10210_vm5, %v2267_v18, %v2268_v8  ;;  %v1909_v36 = vshll.u32 %v10589_v6, 16  ;;  %v1892_v59 = vrot.slane %v1890_v21, 4 }
  0xb1   : > { %8841 = vmatprep.mubr.bf16.mxu0 %v7833_v7  ;;  %v7872_v38 = vcombine.low %v2266_v0, %v2269_v30  ;;  %v1895_v44 = vrot.slane %v1893_v33, 5  ;;  %v1901_v58 = vrot.slane %v1899_v25, 5  ;;  %v1905_v46 = vrot.slane %v1903_v35, 4  ;;  %v7924_v7 = vld [vmem:[%s9939_s17 + $0x24] sm:$0xf] }
  0xb2   : > { %8896 = vmatpush3.bf16.msra.mxu0 %v9496_v32  ;;  %v1911_v1 = vrot.slane %v1909_v36, 5  ;;  %v1914_v15 = vshrl.u32 %v7824_v9, 16  ;;  %v1917_v51 = vshll.u32 %v7824_v9, 16  ;;  %v1923_v45 = vshll.u32 %v10598_v19, 16  ;;  %v10622_v32 = vld [vmem:[%s12238_s1 + $0x238] sm:$0xff]  }
  0xb3   : > { %8932 = vmatpush3.bf16.msra.mxu1 %v9499_v37  ;;  %8897 = vmatprep.subr.bf16.mxu0 %v9498_v10  ;;  %v7834_v37 = vcombine.low %v1878_v20, %v1888_v27  ;;  %v1896_v28 = vor.u32 %v1895_v44, %v1892_v59  ;;  %v1927_v52 = vshrl.u32 %v10598_v19, 16  ;;  %v1906_v53 = vor.u32 %v1905_v46, %v1901_v58  ;;  %v10662_v35 = vld [vmem:[%s9939_s17 + $0x2c] sm:$0x1]  ;;  %v7927_v44 = vld [vmem:[%s9939_s17 + $0x30] sm:$0xf] }
  0xb4   : > { %8933 = vmatprep.subr.bf16.mxu1 %v9500_v41  ;;  %v1916_v42 = vrot.slane %v1914_v15, 4  ;;  %v1933_v5 = vshll.u32 %v10604_v16, 16  ;;  %v7863_v23 = vrot.slane %v7853_v26, 9  ;;  %v1919_v54 = vrot.slane %v1917_v51, 5 }
  0xb5   : > { %8842 = vmatmul.mubr.bf16.gmra.mxu0 %v7834_v37  ;;  %v1925_v13 = vrot.slane %v1923_v45, 5  ;;  %v1929_v29 = vrot.slane %v1927_v52, 4  ;;  %v1907_v55 = vrot.slane %v1906_v53, 4  ;;  %v2272_v56 = vrot.slane %v10586_v4, 5  ;;  %v10672_v53 = vld [vmem:[%s9939_s17 + $0x38] sm:$0x1] }
  0xb6   : > { %8898 = vmatpush3.bf16.msra.mxu0 %v9498_v10  ;;  %8878 = vmatmul.mubr.bf16.gmra.mxu1 %v7872_v38  ;;  %v1935_v22 = vrot.slane %v1933_v5, 5  ;;  %v2275_v31 = vrot.slane %v10589_v6, 5  ;;  %v1920_v61 = vor.u32 %v1919_v54, %v1916_v42  ;;  %v7864_v49 = vrot.slane %v7854_v47, 9  ;;  %v10668_v47 = vld [vmem:[%s9939_s17 + $0x34] sm:$0xf]  ;;  %v9504_v42 = vld [vmem:[%s9939_s17 + $0x24] sm:$0xff]  }
  0xb7   : > { %8934 = vmatpush3.bf16.msra.mxu1 %v9500_v41  ;;  %8899 = vmatprep.subr.bf16.mxu0 %v9501_v57  ;;  %v1897_v41 = vrot.slane %v1896_v28, 4  ;;  %v1930_v62 = vor.u32 %v1929_v29, %v1925_v13  ;;  %v1912_v63 = vsel %vm9983_vm2, %v1907_v55, %v1911_v1  ;;  %v2273_v10 = vsel %vm10210_vm5, %v7863_v23, %v2272_v56 }
  0xb8   : > { %8935 = vmatprep.subr.bf16.mxu1 %v9502_v40  ;;  %v2274_v11 = vrot.slane %v2272_v56, 4  ;;  %v1921_v3 = vrot.slane %v1920_v61, 4  ;;  %v2282_v6 = vrot.slane %v10604_v16, 5  ;;  %v2830_v12 = vshrl.u32 %v7921_v24, 16  ;;  %v9507_v56 = vld [vmem:[%s9939_s17 + $0x30] sm:$0xff]  }
  0xb9   : > { %v1902_v60 = vsel %vm9983_vm2, %v1897_v41, %v1901_v58  ;;  %v1931_v4 = vrot.slane %v1930_v62, 4  ;;  %v2833_v20 = vshll.u32 %v7921_v24, 16  ;;  %v2839_v16 = vshll.u32 %v10637_v50, 16 }
  0xba   : > { %8900 = vmatpush3.bf16.msra.mxu0 %v9501_v57  ;;  %v7835_v2 = vcombine.low %v1902_v60, %v1912_v63  ;;  %v2276_v48 = vsel %vm10210_vm5, %v2274_v11, %v2275_v31  ;;  %v1926_v17 = vsel %vm9983_vm2, %v1921_v3, %v1925_v13  ;;  %v2832_v25 = vrot.slane %v2830_v12, 4  ;;  %v7930_v13 = vld [vmem:[%s9939_s17 + $0x3c] sm:$0xf]  ;;  %v10684_v63 = vld [vmem:[%s9939_s17 + $0x40] sm:$0xf] }
  0xbb   : > { %8936 = vmatpush3.bf16.msra.mxu1 %v9502_v40  ;;  %8957 = vmatprep.subr.bf16.mxu0 %v10622_v32  ;;  %v2279_v40 = vrot.slane %v10598_v19, 5  ;;  %v1936_v0 = vsel %vm9983_vm2, %v1931_v4, %v1935_v22  ;;  %v7873_v18 = vcombine.low %v2273_v10, %v2276_v48  ;;  %v9503_v19 = vld [vmem:[%s9939_s17 + $0x18] sm:$0xff]   ;;  %v2835_v57 = vrot.slane %v2833_v20, 5  ;;  %v9506_v22 = vld [vmem:[%s12238_s1 + $0x230] sm:$0xff]   ;;  %v10688_v3 = vld [vmem:[%s9939_s17 + $0x44] sm:$0x1] }
  0xbc   : > { %8845 = vmatprep.mubr.bf16.mxu0 %v7835_v2  ;;  %v7836_v21 = vcombine.low %v1926_v17, %v1936_v0  ;;  %v2843_v27 = vshrl.u32 %v10637_v50, 16  ;;  %v2849_v30 = vshll.u32 %v10640_v43, 16  ;;  %v2841_v36 = vrot.slane %v2839_v16, 5  ;;  %v9520_v0 = vld [vmem:[%s12242_s5 + $0x38] sm:$0xff]  }
  0xbd   : > { %v2280_v8 = vsel %vm10210_vm5, %v7864_v49, %v2279_v40  ;;  %v2281_v9 = vrot.slane %v2279_v40, 4  ;;  %8881 = vmatprep.mubr.bf16.mxu1 %v7873_v18  ;;  %v2854_v37 = vshrl.u32 %v7924_v7, 16  ;;  %v2857_v38 = vshll.u32 %v7924_v7, 16  ;;  %v9508_v16 = vld [vmem:[%s9939_s17 + $0x3c] sm:$0xff]   ;;  %8993 = vmatprep.subr.bf16.mxu1 %v9520_v0 }
  0xbe   : > { %8846 = vmatmul.mubr.bf16.gmra.mxu0 %v7836_v21  ;;  %v2863_v59 = vshll.u32 %v10645_v34, 16  ;;  %v2836_v58 = vor.u32 %v2835_v57, %v2832_v25  ;;  %v2845_v46 = vrot.slane %v2843_v27, 4  ;;  %v2851_v1 = vrot.slane %v2849_v30, 5  ;;  %v7933_v27 = vld [vmem:[%s9939_s17 + $0x48] sm:$0xf] }
  0xbf   : > { %v2283_v33 = vsel %vm10210_vm5, %v2281_v9, %v2282_v6  ;;  %8901 = vmatprep.mubr.bf16.mxu0 %v9503_v19  ;;  %v2867_v15 = vshrl.u32 %v10645_v34, 16  ;;  %v2856_v28 = vrot.slane %v2854_v37, 4  ;;  %v2859_v51 = vrot.slane %v2857_v38, 5  ;;  %v10708_v30 = vld [vmem:[%s9939_s17 + $0x4c] sm:$0xf] }
  0xc0   : > { %v7874_v26 = vcombine.low %v2280_v8, %v2283_v33  ;;  %v2865_v45 = vrot.slane %v2863_v59, 5  ;;  %v2873_v52 = vshll.u32 %v10662_v35, 16  ;;  %v2837_v5 = vrot.slane %v2836_v58, 4  ;;  %v9509_v33 = vld [vmem:[%s12238_s1 + $0x228] sm:$0xff]   ;;  %v10713_v59 = vld [vmem:[%s9939_s17 + $0x50] sm:$0x1] }
  0xc1   : > { %v2846_v23 = vor.u32 %v2845_v46, %v2841_v36  ;;  %v2869_v41 = vrot.slane %v2867_v15, 4  ;;  %v2878_v54 = vshrl.u32 %v7927_v44, 16  ;;  %v2860_v29 = vor.u32 %v2859_v51, %v2856_v28  ;;  %v7936_v28 = vld [vmem:[%s9939_s17 + $0x54] sm:$0xf] }
  0xc2   : > { %8882 = vmatmul.mubr.bf16.gmra.mxu1 %v7874_v26  ;;  %v2875_v55 = vrot.slane %v2873_v52, 5  ;;  %v2881_v31 = vshll.u32 %v7927_v44, 16  ;;  %v2887_v60 = vshll.u32 %v10668_v47, 16  ;;  %v2842_v61 = vsel %vm9983_vm2, %v2837_v5, %v2841_v36  ;;  %v9522_v51 = vld [vmem:[%s12242_s5 + $0x30] sm:$0xff]   ;;  %v9510_v5 = vld [vmem:[%s9939_s17 + $0x48] sm:$0xff]  }
  0xc3   : > { %v2847_v62 = vrot.slane %v2846_v23, 4  ;;  %v2870_v49 = vor.u32 %v2869_v41, %v2865_v45  ;;  %v2880_v24 = vrot.slane %v2878_v54, 4  ;;  %v2861_v10 = vrot.slane %v2860_v29, 4  ;;  %v10723_v41 = vld [vmem:[%s9939_s17 + $0x58] sm:$0xf] }
  0xc4   : > { %v2883_v11 = vrot.slane %v2881_v31, 5  ;;  %v2889_v40 = vrot.slane %v2887_v60, 5  ;;  %v2891_v2 = vshrl.u32 %v10668_v47, 16  ;;  %v2897_v7 = vshll.u32 %v10672_v53, 16 }
  0xc5   : > { %v2852_v4 = vsel %vm9983_vm2, %v2847_v62, %v2851_v1  ;;  %v2871_v6 = vrot.slane %v2870_v49, 4  ;;  %v2902_v48 = vshrl.u32 %v7930_v13, 16  ;;  %v2866_v9 = vsel %vm9983_vm2, %v2861_v10, %v2865_v45 }
  0xc6   : > { %8902 = vmatmul.mubr.bf16.vlgmr.msra.gmra.mxu0 %v9504_v42  ;;  %v7951_v8 = vcombine.low %v2842_v61, %v2852_v4  ;;  %v2884_v12 = vor.u32 %v2883_v11, %v2880_v24  ;;  %v2893_v17 = vrot.slane %v2891_v2, 4  ;;  %v2899_v19 = vrot.slane %v2897_v7, 5 }
  0xc7   : > { %8958 = vmatpush3.bf16.msra.mxu0 %v10622_v32  ;;  %v2876_v18 = vsel %vm9983_vm2, %v2871_v6, %v2875_v55  ;;  %8905 = vmatprep.mubr.bf16.mxu0 %v9507_v56  ;;  %v2904_v20 = vrot.slane %v2902_v48, 4  ;;  %v2905_v21 = vshll.u32 %v7930_v13, 16  ;;  %v2911_v32 = vshll.u32 %v10684_v63, 16  ;;  %v9511_v13 = vld [vmem:[%s12238_s1 + $0x220] sm:$0xff]   ;;  %v10733_v56 = vld [vmem:[%s9939_s17 + $0x5c] sm:$0x1] }
  0xc8   : > { %8937 = vmatprep.mubr.bf16.mxu1 %v7951_v8  ;;  %v7952_v25 = vcombine.low %v2866_v9, %v2876_v18  ;;  %8959 = vmatprep.subr.bf16.mxu0 %v9506_v22  ;;  %v2885_v26 = vrot.slane %v2884_v12, 4  ;;  %v2894_v57 = vor.u32 %v2893_v17, %v2889_v40  ;;  %v2915_v37 = vshrl.u32 %v10684_v63, 16  ;;  %v9512_v48 = vld [vmem:[%s9939_s17 + $0x54] sm:$0xff]  }
  0xc9   : > { %v2907_v36 = vrot.slane %v2905_v21, 5  ;;  %v2921_v38 = vshll.u32 %v10688_v3, 16  ;;  %v2926_v44 = vshrl.u32 %v7933_v27, 16  ;;  %v2913_v1 = vrot.slane %v2911_v32, 5  ;;  %v9514_v32 = vld [vmem:[%s9939_s17 + $0x60] sm:$0xff]  }
  0xca   : > { %8938 = vmatmul.mubr.bf16.vlgmr.msra.gmra.mxu1 %v7952_v25  ;;  %v2890_v58 = vsel %vm9983_vm2, %v2885_v26, %v2889_v40  ;;  %v2895_v46 = vrot.slane %v2894_v57, 4  ;;  %v2929_v15 = vshll.u32 %v7933_v27, 16  ;;  %v2917_v52 = vrot.slane %v2915_v37, 4  ;;  %v9523_v40 = vld [vmem:[%s12242_s5 + $0x28] sm:$0xff]   ;;  %v7939_v27 = vld [vmem:[%s9939_s17 + $0x60] sm:$0xf] }
  0xcb   : > { %8960 = vmatpush3.bf16.msra.mxu0 %v9506_v22  ;;  %v2908_v45 = vor.u32 %v2907_v36, %v2904_v20  ;;  %v2923_v42 = vrot.slane %v2921_v38, 5  ;;  %v2928_v23 = vrot.slane %v2926_v44, 4  ;;  %8994 = vmatpush3.bf16.msra.mxu1 %v9520_v0  ;;  %v2935_v55 = vshll.u32 %v10708_v30, 16  ;;  %v9513_v0 = vld [vmem:[%s12238_s1 + $0x218] sm:$0xff]   ;;  %v10758_v36 = vld [vmem:[%s9939_s17 + $0x64] sm:$0xf] }
  0xcc   : > { %v2900_v54 = vsel %vm9983_vm2, %v2895_v46, %v2899_v19  ;;  %8961 = vmatprep.subr.bf16.mxu0 %v9509_v33  ;;  %v2931_v29 = vrot.slane %v2929_v15, 5  ;;  %v2939_v22 = vshrl.u32 %v10708_v30, 16  ;;  %8995 = vmatprep.subr.bf16.mxu1 %v9522_v51  ;;  %v2918_v61 = vor.u32 %v2917_v52, %v2913_v1  ;;  %v9525_v52 = vld [vmem:[%s12242_s5 + $0x18] sm:$0xff]  }
  0xcd   : > { %v7953_v31 = vcombine.low %v2890_v58, %v2900_v54  ;;  %v2909_v60 = vrot.slane %v2908_v45, 4  ;;  %v2945_v62 = vshll.u32 %v10713_v59, 16  ;;  %v2937_v24 = vrot.slane %v2935_v55, 5  ;;  %v10761_v58 = vld [vmem:[%s9939_s17 + $0x68] sm:$0x1] }
  0xce   : > { %8906 = vmatmul.mubr.bf16.gmra.mxu0 %v9508_v16  ;;  %v2932_v49 = vor.u32 %v2931_v29, %v2928_v23  ;;  %v2941_v10 = vrot.slane %v2939_v22, 4  ;;  %v2950_v11 = vshrl.u32 %v7936_v28, 16  ;;  %v2919_v4 = vrot.slane %v2918_v61, 4 }
  0xcf   : > { %8941 = vmatprep.mubr.bf16.mxu1 %v7953_v31  ;;  %v2914_v2 = vsel %vm9983_vm2, %v2909_v60, %v2913_v1  ;;  %8962 = vmatpush3.bf16.msra.mxu0 %v9509_v33  ;;  %v2947_v6 = vrot.slane %v2945_v62, 5  ;;  %v2953_v7 = vshll.u32 %v7936_v28, 16  ;;  %v2959_v17 = vshll.u32 %v10723_v41, 16  ;;  %v9524_v33 = vld [vmem:[%s12242_s5 + $0x20] sm:$0xff]   ;;  %v9516_v1 = vld [vmem:[%s12238_s1 + $0x210] sm:$0xff]  }
  0xd0   : > { %8909 = vmatprep.mubr.bf16.mxu0 %v9510_v5  ;;  %8963 = vmatprep.subr.bf16.mxu0 %v9511_v13  ;;  %v2933_v8 = vrot.slane %v2932_v49, 4  ;;  %v2942_v9 = vor.u32 %v2941_v10, %v2937_v24  ;;  %v2952_v12 = vrot.slane %v2950_v11, 4  ;;  %v2924_v18 = vsel %vm9983_vm2, %v2919_v4, %v2923_v42  ;;  %v10776_v60 = vld [vmem:[%s9939_s17 + $0x70] sm:$0xf]  ;;  %v10781_v49 = vld [vmem:[%s9939_s17 + $0x74] sm:$0x1] }
  0xd1   : > { %v2955_v19 = vrot.slane %v2953_v7, 5  ;;  %v2963_v20 = vshrl.u32 %v10723_v41, 16  ;;  %v2969_v21 = vshll.u32 %v10733_v56, 16  ;;  %8996 = vmatpush3.bf16.msra.mxu1 %v9522_v51  ;;  %v7954_v25 = vcombine.low %v2914_v2, %v2924_v18  ;;  %v9517_v11 = vld [vmem:[%s12238_s1 + $0x208] sm:$0xff]  }
  0xd2   : > { %v2938_v16 = vsel %vm9983_vm2, %v2933_v8, %v2937_v24  ;;  %v2943_v26 = vrot.slane %v2942_v9, 4  ;;  %v2961_v57 = vrot.slane %v2959_v17, 5  ;;  %8997 = vmatprep.subr.bf16.mxu1 %v9523_v40  ;;  %v2974_v46 = vshrl.u32 %v7939_v27, 16  ;;  %v9518_v17 = vld [vmem:[%s9939_s17 + $0x78] sm:$0xff]  }
  0xd3   : > { %8964 = vmatpush3.bf16.msra.mxu0 %v9511_v13  ;;  %v2956_v37 = vor.u32 %v2955_v19, %v2952_v12  ;;  %v2965_v38 = vrot.slane %v2963_v20, 4  ;;  %v2971_v44 = vrot.slane %v2969_v21, 5  ;;  %8942 = vmatmul.mubr.bf16.gmra.mxu1 %v7954_v25  ;;  %v2977_v28 = vshll.u32 %v7939_v27, 16  ;;  %v7942_v13 = vld [vmem:[%s9939_s17 + $0x6c] sm:$0xf]  ;;  %v9526_v21 = vld [vmem:[%s12242_s5 + $0x10] sm:$0xff]  }
  0xd4   : > { %v2948_v15 = vsel %vm9983_vm2, %v2943_v26, %v2947_v6  ;;  %8965 = vmatprep.subr.bf16.mxu0 %v9513_v0  ;;  %v2983_v51 = vshll.u32 %v10758_v36, 16  ;;  %v2987_v45 = vshrl.u32 %v10758_v36, 16  ;;  %v2976_v54 = vrot.slane %v2974_v46, 4  ;;  %v7945_v27 = vld [vmem:[%s9939_s17 + $0x78] sm:$0xf] }
  0xd5   : > { %v7955_v42 = vcombine.low %v2938_v16, %v2948_v15  ;;  %v2957_v5 = vrot.slane %v2956_v37, 4  ;;  %v2966_v23 = vor.u32 %v2965_v38, %v2961_v57  ;;  %8998 = vmatpush3.bf16.msra.mxu1 %v9523_v40  ;;  %v2979_v29 = vrot.slane %v2977_v28, 5  ;;  %v9515_v40 = vld [vmem:[%s9939_s17 + $0x6c] sm:$0xff]   ;;  %v10805_v37 = vld [vmem:[%s9939_s17 + $0x7c] sm:$0xf] }
  0xd6   : > { %8910 = vmatmul.mubr.bf16.gmra.mxu0 %v9512_v48  ;;  %v2985_v55 = vrot.slane %v2983_v51, 5  ;;  %v2989_v22 = vrot.slane %v2987_v45, 4  ;;  %v2993_v31 = vshll.u32 %v10761_v58, 16  ;;  %8999 = vmatprep.subr.bf16.mxu1 %v9524_v33  ;;  %v2998_v24 = vshrl.u32 %v7942_v13, 16  ;;  %v10808_v38 = vld [vmem:[%s9939_s17 + $0x80] sm:$0x1] }
  0xd7   : > { %8945 = vmatprep.mubr.bf16.mxu1 %v7955_v42  ;;  %v2962_v61 = vsel %vm9983_vm2, %v2957_v5, %v2961_v57  ;;  %v2967_v62 = vrot.slane %v2966_v23, 4  ;;  %8966 = vmatpush3.bf16.msra.mxu0 %v9513_v0  ;;  %v3001_v10 = vshll.u32 %v7942_v13, 16  ;;  %v2980_v2 = vor.u32 %v2979_v29, %v2976_v54  ;;  %v7948_v23 = vld [vmem:[%s9939_s17 + $0x84] sm:$0xf] }
  0xd8   : > { %8913 = vmatprep.mubr.bf16.mxu0 %v9514_v32  ;;  %v2990_v4 = vor.u32 %v2989_v22, %v2985_v55  ;;  %v2995_v6 = vrot.slane %v2993_v31, 5  ;;  %8967 = vmatprep.subr.bf16.mxu0 %v9516_v1  ;;  %v3007_v7 = vshll.u32 %v10776_v60, 16  ;;  %v3000_v8 = vrot.slane %v2998_v24, 4 }
  0xd9   : > { %v2972_v48 = vsel %vm9983_vm2, %v2967_v62, %v2971_v44  ;;  %v3003_v9 = vrot.slane %v3001_v10, 5  ;;  %v3011_v12 = vshrl.u32 %v10776_v60, 16  ;;  %9000 = vmatpush3.bf16.msra.mxu1 %v9524_v33  ;;  %v2981_v18 = vrot.slane %v2980_v2, 4  ;;  %v9521_v33 = vld [vmem:[%s12238_s1 + $0x200] sm:$0xff]   ;;  %v9527_v44 = vld [vmem:[%s12242_s5 + $0x8] sm:$0xff]  }
  0xda   : > { %v7956_v0 = vcombine.low %v2962_v61, %v2972_v48  ;;  %v2991_v19 = vrot.slane %v2990_v4, 4  ;;  %v3009_v20 = vrot.slane %v3007_v7, 5  ;;  %9001 = vmatprep.subr.bf16.mxu1 %v9525_v52  ;;  %v3017_v26 = vshll.u32 %v10781_v49, 16  ;;  %v9519_v10 = vld [vmem:[%s9939_s17 + $0x84] sm:$0xff]  }
  0xdb   : > { %v3004_v25 = vor.u32 %v3003_v9, %v3000_v8  ;;  %v3013_v16 = vrot.slane %v3011_v12, 4  ;;  %8968 = vmatpush3.bf16.msra.mxu0 %v9516_v1  ;;  %v2986_v57 = vsel %vm9983_vm2, %v2981_v18, %v2985_v55  ;;  %v3022_v51 = vshrl.u32 %v7945_v27, 16  ;;  %v10820_v55 = vld [vmem:[%s9939_s17 + $0x88] sm:$0xf]  ;;  %v9528_v8 = vld [vmem:[%s12242_s5] sm:$0xff]  }
  0xdc   : > { %8946 = vmatmul.mubr.bf16.gmra.mxu1 %v7956_v0  ;;  %v2996_v32 = vsel %vm9983_vm2, %v2991_v19, %v2995_v6  ;;  %8969 = vmatprep.subr.bf16.mxu0 %v9517_v11  ;;  %v3019_v28 = vrot.slane %v3017_v26, 5  ;;  %v3025_v45 = vshll.u32 %v7945_v27, 16  ;;  %v3031_v42 = vshll.u32 %v10805_v37, 16  ;;  %v7969_v18 = vld [vmem:[%s9939_s17 + $0x18] sm:$0xe] }
  0xdd   : > { %v7957_v46 = vcombine.low %v2986_v57, %v2996_v32  ;;  %v3005_v1 = vrot.slane %v3004_v25, 4  ;;  %v3014_v15 = vor.u32 %v3013_v16, %v3009_v20  ;;  %9002 = vmatpush3.bf16.msra.mxu1 %v9525_v52  ;;  %v3035_v5 = vshrl.u32 %v10805_v37, 16  ;;  %v10823_v52 = vld [vmem:[%s9939_s17 + $0x8c] sm:$0x1]  ;;  %v7970_v16 = vld [vmem:[%s9939_s17 + $0x24] sm:$0xe] }
  0xde   : > { %8914 = vmatmul.mubr.bf16.gmra.mxu0 %v9515_v40  ;;  %9003 = vmatprep.subr.bf16.mxu1 %v9526_v21  ;;  %v3041_v29 = vshll.u32 %v10808_v38, 16  ;;  %v3024_v22 = vrot.slane %v3022_v51, 4  ;;  %v3027_v31 = vrot.slane %v3025_v45, 5  ;;  %v3033_v61 = vrot.slane %v3031_v42, 5 }
  0xdf   : > { %8949 = vmatprep.mubr.bf16.mxu1 %v7957_v46  ;;  %v3010_v54 = vsel %vm9983_vm2, %v3005_v1, %v3009_v20  ;;  %v3015_v13 = vrot.slane %v3014_v15, 4  ;;  %8917 = vmatprep.mubr.bf16.mxu0 %v9518_v17  ;;  %v3037_v62 = vrot.slane %v3035_v5, 4  ;;  %v3046_v2 = vshrl.u32 %v7948_v23, 16 }
  0xe0   : > { %8970 = vmatpush3.bf16.msra.mxu0 %v9517_v11  ;;  %v3043_v40 = vrot.slane %v3041_v29, 5  ;;  %v3049_v4 = vshll.u32 %v7948_v23, 16  ;;  %v3028_v7 = vor.u32 %v3027_v31, %v3024_v22  ;;  %v3055_v11 = vshll.u32 %v10820_v55, 16 }
  0xe1   : > { %v3020_v24 = vsel %vm9983_vm2, %v3015_v13, %v3019_v28  ;;  %8971 = vmatprep.subr.bf16.mxu0 %v9521_v33  ;;  %9004 = vmatpush3.bf16.msra.mxu1 %v9526_v21  ;;  %v3038_v48 = vor.u32 %v3037_v62, %v3033_v61  ;;  %v3048_v9 = vrot.slane %v3046_v2, 4  ;;  %v3059_v17 = vshrl.u32 %v10820_v55, 16 }
  0xe2   : > { %v7958_v6 = vcombine.low %v3010_v54, %v3020_v24  ;;  %9005 = vmatprep.subr.bf16.mxu1 %v9527_v44  ;;  %v3051_v12 = vrot.slane %v3049_v4, 5  ;;  %v3065_v0 = vshll.u32 %v10823_v52, 16  ;;  %v3029_v19 = vrot.slane %v3028_v7, 4  ;;  %v7973_v24 = vld [vmem:[%s9939_s17 + $0x48] sm:$0xe] }
  0xe3   : > { %v3039_v20 = vrot.slane %v3038_v48, 4  ;;  %v3057_v21 = vrot.slane %v3055_v11, 5  ;;  %v7979_v25 = vrot.slane %v7969_v18, 9  ;;  %v3061_v57 = vrot.slane %v3059_v17, 4  ;;  %v7975_v17 = vld [vmem:[%s9939_s17 + $0x60] sm:$0xe] }
  0xe4   : > { %8950 = vmatmul.mubr.bf16.gmra.mxu1 %v7958_v6  ;;  %8972 = vmatpush3.bf16.msra.mxu0 %v9521_v33  ;;  %v3052_v26 = vor.u32 %v3051_v12, %v3048_v9  ;;  %v3067_v32 = vrot.slane %v3065_v0, 5  ;;  %v3348_v27 = vrot.slane %v10637_v50, 5  ;;  %v3034_v46 = vsel %vm9983_vm2, %v3029_v19, %v3033_v61  ;;  %v7971_v33 = vld [vmem:[%s9939_s17 + $0x30] sm:$0xe]  ;;  %v7972_v50 = vld [vmem:[%s9939_s17 + $0x3c] sm:$0xe] }
  0xe5   : > { %9006 = vmatpush3.bf16.msra.mxu1 %v9527_v44  ;;  %v3044_v1 = vsel %vm9983_vm2, %v3039_v20, %v3043_v40  ;;  %v3351_v15 = vrot.slane %v10640_v43, 5  ;;  %v7980_v28 = vrot.slane %v7970_v16, 9  ;;  %v3062_v42 = vor.u32 %v3061_v57, %v3057_v21 }
  0xe6   : > { %8918 = vmatmul.mubr.bf16.gmra.mxu0 %v9519_v10  ;;  %9007 = vmatprep.subr.bf16.mxu1 %v9528_v8  ;;  %v7959_v51 = vcombine.low %v3034_v46, %v3044_v1  ;;  %v3053_v45 = vrot.slane %v3052_v26, 4  ;;  %v3349_v5 = vsel %vm10210_vm5, %v7979_v25, %v3348_v27  ;;  %v3350_v44 = vrot.slane %v3348_v27, 4  ;;  %v8008_v1 = vld [vmem:[%s9939_s17 + $0x18] sm:$0xf] }
  0xe7   : > { %v3355_v23 = vrot.slane %v10645_v34, 5  ;;  %v3358_v54 = vrot.slane %v10662_v35, 5  ;;  %v7981_v13 = vrot.slane %v7971_v33, 9  ;;  %v3063_v29 = vrot.slane %v3062_v42, 4  ;;  %v8009_v33 = vld [vmem:[%s9939_s17 + $0x1c] sm:$0xf] }
  0xe8   : > { %8953 = vmatprep.mubr.bf16.mxu1 %v7959_v51  ;;  %v3058_v43 = vsel %vm9983_vm2, %v3053_v45, %v3057_v21  ;;  %v3362_v22 = vrot.slane %v10668_v47, 5  ;;  %v3365_v31 = vrot.slane %v10672_v53, 5  ;;  %v3352_v61 = vsel %vm10210_vm5, %v3350_v44, %v3351_v15  ;;  %v7974_v53 = vld [vmem:[%s9939_s17 + $0x54] sm:$0xe] }
  0xe9   : > { %9008 = vmatpush3.bf16.msra.mxu1 %v9528_v8  ;;  %v3356_v34 = vsel %vm10210_vm5, %v7980_v28, %v3355_v23  ;;  %v3357_v62 = vrot.slane %v3355_v23, 4  ;;  %v7982_v35 = vrot.slane %v7972_v50, 9  ;;  %v3068_v10 = vsel %vm9983_vm2, %v3063_v29, %v3067_v32  ;;  %v8010_v50 = vld [vmem:[%s9939_s17 + $0x20] sm:$0x1] }
  0xea   : > { %v7989_v40 = vcombine.low %v3349_v5, %v3352_v61  ;;  %v3363_v47 = vsel %vm10210_vm5, %v7981_v13, %v3362_v22  ;;  %v3364_v2 = vrot.slane %v3362_v22, 4  ;;  %v7960_v4 = vcombine.low %v3058_v43, %v3068_v10 }
  0xeb   : > { %v3359_v6 = vsel %vm10210_vm5, %v3357_v62, %v3358_v54  ;;  %v3369_v7 = vrot.slane %v10684_v63, 5  ;;  %v3372_v48 = vrot.slane %v10688_v3, 5  ;;  %v7983_v9 = vrot.slane %v7973_v24, 9 }
  0xec   : > { %8973 = vmatprep.mubr.bf16.mxu0 %v7989_v40  ;;  %v7990_v11 = vcombine.low %v3356_v34, %v3359_v6  ;;  %v3366_v8 = vsel %vm10210_vm5, %v3364_v2, %v3365_v31  ;;  %v3376_v12 = vrot.slane %v10708_v30, 5  ;;  %8954 = vmatmul.mubr.bf16.gmra.mxu1 %v7960_v4  ;;  %v3379_v63 = vrot.slane %v10713_v59, 5  ;;  %v7976_v59 = vld [vmem:[%s9939_s17 + $0x6c] sm:$0xe]  ;;  %v7977_v2 = vld [vmem:[%s9939_s17 + $0x78] sm:$0xe] }
  0xed   : > { %v7991_v0 = vcombine.low %v3363_v47, %v3366_v8  ;;  %v3370_v18 = vsel %vm10210_vm5, %v7982_v35, %v3369_v7  ;;  %v3371_v19 = vrot.slane %v3369_v7, 4  ;;  %v7984_v21 = vrot.slane %v7974_v53, 9  ;;  %v8013_v35 = vld [vmem:[%s9939_s17 + $0x2c] sm:$0x1] }
  0xee   : > { %8974 = vmatmul.mubr.bf16.vlgmr.msra.gmra.mxu0 %v7990_v11  ;;  %v3377_v3 = vsel %vm10210_vm5, %v7983_v9, %v3376_v12  ;;  %v3378_v20 = vrot.slane %v3376_v12, 4  ;;  %v3383_v25 = vrot.slane %v10723_v41, 5  ;;  %v3386_v16 = vrot.slane %v10733_v56, 5 }
  0xef   : > { %8977 = vmatprep.mubr.bf16.mxu0 %v7991_v0  ;;  %v3373_v30 = vsel %vm10210_vm5, %v3371_v19, %v3372_v48  ;;  %v7985_v26 = vrot.slane %v7975_v17, 9  ;;  %v3390_v57 = vrot.slane %v10758_v36, 5  ;;  %v3393_v36 = vrot.slane %v10761_v58, 5  ;;  %v8011_v58 = vld [vmem:[%s9939_s17 + $0x24] sm:$0xf] }
  0xf0   : > { %v7992_v32 = vcombine.low %v3370_v18, %v3373_v30  ;;  %v3380_v27 = vsel %vm10210_vm5, %v3378_v20, %v3379_v63  ;;  %v10885_v46 = vsel %vm10210_vm5, %v7984_v21, %v3383_v25  ;;  %v3385_v41 = vrot.slane %v3383_v25, 4  ;;  %v7978_v21 = vld [vmem:[%s9939_s17 + $0x84] sm:$0xe] }
  0xf1   : > { %v7993_v15 = vcombine.low %v3377_v3, %v3380_v27  ;;  %v10890_v56 = vsel %vm10210_vm5, %v7985_v26, %v3390_v57  ;;  %v3392_v28 = vrot.slane %v3390_v57, 4  ;;  %v7986_v45 = vrot.slane %v7976_v59, 9 }
  0xf2   : > { %v3387_v51 = vsel %vm10210_vm5, %v3385_v41, %v3386_v16  ;;  %v3397_v42 = vrot.slane %v10776_v60, 5  ;;  %v3400_v5 = vrot.slane %v10781_v49, 5  ;;  %v3765_v54 = vshrl.u32 %v8008_v1, 16  ;;  %v8012_v49 = vld [vmem:[%s9939_s17 + $0x28] sm:$0xf] }
  0xf3   : > { %v7994_v44 = vcombine.low %v10885_v46, %v3387_v51  ;;  %v3394_v23 = vsel %vm10210_vm5, %v3392_v28, %v3393_v36  ;;  %v3768_v13 = vshll.u32 %v8008_v1, 16  ;;  %v3774_v22 = vshll.u32 %v8009_v33, 16  ;;  %v8014_v46 = vld [vmem:[%s9939_s17 + $0x30] sm:$0xf]  ;;  %v8016_v51 = vld [vmem:[%s9939_s17 + $0x38] sm:$0x1] }
  0xf4   : > { %v7995_v43 = vcombine.low %v10890_v56, %v3394_v23  ;;  %v10906_v29 = vsel %vm10210_vm5, %v7986_v45, %v3397_v42  ;;  %v3399_v60 = vrot.slane %v3397_v42, 4  ;;  %v3767_v31 = vrot.slane %v3765_v54, 4  ;;  %v8015_v56 = vld [vmem:[%s9939_s17 + $0x34] sm:$0xf] }
  0xf5   : > { %v3770_v61 = vrot.slane %v3768_v13, 5  ;;  %v3778_v34 = vshrl.u32 %v8009_v33, 16  ;;  %v3784_v62 = vshll.u32 %v8010_v50, 16  ;;  %v3776_v10 = vrot.slane %v3774_v22, 5  ;;  %v8018_v13 = vld [vmem:[%s9939_s17 + $0x40] sm:$0xf] }
  0xf6   : > { %8978 = vmatmul.mubr.bf16.gmra.mxu0 %v7992_v32  ;;  %v10912_v24 = vsel %vm10210_vm5, %v3399_v60, %v3400_v5  ;;  %v3789_v40 = vshrl.u32 %v8011_v58, 16  ;;  %v3792_v47 = vshll.u32 %v8011_v58, 16  ;;  %v3798_v8 = vshll.u32 %v8012_v49, 16  ;;  %v8017_v5 = vld [vmem:[%s9939_s17 + $0x3c] sm:$0xf] }
  0xf7   : > { %8981 = vmatprep.mubr.bf16.mxu0 %v7993_v15  ;;  %v7996_v53 = vcombine.low %v10906_v29, %v10912_v24  ;;  %v3771_v4 = vor.u32 %v3770_v61, %v3767_v31  ;;  %v3780_v6 = vrot.slane %v3778_v34, 4  ;;  %v3786_v7 = vrot.slane %v3784_v62, 5 }
  0xf8   : > { %v3791_v48 = vrot.slane %v3789_v40, 4  ;;  %v3794_v11 = vrot.slane %v3792_v47, 5  ;;  %v3802_v9 = vshrl.u32 %v8012_v49, 16  ;;  %v3808_v0 = vshll.u32 %v8013_v35, 16  ;;  %v8019_v49 = vld [vmem:[%s9939_s17 + $0x44] sm:$0x1] }
  0xf9   : > { %v3772_v12 = vrot.slane %v3771_v4, 4  ;;  %v3781_v17 = vor.u32 %v3780_v6, %v3776_v10  ;;  %v7987_v18 = vrot.slane %v7977_v2, 9  ;;  %v3800_v63 = vrot.slane %v3798_v8, 5  ;;  %v8020_v35 = vld [vmem:[%s9939_s17 + $0x48] sm:$0xf] }
  0xfa   : > { %v3795_v19 = vor.u32 %v3794_v11, %v3791_v48  ;;  %v3804_v3 = vrot.slane %v3802_v9, 4  ;;  %v3404_v20 = vrot.slane %v10805_v37, 5  ;;  %v3810_v16 = vrot.slane %v3808_v0, 5 }
  0xfb   : > { %v3777_v25 = vsel %vm9983_vm2, %v3772_v12, %v3776_v10  ;;  %v3782_v30 = vrot.slane %v3781_v17, 4  ;;  %v3407_v26 = vrot.slane %v10808_v38, 5  ;;  %v7988_v37 = vrot.slane %v7978_v21, 9  ;;  %v8021_v21 = vld [vmem:[%s9939_s17 + $0x4c] sm:$0xf] }
  0xfc   : > { %v3796_v57 = vrot.slane %v3795_v19, 4  ;;  %v3805_v59 = vor.u32 %v3804_v3, %v3800_v63  ;;  %v3405_v32 = vsel %vm10210_vm5, %v7987_v18, %v3404_v20  ;;  %v3406_v27 = vrot.slane %v3404_v20, 4 }
  0xfd   : > { %v3787_v41 = vsel %vm9983_vm2, %v3782_v30, %v3786_v7  ;;  %v3411_v1 = vrot.slane %v10820_v55, 5  ;;  %v3414_v15 = vrot.slane %v10823_v52, 5  ;;  %v3813_v42 = vshrl.u32 %v8014_v46, 16 }
  0xfe   : > { %8982 = vmatmul.mubr.bf16.gmra.mxu0 %v7994_v44  ;;  %v8033_v38 = vcombine.low %v3777_v25, %v3787_v41  ;;  %v3801_v28 = vsel %vm9983_vm2, %v3796_v57, %v3800_v63  ;;  %v3806_v36 = vrot.slane %v3805_v59, 4  ;;  %v3408_v33 = vsel %vm10210_vm5, %v3406_v27, %v3407_v26  ;;  %v8022_v26 = vld [vmem:[%s9939_s17 + $0x50] sm:$0x1] }
  0xff   : > { %8985 = vmatprep.mubr.bf16.mxu0 %v7995_v43  ;;  %v7997_v45 = vcombine.low %v3405_v32, %v3408_v33  ;;  %v10937_v55 = vsel %vm10210_vm5, %v7988_v37, %v3411_v1  ;;  %v3413_v52 = vrot.slane %v3411_v1, 4  ;;  %v3816_v44 = vshll.u32 %v8014_v46, 16  ;;  %v8023_v46 = vld [vmem:[%s9939_s17 + $0x54] sm:$0xf] }
 0x100   : > { %9009 = vmatprep.mubr.bf16.mxu1 %v8033_v38  ;;  %v3811_v50 = vsel %vm9983_vm2, %v3806_v36, %v3810_v16  ;;  %v3822_v23 = vshll.u32 %v8015_v56, 16  ;;  %v3826_v54 = vshrl.u32 %v8015_v56, 16  ;;  %v3815_v60 = vrot.slane %v3813_v42, 4 }
 0x101   : > { %v8034_v58 = vcombine.low %v3801_v28, %v3811_v50  ;;  %v10945_v43 = vsel %vm10210_vm5, %v3413_v52, %v3414_v15  ;;  %v3832_v22 = vshll.u32 %v8016_v51, 16  ;;  %v3818_v61 = vrot.slane %v3816_v44, 5  ;;  %v8024_v50 = vld [vmem:[%s9939_s17 + $0x58] sm:$0xf] }
 0x102   : > { %v7998_v31 = vcombine.low %v10937_v55, %v10945_v43  ;;  %v3824_v34 = vrot.slane %v3822_v23, 5  ;;  %v3828_v62 = vrot.slane %v3826_v54, 4  ;;  %v3837_v40 = vshrl.u32 %v8017_v5, 16 }
 0x103   : > { %9010 = vmatmul.mubr.bf16.vlgmr.msra.gmra.mxu1 %v8034_v58  ;;  %v3834_v10 = vrot.slane %v3832_v22, 5  ;;  %v3840_v47 = vshll.u32 %v8017_v5, 16  ;;  %v3846_v2 = vshll.u32 %v8018_v13, 16  ;;  %v3819_v6 = vor.u32 %v3818_v61, %v3815_v60  ;;  %v8025_v22 = vld [vmem:[%s9939_s17 + $0x5c] sm:$0x1] }
 0x104   : > { %v3829_v7 = vor.u32 %v3828_v62, %v3824_v34  ;;  %v3850_v48 = vshrl.u32 %v8018_v13, 16  ;;  %v3856_v11 = vshll.u32 %v8019_v49, 16  ;;  %v3839_v9 = vrot.slane %v3837_v40, 4  ;;  %v8026_v49 = vld [vmem:[%s9939_s17 + $0x60] sm:$0xf] }
 0x105   : > { %v3842_v12 = vrot.slane %v3840_v47, 5  ;;  %v3848_v17 = vrot.slane %v3846_v2, 5  ;;  %v3861_v0 = vshrl.u32 %v8020_v35, 16  ;;  %v3820_v63 = vrot.slane %v3819_v6, 4 }
 0x106   : > { %8986 = vmatmul.mubr.bf16.gmra.mxu0 %v7996_v53  ;;  %v3830_v3 = vrot.slane %v3829_v7, 4  ;;  %v3852_v20 = vrot.slane %v3850_v48, 4  ;;  %v3858_v16 = vrot.slane %v3856_v11, 5  ;;  %v3864_v59 = vshll.u32 %v8020_v35, 16 }
 0x107   : > { %8989 = vmatprep.mubr.bf16.mxu0 %v7997_v45  ;;  %v3843_v30 = vor.u32 %v3842_v12, %v3839_v9  ;;  %v3863_v57 = vrot.slane %v3861_v0, 4  ;;  %v3825_v29 = vsel %vm9983_vm2, %v3820_v63, %v3824_v34  ;;  %v3870_v56 = vshll.u32 %v8021_v21, 16  ;;  %v8027_v9 = vld [vmem:[%s9939_s17 + $0x64] sm:$0xf] }
 0x108   : > { %v3835_v24 = vsel %vm9983_vm2, %v3830_v3, %v3834_v10  ;;  %v3853_v27 = vor.u32 %v3852_v20, %v3848_v17  ;;  %v3866_v15 = vrot.slane %v3864_v59, 5  ;;  %v3874_v33 = vshrl.u32 %v8021_v21, 16  ;;  %v8028_v20 = vld [vmem:[%s9939_s17 + $0x68] sm:$0x1] }
 0x109   : > { %v8035_v41 = vcombine.low %v3825_v29, %v3835_v24  ;;  %v3844_v1 = vrot.slane %v3843_v30, 4  ;;  %v3880_v51 = vshll.u32 %v8022_v26, 16  ;;  %v3872_v5 = vrot.slane %v3870_v56, 5  ;;  %v8029_v29 = vld [vmem:[%s9939_s17 + $0x6c] sm:$0xf] }
 0x10a   : > { %v3854_v28 = vrot.slane %v3853_v27, 4  ;;  %v3867_v42 = vor.u32 %v3866_v15, %v3863_v57  ;;  %v3885_v44 = vshrl.u32 %v8023_v46, 16  ;;  %v3876_v58 = vrot.slane %v3874_v33, 4 }
 0x10b   : > { %9013 = vmatprep.mubr.bf16.mxu1 %v8035_v41  ;;  %v3849_v45 = vsel %vm9983_vm2, %v3844_v1, %v3848_v17  ;;  %v3882_v60 = vrot.slane %v3880_v51, 5  ;;  %v3888_v10 = vshll.u32 %v8023_v46, 16  ;;  %v3898_v6 = vshrl.u32 %v8024_v50, 16 }
 0x10c   : > { %v3859_v23 = vsel %vm9983_vm2, %v3854_v28, %v3858_v16  ;;  %v3868_v62 = vrot.slane %v3867_v42, 4  ;;  %v3887_v35 = vrot.slane %v3885_v44, 4  ;;  %v3877_v2 = vor.u32 %v3876_v58, %v3872_v5 }
 0x10d   : > { %v8687_v4 = vpop.f32.mrf.mxu0  ;;  %v8036_v61 = vcombine.low %v3849_v45, %v3859_v23  ;;  %v3890_v11 = vrot.slane %v3888_v10, 5  ;;  %v3909_v12 = vshrl.u32 %v8026_v49, 16  ;;  %v3900_v0 = vrot.slane %v3898_v6, 4 }
 0x10e   : > { %v8723_v8 = vpop.f32.mrf.mxu1  ;;  %8990 = vmatmul.mubr.bf16.gmra.mxu0 %v7998_v31  ;;  %v3873_v48 = vsel %vm9983_vm2, %v3868_v62, %v3872_v5  ;;  %v3878_v55 = vrot.slane %v3877_v2, 4  ;;  %v3918_v59 = vshll.u32 %v8027_v9, 16  ;;  %v3922_v41 = vshrl.u32 %v8027_v9, 16 }
 0x10f   : > { %v10954_v18 = vadd.f32 %v8723_v8, %v8687_v4  ;;  %v749_v19 = vpop.f32.mrf.mxu0  ;;  %v3894_v4 = vshll.u32 %v8024_v50, 16  ;;  %9014 = vmatmul.mubr.bf16.gmra.mxu1 %v8036_v61  ;;  %v3904_v8 = vshll.u32 %v8025_v22, 16  ;;  %v3891_v63 = vor.u32 %v3890_v11, %v3887_v35 }
 0x110   : > { %v970_v25 = vpop.f32.mrf.mxu1  ;;  %v3911_v21 = vrot.slane %v3909_v12, 4  ;;  %v3883_v30 = vsel %vm9983_vm2, %v3878_v55, %v3882_v60  ;;  %v3920_v56 = vrot.slane %v3918_v59, 5  ;;  %v3928_v28 = vshll.u32 %v8028_v20, 16 }
 0x111   : > { %v10958_v32 = vadd.f32 %v970_v25, %v749_v19  ;;  %v8688_v53 = vpop.f32.mrf.mxu0  ;;  %v3896_v31 = vrot.slane %v3894_v4, 5  ;;  %v3906_v3 = vrot.slane %v3904_v8, 5  ;;  %v3912_v25 = vshll.u32 %v8026_v49, 16 }
 0x112   : > { %v8724_v37 = vpop.f32.mrf.mxu1  ;;  %v8037_v24 = vcombine.low %v3873_v48, %v3883_v30  ;;  %v3924_v45 = vrot.slane %v3922_v41, 4  ;;  %v3933_v42 = vshrl.u32 %v8029_v29, 16  ;;  %v3930_v23 = vrot.slane %v3928_v28, 5 }
 0x113   : > { %v10965_v38 = vadd.f32 %v8724_v37, %v8688_v53  ;;  %v752_v36 = vpop.f32.mrf.mxu0  ;;  %v3901_v26 = vor.u32 %v3900_v0, %v3896_v31  ;;  %v3892_v53 = vrot.slane %v3891_v63, 4  ;;  %v3914_v46 = vrot.slane %v3912_v25, 5 }
 0x114   : > { %v973_v52 = vpop.f32.mrf.mxu1  ;;  %9017 = vmatprep.mubr.bf16.mxu1 %v8037_v24  ;;  %v3936_v58 = vshll.u32 %v8029_v29, 16  ;;  %v3925_v61 = vor.u32 %v3924_v45, %v3920_v56 }
 0x115   : > { %v10972_v54 = vadd.f32 %v973_v52, %v752_v36  ;;  %v8691_v13 = vpop.f32.mrf.mxu0  ;;  %v3902_v37 = vrot.slane %v3901_v26, 4  ;;  %v3897_v36 = vsel %vm9983_vm2, %v3892_v53, %v3896_v31  ;;  %v3915_v51 = vor.u32 %v3914_v46, %v3911_v21  ;;  %v8030_v52 = vld [vmem:[%s9939_s17 + $0x70] sm:$0xf] }
 0x116   : > { %v8727_v34 = vpop.f32.mrf.mxu1  ;;  %v3938_v10 = vrot.slane %v3936_v58, 5  ;;  %v3946_v2 = vshrl.u32 %v8030_v52, 16  ;;  %v3926_v6 = vrot.slane %v3925_v61, 4 }
 0x117   : > { %v10979_v40 = vadd.f32 %v8727_v34, %v8691_v13  ;;  %v765_v47 = vpop.f32.mrf.mxu0  ;;  %v3907_v5 = vsel %vm9983_vm2, %v3902_v37, %v3906_v3  ;;  %v8031_v13 = vld [vmem:[%s9939_s17 + $0x74] sm:$0x1]  ;;  %v3916_v49 = vrot.slane %v3915_v51, 4  ;;  %v3935_v34 = vrot.slane %v3933_v42, 4 }
 0x118   : > { %v986_v7 = vpop.f32.mrf.mxu1  ;;  %v8038_v60 = vcombine.low %v3897_v36, %v3907_v5  ;;  %v3952_v48 = vshll.u32 %v8031_v13, 16  ;;  %v3948_v12 = vrot.slane %v3946_v2, 4 }
 0x119   : > { %v10984_v17 = vadd.f32 %v986_v7, %v765_v47  ;;  %v8692_v43 = vpop.f32.mrf.mxu0  ;;  %v3942_v47 = vshll.u32 %v8030_v52, 16  ;;  %v3921_v4 = vsel %vm9983_vm2, %v3916_v49, %v3920_v56  ;;  %v3939_v8 = vor.u32 %v3938_v10, %v3935_v34 }
 0x11a   : > { %v8728_v19 = vpop.f32.mrf.mxu1  ;;  %9018 = vmatmul.mubr.bf16.gmra.mxu1 %v8038_v60  ;;  %v3954_v31 = vrot.slane %v3952_v48, 5 }
 0x11b   : > { %v10989_v16 = vadd.f32 %v8728_v19, %v8692_v43  ;;  %v768_v57 = vpop.f32.mrf.mxu0  ;;  %v3944_v9 = vrot.slane %v3942_v47, 5  ;;  %v3931_v43 = vsel %vm9983_vm2, %v3926_v6, %v3930_v23  ;;  %v3940_v63 = vrot.slane %v3939_v8, 4 }
 0x11c   : > { %v989_v27 = vpop.f32.mrf.mxu1  ;;  %v8039_v19 = vcombine.low %v3921_v4, %v3931_v43 }
 0x11d   : > { %v10992_v1 = vadd.f32 %v989_v27, %v768_v57  ;;  %v8695_v15 = vpop.f32.mrf.mxu0  ;;  %v3949_v3 = vor.u32 %v3948_v12, %v3944_v9  ;;  %v3945_v25 = vsel %vm9983_vm2, %v3940_v63, %v3944_v9 }
 0x11e   : > { %v8731_v33 = vpop.f32.mrf.mxu1  ;;  %9021 = vmatprep.mubr.bf16.mxu1 %v8039_v19 }
 0x11f   : > { %v10999_v50 = vadd.f32 %v8731_v33, %v8695_v15  ;;  %v781_v44 = vpop.f32.mrf.mxu0  ;;  %v3950_v30 = vrot.slane %v3949_v3, 4 }
 0x120   : > { %v1002_v22 = vpop.f32.mrf.mxu1 }
 0x121   : > { %v11002_v62 = vadd.f32 %v1002_v22, %v781_v44  ;;  %v8696_v35 = vpop.f32.mrf.mxu0  ;;  %v3955_v29 = vsel %vm9983_vm2, %v3950_v30, %v3954_v31 }
 0x122   : > { %v8732_v7 = vpop.f32.mrf.mxu1  ;;  %v8040_v53 = vcombine.low %v3945_v25, %v3955_v29 }
 0x123   : > { %v11006_v11 = vadd.f32 %v8732_v7, %v8696_v35  ;;  %v784_v55 = vpop.f32.mrf.mxu0 }
 0x124   : > { %v1005_v0 = vpop.f32.mrf.mxu1  ;;  %9022 = vmatmul.mubr.bf16.gmra.mxu1 %v8040_v53 }
 0x125   : > { %v11010_v20 = vadd.f32 %v1005_v0, %v784_v55  ;;  %v8699_v26 = vpop.f32.mrf.mxu0 }
 0x126   : > { %v8735_v21 = vpop.f32.mrf.mxu1 }
 0x127   : > { %v11014_v57 = vadd.f32 %v8735_v21, %v8699_v26  ;;  %v797_v24 = vpop.f32.mrf.mxu0 }
 0x128   : > { %v1018_v59 = vpop.f32.mrf.mxu1 }
 0x129   : > { %v11018_v27 = vadd.f32 %v1018_v59, %v797_v24  ;;  %v8700_v41 = vpop.f32.mrf.mxu0 }
 0x12a   : > { %v8736_v46 = vpop.f32.mrf.mxu1 }
 0x12b   : > { %v11020_v37 = vadd.f32 %v8736_v46, %v8700_v41  ;;  %v800_v56 = vpop.f32.mrf.mxu0 }
 0x12c   : > { %v1021_v15 = vpop.f32.mrf.mxu1 }
 0x12d   : > { %v11022_v28 = vadd.f32 %v1021_v15, %v800_v56  ;;  %v8703_v51 = vpop.f32.mrf.mxu0 }
 0x12e   : > { %v8739_v36 = vpop.f32.mrf.mxu1 }
 0x12f   : > { %v11024_v45 = vadd.f32 %v8739_v36, %v8703_v51  ;;  %v813_v42 = vpop.f32.mrf.mxu0 }
 0x130   : > { %v1034_v33 = vpop.f32.mrf.mxu1 }
 0x131   : > { %v11026_v5 = vadd.f32 %v1034_v33, %v813_v42  ;;  %v8704_v23 = vpop.f32.mrf.mxu0 }
 0x132   : > { %v8740_v52 = vpop.f32.mrf.mxu1 }
 0x133   : > { %v11028_v13 = vadd.f32 %v8740_v52, %v8704_v23  ;;  %v816_v60 = vpop.f32.mrf.mxu0 }
 0x134   : > { %v1037_v44 = vpop.f32.mrf.mxu1 }
 0x135   : > { %v11030_v22 = vadd.f32 %v1037_v44, %v816_v60  ;;  %v8759_v61 = vpop.f32.mrf.mxu0 }
 0x136   : > { %v8795_v58 = vpop.f32.mrf.mxu1  ;;  %v1371_v34 = vadd.f32 %v8759_v61, %v10954_v18 }
 0x137   : > { %v1290_v10 = vpop.f32.mrf.mxu0 }
 0x138   : > { %v1568_v49 = vpop.f32.mrf.mxu1  ;;  %v1369_v47 = vadd.f32 %v1290_v10, %v10958_v32  ;;  %v11034_v2 = vadd.f32 %v8795_v58, %v1371_v34 }
 0x139   : > { %v8760_v6 = vpop.f32.mrf.mxu0 }
 0x13a   : > { %v8796_v35 = vpop.f32.mrf.mxu1  ;;  %v1372_v7 = vadd.f32 %v8760_v6, %v10965_v38  ;;  %v11037_v48 = vadd.f32 %v1568_v49, %v1369_v47 }
 0x13b   : > { %v1293_v9 = vpop.f32.mrf.mxu0 }
 0x13c   : > { %v1571_v4 = vpop.f32.mrf.mxu1  ;;  %v1370_v12 = vadd.f32 %v1293_v9, %v10972_v54  ;;  %v11040_v55 = vadd.f32 %v8796_v35, %v1372_v7 }
 0x13d   : > { %v8763_v18 = vpop.f32.mrf.mxu0 }
 0x13e   : > { %v8799_v8 = vpop.f32.mrf.mxu1  ;;  %v1375_v31 = vadd.f32 %v8763_v18, %v10979_v40  ;;  %v11043_v0 = vadd.f32 %v1571_v4, %v1370_v12 }
 0x13f   : > { %v1306_v19 = vpop.f32.mrf.mxu0 }
 0x140   : > { %v1584_v43 = vpop.f32.mrf.mxu1  ;;  %v1373_v63 = vadd.f32 %v1306_v19, %v10984_v17  ;;  %v11046_v3 = vadd.f32 %v8799_v8, %v1375_v31 }
 0x141   : > { %v8764_v21 = vpop.f32.mrf.mxu0 }
 0x142   : > { %v8800_v32 = vpop.f32.mrf.mxu1  ;;  %v1376_v25 = vadd.f32 %v8764_v21, %v10989_v16  ;;  %v11049_v30 = vadd.f32 %v1584_v43, %v1373_v63 }
 0x143   : > { %v1309_v26 = vpop.f32.mrf.mxu0 }
 0x144   : > { %v1587_v38 = vpop.f32.mrf.mxu1  ;;  %v1374_v59 = vadd.f32 %v1309_v26, %v10992_v1  ;;  %v11052_v29 = vadd.f32 %v8800_v32, %v1376_v25 }
 0x145   : > { %v8767_v24 = vpop.f32.mrf.mxu0 }
 0x146   : > { %v8803_v54 = vpop.f32.mrf.mxu1  ;;  %v1379_v53 = vadd.f32 %v8767_v24, %v10999_v50  ;;  %v11055_v46 = vadd.f32 %v1587_v38, %v1374_v59 }
 0x147   : > { %v1322_v41 = vpop.f32.mrf.mxu0 }
 0x148   : > { %v1600_v40 = vpop.f32.mrf.mxu1  ;;  %v1377_v15 = vadd.f32 %v1322_v41, %v11002_v62  ;;  %v11058_v56 = vadd.f32 %v8803_v54, %v1379_v53 }
 0x149   : > { %v8768_v36 = vpop.f32.mrf.mxu0 }
 0x14a   : > { %v8804_v17 = vpop.f32.mrf.mxu1  ;;  %v1380_v33 = vadd.f32 %v8768_v36, %v11006_v11  ;;  %v11061_v51 = vadd.f32 %v1600_v40, %v1377_v15 }
 0x14b   : > { %v1325_v52 = vpop.f32.mrf.mxu0 }
 0x14c   : > { %v1603_v16 = vpop.f32.mrf.mxu1  ;;  %v1378_v42 = vadd.f32 %v1325_v52, %v11010_v20  ;;  %v11064_v44 = vadd.f32 %v8804_v17, %v1380_v33 }
 0x14d   : > { %v8771_v23 = vpop.f32.mrf.mxu0 }
 0x14e   : > { %v8807_v1 = vpop.f32.mrf.mxu1  ;;  %v1383_v58 = vadd.f32 %v8771_v23, %v11014_v57  ;;  %v11067_v60 = vadd.f32 %v1603_v16, %v1378_v42 }
 0x14f   : > { %v1338_v49 = vpop.f32.mrf.mxu0 }
 0x150   : > { %v1616_v50 = vpop.f32.mrf.mxu1  ;;  %v1381_v61 = vadd.f32 %v1338_v49, %v11018_v27  ;;  %v11070_v34 = vadd.f32 %v8807_v1, %v1383_v58 }
 0x151   : > { %v8772_v35 = vpop.f32.mrf.mxu0 }
 0x152   : > { %v8808_v62 = vpop.f32.mrf.mxu1  ;;  %v1384_v10 = vadd.f32 %v8772_v35, %v11020_v37  ;;  %v1659_v47 = vadd.f32 %v1616_v50, %v1381_v61 }
 0x153   : > { %v1341_v4 = vpop.f32.mrf.mxu0 }
 0x154   : > { %v1619_v11 = vpop.f32.mrf.mxu1  ;;  %v1382_v6 = vadd.f32 %v1341_v4, %v11022_v28  ;;  %v1662_v7 = vadd.f32 %v8808_v62, %v1384_v10 }
 0x155   : > { %v8775_v57 = vpop.f32.mrf.mxu0 }
 0x156   : > { %v8811_v20 = vpop.f32.mrf.mxu1  ;;  %v1387_v9 = vadd.f32 %v8775_v57, %v11024_v45  ;;  %v1660_v12 = vadd.f32 %v1619_v11, %v1382_v6 }
 0x157   : > { %v1354_v18 = vpop.f32.mrf.mxu0 }
 0x158   : > { %v1632_v8 = vpop.f32.mrf.mxu1  ;;  %v1385_v27 = vadd.f32 %v1354_v18, %v11026_v5  ;;  %v1665_v31 = vadd.f32 %v8811_v20, %v1387_v9 }
 0x159   : > { %v8776_v19 = vpop.f32.mrf.mxu0 }
 0x15a   : > { %v8812_v43 = vpop.f32.mrf.mxu1  ;;  %v1388_v37 = vadd.f32 %v8776_v19, %v11028_v13  ;;  %v1663_v63 = vadd.f32 %v1632_v8, %v1385_v27 }
 0x15b   : > { %v1357_v21 = vpop.f32.mrf.mxu0 }
 0x15c   : > { %v1635_v32 = vpop.f32.mrf.mxu1  ;;  %v1386_v28 = vadd.f32 %v1357_v21, %v11030_v22  ;;  %v1666_v25 = vadd.f32 %v8812_v43, %v1388_v37 }
 0x15d   : > { %v8831_v45 = vpop.f32.mrf.mxu0 }
 0x15e   : > { %v11077_v38 = vpop.f32.mrf.mxu1  ;;  %v1664_v26 = vadd.f32 %v1635_v32, %v1386_v28  ;;  %v11083_v59 = vadd.f32 %v8831_v45, %v11034_v2 }
 0x15f   : > { %v2075_v40 = vpop.f32.mrf.mxu0 }
 0x160   : > { %v11080_v54 = vpop.f32.mrf.mxu1  ;;  %v11088_v24 = vadd.f32 %v2075_v40, %v11037_v48 }
 0x161   : > { %v8832_v53 = vpop.f32.mrf.mxu0 }
 0x162   : > { %v11085_v5 = vpop.f32.mrf.mxu1  ;;  %v11093_v17 = vadd.f32 %v8832_v53, %v11040_v55 }
 0x163   : > { %v2078_v41 = vpop.f32.mrf.mxu0 }
 0x164   : > { %v11090_v13 = vpop.f32.mrf.mxu1  ;;  %v11098_v15 = vadd.f32 %v2078_v41, %v11043_v0 }
 0x165   : > { %v8835_v16 = vpop.f32.mrf.mxu0 }
 0x166   : > { %v11095_v22 = vpop.f32.mrf.mxu1  ;;  %v11103_v36 = vadd.f32 %v8835_v16, %v11046_v3 }
 0x167   : > { %v2091_v33 = vpop.f32.mrf.mxu0 }
 0x168   : > { %v11100_v2 = vpop.f32.mrf.mxu1  ;;  %v11108_v1 = vadd.f32 %v2091_v33, %v11049_v30 }
 0x169   : > { %v8836_v52 = vpop.f32.mrf.mxu0 }
 0x16a   : > { %v11105_v48 = vpop.f32.mrf.mxu1  ;;  %v11113_v42 = vadd.f32 %v8836_v52, %v11052_v29 }
 0x16b   : > { %v2094_v0 = vpop.f32.mrf.mxu0 }
 0x16c   : > { %v11110_v55 = vpop.f32.mrf.mxu1  ;;  %v11116_v50 = vadd.f32 %v2094_v0, %v11055_v46 }
 0x16d   : > { %v8839_v3 = vpop.f32.mrf.mxu0 }
 0x16e   : > { %v11118_v23 = vpop.f32.mrf.mxu1  ;;  %v11121_v58 = vadd.f32 %v8839_v3, %v11058_v56 }
 0x16f   : > { %v2107_v30 = vpop.f32.mrf.mxu0 }
 0x170   : > { %v11123_v62 = vpop.f32.mrf.mxu1  ;;  %v11126_v49 = vadd.f32 %v2107_v30, %v11061_v51 }
 0x171   : > { %v8840_v29 = vpop.f32.mrf.mxu0 }
 0x172   : > { %v11128_v61 = vpop.f32.mrf.mxu1  ;;  %v11131_v11 = vadd.f32 %v8840_v29, %v11064_v44 }
 0x173   : > { %v2110_v46 = vpop.f32.mrf.mxu0 }
 0x174   : > { %v11133_v35 = vpop.f32.mrf.mxu1  ;;  %v11136_v10 = vadd.f32 %v2110_v46, %v11067_v60 }
 0x175   : > { %v8843_v56 = vpop.f32.mrf.mxu0 }
 0x176   : > { %v11138_v20 = vpop.f32.mrf.mxu1  ;;  %v11141_v4 = vadd.f32 %v8843_v56, %v11070_v34 }
 0x177   : > { %v2123_v51 = vpop.f32.mrf.mxu0 }
 0x178   : > { %v11143_v6 = vpop.f32.mrf.mxu1  ;;  %v11145_v8 = vadd.f32 %v2123_v51, %v1659_v47 }
 0x179   : > { %v8844_v57 = vpop.f32.mrf.mxu0 }
 0x17a   : > { %v11147_v44 = vpop.f32.mrf.mxu1  ;;  %v11149_v9 = vadd.f32 %v8844_v57, %v1662_v7 }
 0x17b   : > { %v2126_v43 = vpop.f32.mrf.mxu0 }
 0x17c   : > { %v11151_v18 = vadd.f32 %v2126_v43, %v1660_v12  ;;  %v11153_v60 = vpop.f32.mrf.mxu1 }
 0x17e   : > { %v8847_v27 = vpop.f32.mrf.mxu0 }
 0x17f   : > { %v11155_v32 = vadd.f32 %v8847_v27, %v1665_v31 }
 0x180   : > { %v2139_v19 = vpop.f32.mrf.mxu0 }
 0x181   : > { %v11159_v37 = vadd.f32 %v2139_v19, %v1663_v63 }
 0x182   : > { %v11157_v34 = vpop.f32.mrf.mxu1  ;;  %v8848_v21 = vpop.f32.mrf.mxu0 }
 0x183   : > { %12268 = vst [vmem:[#allocation13_spill] sm:$0xff] %v11159_v37  ;;  %v11163_v28 = vadd.f32 %v8848_v21, %v1666_v25 }
 0x184   : > { %v11161_v47 = vpop.f32.mrf.mxu1  ;;  %v2142_v45 = vpop.f32.mrf.mxu0 }
 0x185   : > { %12269 = vst [vmem:[#allocation14_spill] sm:$0xff] %v11161_v47  ;;  %12270 = vst [vmem:[#allocation15_spill] sm:$0xff] %v11163_v28  ;;  %v11167_v12 = vadd.f32 %v2142_v45, %v1664_v26  ;;  %v2504_v47 = vadd.f32 %v11085_v5, %v11093_v17  ;;  %v2509_v5 = vadd.f32 %v11123_v62, %v11126_v49 }
 0x186   : > { %v11165_v7 = vpop.f32.mrf.mxu1  ;;  %v8903_v53 = vpop.f32.mrf.mxu0  ;;  %v2519_v62 = vadd.f32 %v11157_v34, %v11155_v32 }
 0x187   : > { %12271 = vst [vmem:[#allocation16_spill] sm:$0xff] %v11165_v7  ;;  %12272 = vst [vmem:[#allocation17_spill] sm:$0xff] %v11167_v12 }
 0x188   : > { %v11169_v40 = vpop.f32.mrf.mxu1  ;;  %v2700_v31 = vpop.f32.mrf.mxu0 }
 0x189   : > { %12273 = vst [vmem:[#allocation18_spill] sm:$0xff] %v11169_v40 }
 0x18a   : > { %v11171_v41 = vpop.f32.mrf.mxu1  ;;  %v8904_v16 = vpop.f32.mrf.mxu0  ;;  %v12281_v49 = vld [vmem:[#allocation13_spill] sm:$0xff] }
 0x18b   : > { %12274 = vst [vmem:[#allocation19_spill] sm:$0xff] %v11171_v41 }
 0x18c   : > { %v3207_v33 = vpop.f32.mrf.mxu1  ;;  %v2703_v63 = vpop.f32.mrf.mxu0 }
 0x18e   : > { %v8940_v52 = vpop.f32.mrf.mxu1  ;;  %v8907_v0 = vpop.f32.mrf.mxu0 }
 0x190   : > { %v3210_v3 = vpop.f32.mrf.mxu1  ;;  %v2716_v30 = vpop.f32.mrf.mxu0 }
 0x192   : > { %v8908_v25 = vpop.f32.mrf.mxu0 }
 0x193   : > { %v8943_v29 = vpop.f32.mrf.mxu1 }
 0x194   : > { %v2719_v46 = vpop.f32.mrf.mxu0 }
 0x195   : > { %v3223_v56 = vpop.f32.mrf.mxu1 }
 0x196   : > { %v8911_v51 = vpop.f32.mrf.mxu0 }
 0x197   : > { %v11173_v26 = vpop.f32.mrf.mxu1 }
 0x198   : > { %12275 = vst [vmem:[#allocation20_spill] sm:$0xff] %v11173_v26  ;;  %v2732_v57 = vpop.f32.mrf.mxu0  ;;  %v2503_v26 = vadd.f32 %v11077_v38, %v11083_v59  ;;  %v2508_v38 = vadd.f32 %v11105_v48, %v11113_v42  ;;  %v2511_v59 = vadd.f32 %v11118_v23, %v11121_v58  ;;  %v2782_v42 = vadd.f32 %v8904_v16, %v2504_v47 }
 0x199   : > { %v11175_v43 = vpop.f32.mrf.mxu1 }
 0x19a   : > { %12276 = vst [vmem:[#allocation21_spill] sm:$0xff] %v11175_v43  ;;  %v8912_v27 = vpop.f32.mrf.mxu0  ;;  %v2501_v43 = vadd.f32 %v11080_v54, %v11088_v24  ;;  %v2506_v54 = vadd.f32 %v11110_v55, %v11116_v50  ;;  %v2512_v24 = vadd.f32 %v11128_v61, %v11131_v11  ;;  %v2514_v55 = vadd.f32 %v11153_v60, %v11151_v18  ;;  %v12282_v61 = vld [vmem:[#allocation14_spill] sm:$0xff]  ;;  %v12285_v18 = vld [vmem:[#allocation17_spill] sm:$0xff] }
 0x19b   : > { %v2517_v11 = vadd.f32 %v12282_v61, %v12281_v49  ;;  %v12286_v60 = vld [vmem:[#allocation18_spill] sm:$0xff]  ;;  %v3289_v32 = vadd.f32 %v8940_v52, %v2782_v42 }
 0x19c   : > { %v8947_v19 = vpop.f32.mrf.mxu1  ;;  %v2735_v21 = vpop.f32.mrf.mxu0  ;;  %v2779_v48 = vadd.f32 %v2700_v31, %v2501_v43  ;;  %v2518_v47 = vadd.f32 %v12286_v60, %v12285_v18  ;;  %v12287_v31 = vld [vmem:[#allocation19_spill] sm:$0xff]  ;;  %v2790_v43 = vadd.f32 %v8912_v27, %v2512_v24 }
 0x19e   : > { %v11177_v45 = vpop.f32.mrf.mxu1  ;;  %v8915_v14 = vpop.f32.mrf.mxu0 }
 0x19f   : > { %12277 = vst [vmem:[#allocation22_spill] sm:$0xff] %v11177_v45  ;;  %v2502_v45 = vadd.f32 %v11090_v13, %v11098_v15  ;;  %v2510_v13 = vadd.f32 %v11133_v35, %v11136_v10  ;;  %v2515_v15 = vadd.f32 %v11138_v20, %v11141_v4  ;;  %v12283_v20 = vld [vmem:[#allocation15_spill] sm:$0xff]  ;;  %v12284_v4 = vld [vmem:[#allocation16_spill] sm:$0xff] }
 0x1a0   : > { %v11179_v39 = vpop.f32.mrf.mxu1  ;;  %v2748_v41 = vpop.f32.mrf.mxu0 }
 0x1a1   : > { %12278 = vst [vmem:[#allocation23_spill] sm:$0xff] %v11179_v39  ;;  %v2780_v50 = vadd.f32 %v2703_v63, %v2502_v45  ;;  %v3286_v63 = vadd.f32 %v3207_v33, %v2779_v48  ;;  %v2788_v45 = vadd.f32 %v2735_v21, %v2510_v13  ;;  %v12289_v33 = vld [vmem:[#allocation21_spill] sm:$0xff] }
 0x1a2   : > { %v11181_v40 = vpop.f32.mrf.mxu1  ;;  %v8916_v12 = vpop.f32.mrf.mxu0 }
 0x1a3   : > { %12279 = vst [vmem:[#allocation24_spill] sm:$0xff] %v11181_v40  ;;  %v2507_v40 = vadd.f32 %v11095_v22, %v11103_v36  ;;  %v2781_v36 = vadd.f32 %v8903_v53, %v2503_v26  ;;  %v2787_v26 = vadd.f32 %v2732_v57, %v2509_v5  ;;  %v3287_v34 = vadd.f32 %v3210_v3, %v2780_v50 }
 0x1a4   : > { %v11183_v7 = vpop.f32.mrf.mxu1  ;;  %v2751_v28 = vpop.f32.mrf.mxu0 }
 0x1a5   : > { %12280 = vst [vmem:[#allocation25_spill] sm:$0xff] %v11183_v7  ;;  %v2505_v7 = vadd.f32 %v11100_v2, %v11108_v1  ;;  %v2513_v2 = vadd.f32 %v11143_v6, %v11145_v8  ;;  %v2516_v1 = vadd.f32 %v11147_v44, %v11149_v9  ;;  %v2785_v35 = vadd.f32 %v8907_v0, %v2507_v40 }
 0x1a6   : > { %v11193_v39 = vpop.f32.mrf.mxu1  ;;  %v8919_v37 = vpop.f32.mrf.mxu0  ;;  %v2520_v6 = vadd.f32 %v12284_v4, %v12283_v20  ;;  %v2786_v8 = vadd.f32 %v8908_v25, %v2508_v38  ;;  %v2784_v44 = vadd.f32 %v2719_v46, %v2506_v54  ;;  %v2789_v9 = vadd.f32 %v8911_v51, %v2511_v59  ;;  %v11233_v46 = vld [vmem:[%s12239_s2] ss:$0 sm:$0xff] }
 0x1a7   : > { %v2783_v10 = vadd.f32 %v2716_v30, %v2505_v7  ;;  %v3288_v16 = vadd.f32 %v12287_v31, %v2781_v36  ;;  %v3292_v7 = vadd.f32 %v8943_v29, %v2785_v35  ;;  %v2793_v30 = vadd.f32 %v8915_v14, %v2515_v15  ;;  %v12288_v51 = vld [vmem:[#allocation20_spill] sm:$0xff]  ;;  %v12290_v29 = vld [vmem:[#allocation22_spill] sm:$0xff] }
 0x1a8   : > { %v11211_v17 = vpop.f32.mrf.mxu1  ;;  %v2764_v22 = vpop.f32.mrf.mxu0  ;;  %v2791_v49 = vadd.f32 %v2748_v41, %v2513_v2  ;;  %v11236_v38 = vadd.f32 %v12288_v51, %v2786_v8  ;;  %v11239_v57 = vadd.f32 %v12289_v33, %v2784_v44  ;;  %v11241_v52 = vadd.f32 %v8947_v19, %v2789_v9  ;;  %v12291_v59 = vld [vmem:[#allocation23_spill] sm:$0xff] }
 0x1a9   : > { %v3290_v0 = vadd.f32 %v3223_v56, %v2783_v10  ;;  %v11244_v56 = vadd.f32 %v12290_v29, %v2787_v26  ;;  %v2794_v14 = vadd.f32 %v8916_v12, %v2516_v1  ;;  %v2792_v41 = vadd.f32 %v2751_v28, %v2514_v55 }
 0x1aa   : > { %v3258_v23 = vpop.f32.mrf.mxu1  ;;  %v8920_v58 = vpop.f32.mrf.mxu0  ;;  %v2797_v21 = vadd.f32 %v8919_v37, %v2519_v62  ;;  %v11247_v5 = vadd.f32 %v12291_v59, %v2790_v43  ;;  %v12292_v24 = vld [vmem:[#allocation24_spill] sm:$0xff]  ;;  %v11257_v12 = vadd.f32 %v11193_v39, %v2791_v49  ;;  %v2795_v37 = vadd.f32 %v2764_v22, %v2517_v11 }
 0x1ab   : > { %v11250_v13 = vadd.f32 %v12292_v24, %v2788_v45  ;;  %v2798_v28 = vadd.f32 %v8920_v58, %v2520_v6  ;;  %v11261_v62 = vadd.f32 %v11211_v17, %v2794_v14  ;;  %v11263_v61 = vadd.f32 %v3258_v23, %v2792_v41  ;;  %v4422_v41 = vld [vmem:[#allocation2] sm:$0xf] }
 0x1ac   : > { %v2767_v53 = vpop.f32.mrf.mxu0  ;;  %v8955_v40 = vpop.f32.mrf.mxu1  ;;  %v12293_v36 = vld [vmem:[#allocation25_spill] sm:$0xff] }
 0x1ad   : > { %v11254_v48 = vadd.f32 %v12293_v36, %v2793_v30  ;;  %v11265_v35 = vadd.f32 %v8955_v40, %v2797_v21  ;;  %v2796_v10 = vadd.f32 %v2767_v53, %v2518_v47  ;;  %v4431_v40 = vld [vmem:[#allocation2 + $0xc] sm:$0xf] }
 0x1ae   : > { %v8975_v25 = vpop.f32.mrf.mxu0  ;;  %v3271_v3 = vpop.f32.mrf.mxu1 }
 0x1af   : > { %v3635_v27 = vadd.f32 %v8975_v25, %v3288_v16  ;;  %v11268_v4 = vadd.f32 %v3271_v3, %v2795_v37 }
 0x1b0   : > { %v3554_v54 = vpop.f32.mrf.mxu0  ;;  %v8956_v15 = vpop.f32.mrf.mxu1 }
 0x1b1   : > { %v3662_v19 = vadd.f32 %v11233_v46, %v3635_v27  ;;  %v3633_v2 = vadd.f32 %v3554_v54, %v3286_v63  ;;  %v11270_v6 = vadd.f32 %v8956_v15, %v2798_v28 }
 0x1b2   : > { %v8976_v1 = vpop.f32.mrf.mxu0  ;;  %v3274_v22 = vpop.f32.mrf.mxu1 }
 0x1b3   : > { %vm3682_vm8 = vcmp.ge.f32.partialorder %v3662_v19, 0.0  ;;  %v3702_v55 = vmul.f32 0.2, %v3662_v19  ;;  %v3660_v42 = vadd.f32 %v11233_v46, %v3633_v2  ;;  %v3636_v50 = vadd.f32 %v8976_v1, %v3289_v32 }
 0x1b4   : > { %v3557_v39 = vpop.f32.mrf.mxu0  ;;  %v11272_v53 = vadd.f32 %v3274_v22, %v2796_v10 }
 0x1b5   : > { %v3722_v58 = vsel %vm3682_vm8, %v3662_v19, %v3702_v55  ;;  %vm3680_vm12 = vcmp.ge.f32.partialorder %v3660_v42, 0.0  ;;  %v3700_v11 = vmul.f32 0.2, %v3660_v42  ;;  %v3663_v20 = vadd.f32 %v11233_v46, %v3636_v50  ;;  %v4435_v55 = vld [vmem:[#allocation2 + $0x14] sm:$0x1]  ;;  %vm11333_vm8 = vmand %vm4426_vm10, %vm4420_vm7 }
 0x1b6   : > { %v8265_v8 = vpack.c.bf16 %v3722_v58, %v3722_v58  ;;  %v3634_v17 = vadd.f32 %v3557_v39, %v3287_v34  ;;  %v8979_v44 = vpop.f32.mrf.mxu0 }
 0x1b7   : > { %v3720_v23 = vsel %vm3680_vm12, %v3660_v42, %v3700_v11  ;;  %vm3683_vm13 = vcmp.ge.f32.partialorder %v3663_v20, 0.0  ;;  %v3703_v9 = vmul.f32 0.2, %v3663_v20  ;;  %v3639_v18 = vadd.f32 %v8979_v44, %v3292_v7 }
 0x1b8   : > { %v4237_v60 = vshrl.u32 %v8265_v8, 16  ;;  %v8263_v47 = vpack.c.bf16 %v3720_v23, %v3720_v23  ;;  %v3661_v31 = vadd.f32 %v11233_v46, %v3634_v17  ;;  %v3570_v16 = vpop.f32.mrf.mxu0  ;;  %v4240_v63 = vshll.u32 %v8265_v8, 16 }
 0x1b9   : > { %v3723_v26 = vsel %vm3683_vm13, %v3663_v20, %v3703_v9  ;;  %v3666_v32 = vadd.f32 %v11233_v46, %v3639_v18  ;;  %v3637_v43 = vadd.f32 %v3570_v16, %v3290_v0 }
 0x1ba   : > { %v4239_v45 = vrot.slane %v4237_v60, 7  ;;  %v4220_v34 = vshrl.u32 %v8263_v47, 16  ;;  %v4223_v30 = vshll.u32 %v8263_v47, 16  ;;  %v8266_v49 = vpack.c.bf16 %v3723_v26, %v3723_v26  ;;  %v8980_v25 = vpop.f32.mrf.mxu0 }
 0x1bb   : > { %vm3681_vm15 = vcmp.ge.f32.partialorder %v3661_v31, 0.0  ;;  %v3701_v51 = vmul.f32 0.2, %v3661_v31  ;;  %vm3686_vm0 = vcmp.ge.f32.partialorder %v3666_v32, 0.0  ;;  %v3706_v33 = vmul.f32 0.2, %v3666_v32 }
 0x1bc   : > { %v4242_v3 = vor.u32 %v4240_v63, %v4239_v45  ;;  %v4243_v27 = vrot.slane %v4239_v45, 4  ;;  %v11282_v29 = vrot.slane %v4220_v34, 7  ;;  %v4245_v0 = vshrl.u32 %v8266_v49, 16  ;;  %v3573_v14 = vpop.f32.mrf.mxu0  ;;  %v4445_v45 = vld [vmem:[#allocation2 + $0x24] sm:$0xf] }
 0x1bd   : > { %v4248_v21 = vshll.u32 %v8266_v49, 16  ;;  %v3721_v54 = vsel %vm3681_vm15, %v3661_v31, %v3701_v51  ;;  %v3726_v59 = vsel %vm3686_vm0, %v3666_v32, %v3706_v33  ;;  %v3664_v24 = vadd.f32 %v11233_v46, %v3637_v43 }
 0x1be   : > { %v4432_v19 = vsel %vm11278_vm14, %v4242_v3, %v4431_v40  ;;  %v4225_v2 = vor.u32 %v4223_v30, %v11282_v29  ;;  %v4226_v36 = vrot.slane %v11282_v29, 4  ;;  %v4247_v37 = vrot.slane %v4245_v0, 7  ;;  %v8983_v28 = vpop.f32.mrf.mxu0 }
 0x1bf   : > { %4433 = vst [vmem:[#allocation2 + $0xc] sm:$0xf] %v4432_v19  ;;  %v8264_v42 = vpack.c.bf16 %v3721_v54, %v3721_v54  ;;  %v8269_v50 = vpack.c.bf16 %v3726_v59, %v3726_v59  ;;  %vm3684_vm4 = vcmp.ge.f32.partialorder %v3664_v24, 0.0  ;;  %v3704_v10 = vmul.f32 0.2, %v3664_v24 }
 0x1c0   : > { %v4423_v39 = vsel %vm11278_vm14, %v4225_v2, %v4422_v41  ;;  %v4250_v22 = vor.u32 %v4248_v21, %v4247_v37  ;;  %v4252_v58 = vrot.slane %v4247_v37, 4  ;;  %v3640_v11 = vadd.f32 %v8980_v25, %v11236_v38  ;;  %v3586_v20 = vpop.f32.mrf.mxu0  ;;  %v4428_v38 = vld [vmem:[#allocation2 + $0x8] sm:$0x1] }
 0x1c1   : > { %4424 = vst [vmem:[#allocation2] sm:$0xf] %v4423_v39  ;;  %v4228_v8 = vshrl.u32 %v8264_v42, 16  ;;  %v4231_v17 = vshll.u32 %v8264_v42, 16  ;;  %v4271_v44 = vshrl.u32 %v8269_v50, 16  ;;  %v4274_v23 = vshll.u32 %v8269_v50, 16 }
 0x1c2   : > { %v4251_v9 = vsel %vm11297_vm3, %v4243_v27, %v4250_v22  ;;  %v4436_v18 = vsel %vm11287_vm1, %v4252_v58, %v4435_v55  ;;  %v3724_v60 = vsel %vm3684_vm4, %v3664_v24, %v3704_v10  ;;  %v3667_v47 = vadd.f32 %v11233_v46, %v3640_v11  ;;  %v8984_v31 = vpop.f32.mrf.mxu0  ;;  %v4438_v55 = vld [vmem:[#allocation2 + $0x18] sm:$0xf] }
 0x1c3   : > { %4434 = vst [vmem:[#allocation2 + $0x10] sm:$0xf] %v4251_v9  ;;  %4437 = vst [vmem:[#allocation2 + $0x14] sm:$0x1] %v4436_v18  ;;  %v4230_v16 = vrot.slane %v4228_v8, 7  ;;  %v11309_v63 = vrot.slane %v4271_v44, 7  ;;  %v8267_v26 = vpack.c.bf16 %v3724_v60, %v3724_v60  ;;  %v3638_v32 = vadd.f32 %v3573_v14, %v11239_v57  ;;  %v11312_v43 = vpop.f32.mrf.mxu1 }
 0x1c4   : > { %vm3687_vm6 = vcmp.ge.f32.partialorder %v3667_v47, 0.0  ;;  %v3707_v40 = vmul.f32 0.2, %v3667_v47  ;;  %v3643_v34 = vadd.f32 %v8983_v28, %v11241_v52  ;;  %v3641_v30 = vadd.f32 %v3586_v20, %v11244_v56  ;;  %v3589_v41 = vpop.f32.mrf.mxu0 }
 0x1c5   : > { %v4233_v49 = vor.u32 %v4231_v17, %v4230_v16  ;;  %v4235_v25 = vrot.slane %v4230_v16, 4  ;;  %v4276_v51 = vor.u32 %v4274_v23, %v11309_v63  ;;  %v4277_v33 = vrot.slane %v11309_v63, 4  ;;  %v11318_v3 = vpop.f32.mrf.mxu1 }
 0x1c6   : > { %v4497_v27 = vld [vmem:[#allocation2 + $0xc] sm:$0x1]  ;;  %v4254_v29 = vshrl.u32 %v8267_v26, 16  ;;  %v4257_v57 = vshll.u32 %v8267_v26, 16  ;;  %v3727_v0 = vsel %vm3687_vm6, %v3667_v47, %v3707_v40  ;;  %v3665_v14 = vadd.f32 %v11233_v46, %v3638_v32  ;;  %v8987_v8 = vpop.f32.mrf.mxu0 }
 0x1c7   : > { %v4498_v52 = vsel %vm11287_vm1, 0, %v4497_v27  ;;  %v4234_v56 = vsel %vm11297_vm3, %v4226_v36, %v4233_v49  ;;  %v4429_v21 = vsel %vm11287_vm1, %v4235_v25, %v4428_v38  ;;  %v4446_v54 = vsel %vm11278_vm14, %v4276_v51, %v4445_v45  ;;  %v11329_v59 = vpop.f32.mrf.mxu1  ;;  %v4449_v47 = vld [vmem:[#allocation2 + $0x2c] sm:$0x1] }
 0x1c8   : > { %4499 = vst [vmem:[#allocation2 + $0xc] sm:$0x1] %v4498_v52  ;;  %v4494_v19 = vld [vmem:[#allocation2] sm:$0x1]  ;;  %4425 = vst [vmem:[#allocation2 + $0x4] sm:$0xf] %v4234_v56  ;;  %v8270_v36 = vpack.c.bf16 %v3727_v0, %v3727_v0  ;;  %v3670_v42 = vadd.f32 %v11233_v46, %v3643_v34  ;;  %v3668_v50 = vadd.f32 %v11233_v46, %v3641_v30  ;;  %v3602_v30 = vpop.f32.mrf.mxu0 }
 0x1c9   : > { %4430 = vst [vmem:[#allocation2 + $0x8] sm:$0x1] %v4429_v21  ;;  %4447 = vst [vmem:[#allocation2 + $0x24] sm:$0xf] %v4446_v54  ;;  %v11337_v2 = vrot.slane %v4254_v29, 7  ;;  %vm3685_vm9 = vcmp.ge.f32.partialorder %v3665_v14, 0.0  ;;  %v3644_v10 = vadd.f32 %v8984_v31, %v11247_v5  ;;  %v11348_v9 = vpop.f32.mrf.mxu1  ;;  %v3642_v26 = vadd.f32 %v3589_v41, %v11250_v13 }
 0x1ca   : > { %v3705_v37 = vmul.f32 0.2, %v3665_v14  ;;  %v4495_v28 = vsel %vm11287_vm1, 0, %v4494_v19  ;;  %v4528_v39 = vld [vmem:[#allocation2 + $0x14] sm:$0x1]  ;;  %v4279_v11 = vshrl.u32 %v8270_v36, 16 }
 0x1cb   : > { %4496 = vst [vmem:[#allocation2] sm:$0x1] %v4495_v28  ;;  %v4259_v22 = vor.u32 %v4257_v57, %v11337_v2  ;;  %v4260_v58 = vrot.slane %v11337_v2, 4  ;;  %v4282_v20 = vshll.u32 %v8270_v36, 16  ;;  %v4529_v17 = vsel %vm11333_vm8, 0, %v4528_v39 }
 0x1cc   : > { %v3725_v44 = vsel %vm3685_vm9, %v3665_v14, %v3705_v37  ;;  %vm3690_vm7 = vcmp.ge.f32.partialorder %v3670_v42, 0.0  ;;  %v3710_v23 = vmul.f32 0.2, %v3670_v42  ;;  %4530 = vst [vmem:[#allocation2 + $0x14] sm:$0x1] %v4529_v17  ;;  %v4281_v18 = vrot.slane %v4279_v11, 7 }
 0x1cd   : > { %v4439_v5 = vsel %vm11278_vm14, %v4259_v22, %v4438_v55  ;;  %v8268_v60 = vpack.c.bf16 %v3725_v44, %v3725_v44  ;;  %vm3688_vm10 = vcmp.ge.f32.partialorder %v3668_v50, 0.0  ;;  %v3708_v16 = vmul.f32 0.2, %v3668_v50  ;;  %v4442_v56 = vld [vmem:[#allocation2 + $0x20] sm:$0x1] }
 0x1ce   : > { %4440 = vst [vmem:[#allocation2 + $0x18] sm:$0xf] %v4439_v5  ;;  %v3730_v31 = vsel %vm3690_vm7, %v3670_v42, %v3710_v23  ;;  %v3671_v38 = vadd.f32 %v11233_v46, %v3644_v10  ;;  %v4284_v32 = vor.u32 %v4282_v20, %v4281_v18  ;;  %v4286_v45 = vrot.slane %v4281_v18, 4  ;;  %v4459_v11 = vld [vmem:[#allocation2 + $0x3c] sm:$0xf] }
 0x1cf   : > { %v4262_v40 = vshrl.u32 %v8268_v60, 16  ;;  %v4265_v34 = vshll.u32 %v8268_v60, 16  ;;  %v8273_v51 = vpack.c.bf16 %v3730_v31, %v3730_v31  ;;  %v3728_v27 = vsel %vm3688_vm10, %v3668_v50, %v3708_v16  ;;  %v11355_v57 = vpop.f32.mrf.mxu1  ;;  %v4452_v16 = vld [vmem:[#allocation2 + $0x30] sm:$0xf] }
 0x1d0   : > { %v4525_v49 = vld [vmem:[#allocation2 + $0x8] sm:$0x1]  ;;  %v4503_v25 = vld [vmem:[#allocation2 + $0x24] sm:$0x1]  ;;  %vm3691_vm11 = vcmp.ge.f32.partialorder %v3671_v38, 0.0  ;;  %v3669_v29 = vadd.f32 %v11233_v46, %v3642_v26  ;;  %v4285_v14 = vsel %vm11297_vm3, %v4277_v33, %v4284_v32  ;;  %v4450_v41 = vsel %vm11287_vm1, %v4286_v45, %v4449_v47  ;;  %v8988_v33 = vpop.f32.mrf.mxu0 }
 0x1d1   : > { %v4526_v0 = vsel %vm11333_vm8, 0, %v4525_v49  ;;  %v4504_v13 = vsel %vm11287_vm1, 0, %v4503_v25  ;;  %4448 = vst [vmem:[#allocation2 + $0x28] sm:$0xf] %v4285_v14  ;;  %4451 = vst [vmem:[#allocation2 + $0x2c] sm:$0x1] %v4450_v41  ;;  %v8271_v19 = vpack.c.bf16 %v3728_v27, %v3728_v27  ;;  %v11367_v36 = vpop.f32.mrf.mxu1  ;;  %v3647_v28 = vadd.f32 %v8987_v8, %v11254_v48 }
 0x1d2   : > { %4527 = vst [vmem:[#allocation2 + $0x8] sm:$0x1] %v4526_v0  ;;  %4505 = vst [vmem:[#allocation2 + $0x24] sm:$0x1] %v4504_v13  ;;  %v4264_v52 = vrot.slane %v4262_v40, 7  ;;  %v4305_v21 = vshrl.u32 %v8273_v51, 16  ;;  %v3605_v2 = vpop.f32.mrf.mxu0  ;;  %v3645_v45 = vadd.f32 %v3602_v30, %v11257_v12 }
 0x1d3   : > { %v4308_v54 = vshll.u32 %v8273_v51, 16  ;;  %v3711_v37 = vmul.f32 0.2, %v3671_v38  ;;  %vm3689_vm12 = vcmp.ge.f32.partialorder %v3669_v29, 0.0  ;;  %v3709_v63 = vmul.f32 0.2, %v3669_v29  ;;  %v11372_v39 = vpop.f32.mrf.mxu1 }
 0x1d4   : > { %v4267_v55 = vor.u32 %v4265_v34, %v4264_v52  ;;  %v4269_v42 = vrot.slane %v4264_v52, 4  ;;  %v11370_v50 = vrot.slane %v4305_v21, 7  ;;  %v4288_v10 = vshrl.u32 %v8271_v19, 16  ;;  %v11394_v40 = vld [vmem:[%s12243_s6] ss:$0 sm:$0xff]  ;;  %v8991_v21 = vpop.f32.mrf.mxu0 }
 0x1d5   : > { %v4500_v22 = vld [vmem:[#allocation2 + $0x18] sm:$0x1]  ;;  %v4291_v20 = vshll.u32 %v8271_v19, 16  ;;  %v3731_v17 = vsel %vm3691_vm11, %v3671_v38, %v3711_v37  ;;  %v3729_v44 = vsel %vm3689_vm12, %v3669_v29, %v3709_v63  ;;  %v3674_v23 = vadd.f32 %v11233_v46, %v3647_v28  ;;  %v11385_v60 = vpop.f32.mrf.mxu1 }
 0x1d6   : > { %v4501_v5 = vsel %vm11287_vm1, 0, %v4500_v22  ;;  %v4268_v48 = vsel %vm11297_vm3, %v4260_v58, %v4267_v55  ;;  %v4443_v8 = vsel %vm11287_vm1, %v4269_v42, %v4442_v56  ;;  %v4310_v18 = vor.u32 %v4308_v54, %v11370_v50  ;;  %v4463_v54 = vld [vmem:[#allocation2 + $0x44] sm:$0x1] }
 0x1d7   : > { %4502 = vst [vmem:[#allocation2 + $0x18] sm:$0x1] %v4501_v5  ;;  %4441 = vst [vmem:[#allocation2 + $0x1c] sm:$0xf] %v4268_v48  ;;  %v4311_v47 = vrot.slane %v11370_v50, 4  ;;  %v4290_v31 = vrot.slane %v4288_v10, 7  ;;  %v8274_v38 = vpack.c.bf16 %v3731_v17, %v3731_v17  ;;  %v8272_v26 = vpack.c.bf16 %v3729_v44, %v3729_v44  ;;  %v3618_v5 = vpop.f32.mrf.mxu0 }
 0x1d8   : > { %4444 = vst [vmem:[#allocation2 + $0x20] sm:$0x1] %v4443_v8  ;;  %v4460_v58 = vsel %vm11278_vm14, %v4310_v18, %v4459_v11  ;;  %vm3694_vm13 = vcmp.ge.f32.partialorder %v3674_v23, 0.0  ;;  %v3714_v32 = vmul.f32 0.2, %v3674_v23  ;;  %v3672_v56 = vadd.f32 %v11233_v46, %v3645_v45 }
 0x1d9   : > { %v4534_v34 = vld [vmem:[#allocation2 + $0x2c] sm:$0x1]  ;;  %4461 = vst [vmem:[#allocation2 + $0x3c] sm:$0xf] %v4460_v58  ;;  %v4293_v49 = vor.u32 %v4291_v20, %v4290_v31  ;;  %v4294_v25 = vrot.slane %v4290_v31, 4  ;;  %v4313_v51 = vshrl.u32 %v8274_v38, 16  ;;  %v3648_v37 = vadd.f32 %v8988_v33, %v11261_v62 }
 0x1da   : > { %v4316_v27 = vshll.u32 %v8274_v38, 16  ;;  %v4535_v29 = vsel %vm11333_vm8, 0, %v4534_v34  ;;  %v4296_v0 = vshrl.u32 %v8272_v26, 16  ;;  %v4299_v13 = vshll.u32 %v8272_v26, 16  ;;  %v11398_v41 = vpop.f32.mrf.mxu1  ;;  %v4456_v50 = vld [vmem:[#allocation2 + $0x38] sm:$0x1] }
 0x1db   : > { %v3734_v14 = vsel %vm3694_vm13, %v3674_v23, %v3714_v32  ;;  %4536 = vst [vmem:[#allocation2 + $0x2c] sm:$0x1] %v4535_v29  ;;  %v4453_v12 = vsel %vm11278_vm14, %v4293_v49, %v4452_v16  ;;  %v4315_v30 = vrot.slane %v4313_v51, 7  ;;  %v11406_v63 = vadd.f32 %v11312_v43, %v11394_v40  ;;  %v4473_v31 = vld [vmem:[#allocation2 + $0x54] sm:$0xf] }
 0x1dc   : > { %v8277_v52 = vpack.c.bf16 %v3734_v14, %v3734_v14  ;;  %4454 = vst [vmem:[#allocation2 + $0x30] sm:$0xf] %v4453_v12  ;;  %v4298_v19 = vrot.slane %v4296_v0, 7  ;;  %v3646_v28 = vadd.f32 %v3605_v2, %v11263_v61  ;;  %v11409_v11 = vpop.f32.mrf.mxu1  ;;  %vm3692_vm15 = vcmp.ge.f32.partialorder %v3672_v56, 0.0 }
 0x1dd   : > { %12302 = vst [vmem:[#allocation13_spill] sm:$0xff] %v11406_v63  ;;  %v4318_v55 = vor.u32 %v4316_v27, %v4315_v30  ;;  %v4320_v42 = vrot.slane %v4315_v30, 4  ;;  %v3712_v23 = vmul.f32 0.2, %v3672_v56  ;;  %v11433_v49 = vadd.f32 %v11394_v40, %v11318_v3 }
 0x1de   : > { %v4339_v10 = vshrl.u32 %v8277_v52, 16  ;;  %v4342_v22 = vshll.u32 %v8277_v52, 16  ;;  %v4301_v17 = vor.u32 %v4299_v13, %v4298_v19  ;;  %v4303_v44 = vrot.slane %v4298_v19, 4  ;;  %v11428_v32 = vpop.f32.mrf.mxu1  ;;  %v8992_v13 = vpop.f32.mrf.mxu0 }
 0x1df   : > { %v4531_v20 = vld [vmem:[#allocation2 + $0x20] sm:$0x1]  ;;  %v4319_v43 = vsel %vm11297_vm3, %v4311_v47, %v4318_v55  ;;  %v4464_v61 = vsel %vm11287_vm1, %v4320_v42, %v4463_v54  ;;  %v3732_v16 = vsel %vm3692_vm15, %v3672_v56, %v3712_v23  ;;  %v3675_v47 = vadd.f32 %v11233_v46, %v3648_v37  ;;  %12303 = vst [vmem:[#allocation14_spill] sm:$0xff] %v11433_v49 }
 0x1e0   : > { %v4532_v62 = vsel %vm11333_vm8, 0, %v4531_v20  ;;  %v11417_v33 = vrot.slane %v4339_v10, 7  ;;  %v4509_v48 = vld [vmem:[#allocation2 + $0x3c] sm:$0x1]  ;;  %4462 = vst [vmem:[#allocation2 + $0x40] sm:$0xf] %v4319_v43  ;;  %v4302_v8 = vsel %vm11297_vm3, %v4294_v25, %v4301_v17  ;;  %v4457_v18 = vsel %vm11287_vm1, %v4303_v44, %v4456_v50  ;;  %v11445_v19 = vpop.f32.mrf.mxu1 }
 0x1e1   : > { %4533 = vst [vmem:[#allocation2 + $0x20] sm:$0x1] %v4532_v62  ;;  %4465 = vst [vmem:[#allocation2 + $0x44] sm:$0x1] %v4464_v61  ;;  %v4510_v38 = vsel %vm11287_vm1, 0, %v4509_v48  ;;  %v8275_v58 = vpack.c.bf16 %v3732_v16, %v3732_v16  ;;  %vm3695_vm0 = vcmp.ge.f32.partialorder %v3675_v47, 0.0  ;;  %v3673_v34 = vadd.f32 %v11233_v46, %v3646_v28 }
 0x1e2   : > { %4455 = vst [vmem:[#allocation2 + $0x34] sm:$0xf] %v4302_v8  ;;  %4458 = vst [vmem:[#allocation2 + $0x38] sm:$0x1] %v4457_v18  ;;  %v4344_v26 = vor.u32 %v4342_v22, %v11417_v33  ;;  %v4345_v2 = vrot.slane %v11417_v33, 4  ;;  %v3651_v0 = vadd.f32 %v8991_v21, %v11265_v35  ;;  %v11443_v54 = vadd.f32 %v11329_v59, %v11394_v40 }
 0x1e3   : > { %4511 = vst [vmem:[#allocation2 + $0x3c] sm:$0x1] %v4510_v38  ;;  %v3715_v45 = vmul.f32 0.2, %v3675_v47  ;;  %v4506_v25 = vld [vmem:[#allocation2 + $0x30] sm:$0x1]  ;;  %v3649_v37 = vadd.f32 %v3618_v5, %v11268_v4  ;;  %v11450_v28 = vadd.f32 %v11394_v40, %v11348_v9  ;;  %v3652_v55 = vadd.f32 %v8992_v13, %v11270_v6 }
 0x1e4   : > { %v4474_v51 = vsel %vm11278_vm14, %v4344_v26, %v4473_v31  ;;  %v4322_v27 = vshrl.u32 %v8275_v58, 16  ;;  %v4325_v29 = vshll.u32 %v8275_v58, 16  ;;  %v4507_v14 = vsel %vm11287_vm1, 0, %v4506_v25  ;;  %12304 = vst [vmem:[#allocation15_spill] sm:$0xff] %v11443_v54  ;;  %v4466_v35 = vld [vmem:[#allocation2 + $0x48] sm:$0xf]  ;;  %v11460_v43 = vpop.f32.mrf.mxu1 }
 0x1e5   : > { %4475 = vst [vmem:[#allocation2 + $0x54] sm:$0xf] %v4474_v51  ;;  %v3735_v12 = vsel %vm3695_vm0, %v3675_v47, %v3715_v45  ;;  %vm3693_vm4 = vcmp.ge.f32.partialorder %v3673_v34, 0.0  ;;  %v3713_v30 = vmul.f32 0.2, %v3673_v34  ;;  %v3678_v56 = vadd.f32 %v11233_v46, %v3651_v0  ;;  %12305 = vst [vmem:[#allocation16_spill] sm:$0xff] %v11450_v28 }
 0x1e6   : > { %4508 = vst [vmem:[#allocation2 + $0x30] sm:$0x1] %v4507_v14  ;;  %v4324_v52 = vrot.slane %v4322_v27, 7  ;;  %v8278_v3 = vpack.c.bf16 %v3735_v12, %v3735_v12  ;;  %v3676_v62 = vadd.f32 %v11233_v46, %v3649_v37  ;;  %v4477_v61 = vld [vmem:[#allocation2 + $0x5c] sm:$0x1]  ;;  %v3679_v18 = vadd.f32 %v11233_v46, %v3652_v55  ;;  %v4141_v13 = vpop.f32.mrf.mxu1 }
 0x1e7   : > { %v3733_v21 = vsel %vm3693_vm4, %v3673_v34, %v3713_v30  ;;  %vm3698_vm6 = vcmp.ge.f32.partialorder %v3678_v56, 0.0  ;;  %v3718_v23 = vmul.f32 0.2, %v3678_v56  ;;  %v3621_v34 = vpop.f32.mrf.mxu0  ;;  %v4470_v27 = vld [vmem:[#allocation2 + $0x50] sm:$0x1]  ;;  %v11474_v33 = vadd.f32 %v11355_v57, %v11394_v40 }
 0x1e8   : > { %v4540_v42 = vld [vmem:[#allocation2 + $0x44] sm:$0x1]  ;;  %v4327_v50 = vor.u32 %v4325_v29, %v4324_v52  ;;  %v4328_v10 = vrot.slane %v4324_v52, 4  ;;  %v4347_v22 = vshrl.u32 %v8278_v3, 16  ;;  %v4350_v20 = vshll.u32 %v8278_v3, 16 }
 0x1e9   : > { %v4541_v59 = vsel %vm11333_vm8, 0, %v4540_v42  ;;  %v4537_v17 = vld [vmem:[#allocation2 + $0x38] sm:$0x1]  ;;  %v8276_v44 = vpack.c.bf16 %v3733_v21, %v3733_v21  ;;  %v3738_v8 = vsel %vm3698_vm6, %v3678_v56, %v3718_v23  ;;  %vm3696_vm9 = vcmp.ge.f32.partialorder %v3676_v62, 0.0  ;;  %12306 = vst [vmem:[#allocation17_spill] sm:$0xff] %v11474_v33 }
 0x1ea   : > { %4542 = vst [vmem:[#allocation2 + $0x44] sm:$0x1] %v4541_v59  ;;  %v4538_v4 = vsel %vm11333_vm8, 0, %v4537_v17  ;;  %v4467_v9 = vsel %vm11278_vm14, %v4327_v50, %v4466_v35  ;;  %v4349_v6 = vrot.slane %v4347_v22, 7  ;;  %v8281_v38 = vpack.c.bf16 %v3738_v8, %v3738_v8  ;;  %v4487_v37 = vld [vmem:[#allocation2 + $0x6c] sm:$0xf] }
 0x1eb   : > { %4539 = vst [vmem:[#allocation2 + $0x38] sm:$0x1] %v4538_v4  ;;  %4468 = vst [vmem:[#allocation2 + $0x48] sm:$0xf] %v4467_v9  ;;  %v4330_v5 = vshrl.u32 %v8276_v44, 16  ;;  %v4333_v48 = vshll.u32 %v8276_v44, 16  ;;  %v11484_v42 = vadd.f32 %v11394_v40, %v11367_v36  ;;  %v11491_v44 = vadd.f32 %v11372_v39, %v11394_v40 }
 0x1ec   : > { %v4515_v31 = vld [vmem:[#allocation2 + $0x54] sm:$0x1]  ;;  %v4352_v16 = vor.u32 %v4350_v20, %v4349_v6  ;;  %v4354_v47 = vrot.slane %v4349_v6, 4  ;;  %v3716_v45 = vmul.f32 0.2, %v3676_v62  ;;  %vm3699_vm7 = vcmp.ge.f32.partialorder %v3679_v18, 0.0 }
 0x1ed   : > { %v4516_v26 = vsel %vm11287_vm1, 0, %v4515_v31  ;;  %v4332_v58 = vrot.slane %v4330_v5, 7  ;;  %v4373_v29 = vshrl.u32 %v8281_v38, 16  ;;  %v4376_v0 = vshll.u32 %v8281_v38, 16  ;;  %12307 = vst [vmem:[#allocation18_spill] sm:$0xff] %v11484_v42  ;;  %12308 = vst [vmem:[#allocation19_spill] sm:$0xff] %v11491_v44 }
 0x1ee   : > { %4517 = vst [vmem:[#allocation2 + $0x54] sm:$0x1] %v4516_v26  ;;  %v4353_v25 = vsel %vm11297_vm3, %v4345_v2, %v4352_v16  ;;  %v4478_v51 = vsel %vm11287_vm1, %v4354_v47, %v4477_v61  ;;  %v3736_v30 = vsel %vm3696_vm9, %v3676_v62, %v3716_v45  ;;  %v3719_v52 = vmul.f32 0.2, %v3679_v18  ;;  %v4480_v4 = vld [vmem:[#allocation2 + $0x60] sm:$0xf] }
 0x1ef   : > { %4476 = vst [vmem:[#allocation2 + $0x58] sm:$0xf] %v4353_v25  ;;  %4479 = vst [vmem:[#allocation2 + $0x5c] sm:$0x1] %v4478_v51  ;;  %v4335_v14 = vor.u32 %v4333_v48, %v4332_v58  ;;  %v4337_v12 = vrot.slane %v4332_v58, 4  ;;  %v4375_v3 = vrot.slane %v4373_v29, 7  ;;  %v8279_v56 = vpack.c.bf16 %v3736_v30, %v3736_v30 }
 0x1f0   : > { %v3650_v2 = vadd.f32 %v3621_v34, %v11272_v53  ;;  %v3739_v55 = vsel %vm3699_vm7, %v3679_v18, %v3719_v52  ;;  %v9024_v53 = vpop.f32.mrf.mxu1  ;;  %v11497_v9 = vadd.f32 %v11394_v40, %v11385_v60  ;;  %v11501_v6 = vadd.f32 %v11398_v41, %v11394_v40 }
 0x1f1   : > { %v4336_v35 = vsel %vm11297_vm3, %v4328_v10, %v4335_v14  ;;  %v4471_v21 = vsel %vm11287_vm1, %v4337_v12, %v4470_v27  ;;  %v4378_v57 = vor.u32 %v4376_v0, %v4375_v3  ;;  %v4356_v22 = vshrl.u32 %v8279_v56, 16  ;;  %v4484_v12 = vld [vmem:[#allocation2 + $0x68] sm:$0x1] }
 0x1f2   : > { %v4512_v50 = vld [vmem:[#allocation2 + $0x48] sm:$0x1]  ;;  %4469 = vst [vmem:[#allocation2 + $0x4c] sm:$0xf] %v4336_v35  ;;  %4472 = vst [vmem:[#allocation2 + $0x50] sm:$0x1] %v4471_v21  ;;  %v8282_v59 = vpack.c.bf16 %v3739_v55, %v3739_v55  ;;  %v3677_v17 = vadd.f32 %v11233_v46, %v3650_v2  ;;  %v11505_v8 = vadd.f32 %v11394_v40, %v11409_v11  ;;  %v4144_v18 = vpop.f32.mrf.mxu1 }
 0x1f3   : > { %v4359_v20 = vshll.u32 %v8279_v56, 16  ;;  %v4513_v10 = vsel %vm11287_vm1, 0, %v4512_v50  ;;  %v4488_v36 = vsel %vm11278_vm14, %v4378_v57, %v4487_v37  ;;  %v4358_v23 = vrot.slane %v4356_v22, 7  ;;  %12309 = vst [vmem:[#allocation20_spill] sm:$0xff] %v11497_v9  ;;  %12310 = vst [vmem:[#allocation21_spill] sm:$0xff] %v11501_v6 }
 0x1f4   : > { %4514 = vst [vmem:[#allocation2 + $0x48] sm:$0x1] %v4513_v10  ;;  %v4379_v62 = vrot.slane %v4375_v3, 4  ;;  %4489 = vst [vmem:[#allocation2 + $0x6c] sm:$0xf] %v4488_v36  ;;  %v4381_v46 = vshrl.u32 %v8282_v59, 16  ;;  %v11509_v60 = vadd.f32 %v11428_v32, %v11394_v40  ;;  %v11515_v47 = vadd.f32 %v11394_v40, %v11445_v19 }
 0x1f5   : > { %vm3697_vm10 = vcmp.ge.f32.partialorder %v3677_v17, 0.0  ;;  %v3717_v39 = vmul.f32 0.2, %v3677_v17  ;;  %v4361_v5 = vor.u32 %v4359_v20, %v4358_v23  ;;  %v4384_v48 = vshll.u32 %v8282_v59, 16  ;;  %12311 = vst [vmem:[#allocation22_spill] sm:$0xff] %v11505_v8 }
 0x1f6   : > { %v4546_v61 = vld [vmem:[#allocation2 + $0x5c] sm:$0x1]  ;;  %12312 = vst [vmem:[#allocation23_spill] sm:$0xff] %v11509_v60  ;;  %v4383_v31 = vrot.slane %v4381_v46, 7  ;;  %12313 = vst [vmem:[#allocation24_spill] sm:$0xff] %v11515_v47  ;;  %v11521_v32 = vadd.f32 %v11460_v43, %v11394_v40  ;;  %v11524_v58 = vadd.f32 %v11394_v40, %v4141_v13  ;;  %v11527_v19 = vadd.f32 %v9024_v53, %v11394_v40 }
 0x1f7   : > { %v4547_v41 = vsel %vm11333_vm8, 0, %v4546_v61  ;;  %v3737_v16 = vsel %vm3697_vm10, %v3677_v17, %v3717_v39  ;;  %v4481_v38 = vsel %vm11278_vm14, %v4361_v5, %v4480_v4  ;;  %v4491_v11 = vld [vmem:[#allocation2 + $0x74] sm:$0x1]  ;;  %v11530_v51 = vadd.f32 %v11394_v40, %v4144_v18 }
 0x1f8   : > { %4548 = vst [vmem:[#allocation2 + $0x5c] sm:$0x1] %v4547_v41  ;;  %v8280_v26 = vpack.c.bf16 %v3737_v16, %v3737_v16  ;;  %12314 = vst [vmem:[#allocation25_spill] sm:$0xff] %v11521_v32  ;;  %v4386_v34 = vor.u32 %v4384_v48, %v4383_v31  ;;  %v4388_v25 = vrot.slane %v4383_v31, 4  ;;  %v4362_v30 = vrot.slane %v4358_v23, 4 }
 0x1f9   : > { %12315 = vst [vmem:[#allocation26_spill] sm:$0xff] %v11524_v58  ;;  %v4543_v45 = vld [vmem:[#allocation2 + $0x50] sm:$0x1]  ;;  %4482 = vst [vmem:[#allocation2 + $0x60] sm:$0xf] %v4481_v38 }
 0x1fa   : > { %12316 = vst [vmem:[#allocation27_spill] sm:$0xff] %v11527_v19  ;;  %12317 = vst [vmem:[#allocation28_spill] sm:$0xff] %v11530_v51  ;;  %v4544_v7 = vsel %vm11333_vm8, 0, %v4543_v45  ;;  %v4364_v27 = vshrl.u32 %v8280_v26, 16  ;;  %v4387_v43 = vsel %vm11297_vm3, %v4379_v62, %v4386_v34  ;;  %v4492_v29 = vsel %vm11287_vm1, %v4388_v25, %v4491_v11 }
 0x1fb   : > { %4545 = vst [vmem:[#allocation2 + $0x50] sm:$0x1] %v4544_v7  ;;  %v4521_v0 = vld [vmem:[#allocation2 + $0x6c] sm:$0x1]  ;;  %4490 = vst [vmem:[#allocation2 + $0x70] sm:$0xf] %v4387_v43 }
 0x1fc   : > { %4493 = vst [vmem:[#allocation2 + $0x74] sm:$0x1] %v4492_v29  ;;  %v4366_v13 = vrot.slane %v4364_v27, 7  ;;  %v4367_v14 = vshll.u32 %v8280_v26, 16  ;;  %v4522_v40 = vsel %vm11287_vm1, 0, %v4521_v0 }
 0x1fd   : > { %4523 = vst [vmem:[#allocation2 + $0x6c] sm:$0x1] %v4522_v40 }
 0x1fe   : > { %v4369_v52 = vor.u32 %v4367_v14, %v4366_v13  ;;  %v4371_v3 = vrot.slane %v4366_v13, 4 }
 0x200   : > { %v4518_v56 = vld [vmem:[#allocation2 + $0x60] sm:$0x1]  ;;  %v4370_v2 = vsel %vm11297_vm3, %v4362_v30, %v4369_v52  ;;  %v4485_v35 = vsel %vm11287_vm1, %v4371_v3, %v4484_v12 }
 0x201   : > { %v4519_v21 = vsel %vm11287_vm1, 0, %v4518_v56  ;;  %4483 = vst [vmem:[#allocation2 + $0x64] sm:$0xf] %v4370_v2  ;;  %4486 = vst [vmem:[#allocation2 + $0x68] sm:$0x1] %v4485_v35 }
 0x202   : > { %4520 = vst [vmem:[#allocation2 + $0x60] sm:$0x1] %v4519_v21 }
 0x203   : > { %v4552_v37 = vld [vmem:[#allocation2 + $0x74] sm:$0x1] }
 0x204   : > { %v4553_v55 = vsel %vm11333_vm8, 0, %v4552_v37 }
 0x205   : > { %4554 = vst [vmem:[#allocation2 + $0x74] sm:$0x1] %v4553_v55 }
 0x206   : > { %4558 = sbr.rel (%p8069_p10) target bundleno = 526 (0x20e), region = 56 }
 0x208   : > { %v4549_v50 = vld [vmem:[#allocation2 + $0x68] sm:$0x1] }
 0x209   : > { %v4550_v57 = vsel %vm11333_vm8, 0, %v4549_v50 }
 0x20a   : > { %4551 = vst [vmem:[#allocation2 + $0x68] sm:$0x1] %v4550_v57 }
 0x20b   : > { %v9752_v15 = vmov 0  }
 0x20c   : > { %4559 = vst [vmem:[#allocation2] sm:$0xf] %v9752_v15  ;;  %4560 = vst [vmem:[#allocation2 + $0x4] sm:$0xf] %v9752_v15 }
 0x20d   : > { %4561 = vst [vmem:[#allocation2 + $0x8] sm:$0x1] %v9752_v15 }
 0x20e PF: > { %p8070_p12 = scmp.ne.s32.totalorder %s9731_s27, 1 }
 0x210   : > { %4565 = sbr.rel (%p8070_p12) target bundleno = 536 (0x218), region = 60 }
 0x215   : > { %v9753_v1 = vmov 0  }
 0x216   : > { %4567 = vst [vmem:[#allocation2 + $0x6c] sm:$0xf] %v9753_v1  ;;  %4568 = vst [vmem:[#allocation2 + $0x70] sm:$0xf] %v9753_v1 }
 0x217   : > { %4569 = vst [vmem:[#allocation2 + $0x74] sm:$0x1] %v9753_v1 }
 0x218 PF: > { %v9529_v24 = vld [vmem:[#allocation3 + $0x78] sm:$0xff]   ;;  %v9531_v20 = vld [vmem:[#allocation3 + $0x70] sm:$0xff]   ;;  %v9533_v10 = vld [vmem:[#allocation3 + $0x68] sm:$0xff]   ;;  %s8299_s12 = sshll.u32 %s9731_s27, 4  ;;  %s8259_s22 = sshll.u32 %s9735_s28, 5 }
 0x219   : > { %v9530_v22 = vld [vmem:[#allocation3 + $0x38] sm:$0xff]   ;;  %9025 = vmatprep.subr.bf16.mxu1 %v9529_v24  ;;  %v9532_v53 = vld [vmem:[#allocation3 + $0x30] sm:$0xff]   ;;  %v9534_v59 = vld [vmem:[#allocation3 + $0x28] sm:$0xff]   ;;  %s7586_s23 = sadd.s32 %s8299_s12, %s8259_s22  ;;  %s7589_s27 = sshll.u32 %s11551_s19, 4  ;;  %s12175_s27 = int_to_ptr.vmem [resolvable:$true] %s7589_s27 }
 0x21a   : > { %9057 = vmatprep.subr.bf16.mxu0 %v9530_v22  ;;  %9026 = vmatpush3.bf16.msra.mxu1 %v9529_v24  ;;  %v9535_v17 = vld [vmem:[#allocation3 + $0x60] sm:$0xff]   ;;  %v9537_v23 = vld [vmem:[#allocation3 + $0x58] sm:$0xff]   ;;  %v9539_v62 = vld [vmem:[#allocation3 + $0x50] sm:$0xff]   ;;  %s8260_s28 = sshll.u32 %s7586_s23, 6  ;;  %s12365_s17 = sand.u32 1, %s9723_s25  }
 0x21b   : > { %9058 = vmatpush3.bf16.msra.mxu0 %v9530_v22  ;;  %9027 = vmatprep.subr.bf16.mxu1 %v9531_v20  ;;  %v9536_v36 = vld [vmem:[#allocation3 + $0x20] sm:$0xff]   ;;  %v9538_v4 = vld [vmem:[#allocation3 + $0x18] sm:$0xff]   ;;  %v9540_v46 = vld [vmem:[#allocation3 + $0x10] sm:$0xff]   ;;  %s12180_s3 = scalar_lea.hbm %s12244_s7, %s8260_s28  ;;  %s12186_s11 = scalar_lea.sflag [#allocation5], %s12365_s17 }
 0x21c   : > { %9059 = vmatprep.subr.bf16.mxu0 %v9532_v53  ;;  %v4570_v39 = vld [vmem:[#allocation2] sm:$0xf]  ;;  %v11555_v61 = vld [vmem:[#allocation2 + $0x4] sm:$0xf]  ;;  %v11557_v5 = vld [vmem:[#allocation2 + $0x8] sm:$0x1] }
 0x21d   : > { %v4611_v48 = vshrl.u32 %v4570_v39, 16  ;;  %v4614_v18 = vshll.u32 %v4570_v39, 16  ;;  %v4620_v41 = vshll.u32 %v11555_v61, 16  ;;  %v4624_v31 = vshrl.u32 %v11555_v61, 16  ;;  %v11561_v16 = vld [vmem:[#allocation2 + $0xc] sm:$0xf] }
 0x21e   : > { %9028 = vmatpush3.bf16.msra.mxu1 %v9531_v20  ;;  %v9541_v38 = vld [vmem:[#allocation3 + $0x48] sm:$0xff]   ;;  %v4630_v11 = vshll.u32 %v11557_v5, 16  ;;  %v8087_v26 = vcombine.low %v4570_v39, %v11555_v61  ;;  %v11565_v45 = vld [vmem:[#allocation2 + $0x10] sm:$0xf]  ;;  %v11567_v34 = vld [vmem:[#allocation2 + $0x14] sm:$0x1] }
 0x21f   : > { %9060 = vmatpush3.bf16.msra.mxu0 %v9532_v53  ;;  %9029 = vmatprep.subr.bf16.mxu1 %v9533_v10  ;;  %v4613_v25 = vrot.slane %v4611_v48, 4  ;;  %v4616_v7 = vrot.slane %v4614_v18, 5  ;;  %v4622_v27 = vrot.slane %v4620_v41, 5  ;;  %v4626_v43 = vrot.slane %v4624_v31, 4  ;;  %v9542_v40 = vld [vmem:[#allocation3 + $0x8] sm:$0xff]   ;;  %v9543_v37 = vld [vmem:[#allocation3 + $0x40] sm:$0xff]  }
 0x220   : > { %9061 = vmatprep.subr.bf16.mxu0 %v9534_v59  ;;  %v4632_v29 = vrot.slane %v4630_v11, 5  ;;  %v4635_v0 = vshrl.u32 %v11561_v16, 16  ;;  %v4638_v13 = vshll.u32 %v11561_v16, 16  ;;  %v4644_v14 = vshll.u32 %v11565_v45, 16  ;;  %9073 = vmatprep.mubr.bf16.mxu0 %v8087_v26  ;;  %v9544_v15 = vld [vmem:[#allocation3] sm:$0xff]   ;;  %s9651_s20 = scalar_lea.vmem %s12175_s27, 1024 }
 0x221   : > { %v4617_v12 = vor.u32 %v4616_v7, %v4613_v25  ;;  %v4627_v30 = vor.u32 %v4626_v43, %v4622_v27  ;;  %v4648_v52 = vshrl.u32 %v11565_v45, 16  ;;  %v4654_v3 = vshll.u32 %v11567_v34, 16  ;;  %v11588_v39 = vld [vmem:[#allocation2 + $0x20] sm:$0x1]  ;;  %v11594_v26 = vld [vmem:[#allocation2 + $0x24] sm:$0xf]  ;;  %p9652_p1 = scmp.ne.s32.totalorder %s12175_s27, %s9651_s20 }
 0x222   : > { %9030 = vmatpush3.bf16.msra.mxu1 %v9533_v10  ;;  %v4637_v56 = vrot.slane %v4635_v0, 4  ;;  %v4640_v2 = vrot.slane %v4638_v13, 5  ;;  %v4646_v35 = vrot.slane %v4644_v14, 5  ;;  %v12252_v21 = vrot.slane %v11565_v45, 5  ;;  %v11601_v43 = vld [vmem:[#allocation2 + $0x28] sm:$0xf] }
 0x223   : > { %9062 = vmatpush3.bf16.msra.mxu0 %v9534_v59  ;;  %9031 = vmatprep.subr.bf16.mxu1 %v9535_v17  ;;  %v4618_v55 = vrot.slane %v4617_v12, 4  ;;  %v4628_v50 = vrot.slane %v4627_v30, 4  ;;  %v4650_v57 = vrot.slane %v4648_v52, 4  ;;  %v5217_v1 = vrot.slane %v11557_v5, 5  ;;  %v9548_v13 = vld [vmem:[#allocation3 + $0xf8] sm:$0xff]   ;;  %v9549_v52 = vld [vmem:[#allocation3 + $0xb0] sm:$0xff]   ;;  %p9653_p2 = pnand %p9652_p1, %p9849_p3 }
 0x224   : > { %9063 = vmatprep.subr.bf16.mxu0 %v9536_v36  ;;  %v4641_v24 = vor.u32 %v4640_v2, %v4637_v56  ;;  %v4656_v22 = vrot.slane %v4654_v3, 5  ;;  %v11578_v20 = vrot.slane %v12252_v21, 4  ;;  %v8088_v7 = vcombine.low %v11561_v16, %v11565_v45  ;;  %s9754_s14 = smov [#allocation6]  }
 0x225   : > { %v4623_v10 = vsel %vm9983_vm2, %v4618_v55, %v4622_v27  ;;  %v4633_v59 = vsel %vm9983_vm2, %v4628_v50, %v4632_v29  ;;  %v11603_v29 = vld [vmem:[#allocation2 + $0x2c] sm:$0x1]  ;;  %v4683_v16 = vshrl.u32 %v11594_v26, 16  ;;  %v4686_v56 = vshll.u32 %v11594_v26, 16  ;;  %p9654_p4 = pneg %p9653_p2  ;;  %s9655_s10 = sshll.u32 %s9754_s14, 4  ;;  %s9656_s10 = int_to_ptr.vmem [resolvable:$false] %s9655_s10 }
 0x226   : > { %9032 = vmatpush3.bf16.msra.mxu1 %v9535_v17  ;;  %v4651_v17 = vor.u32 %v4650_v57, %v4646_v35  ;;  %v4692_v55 = vshll.u32 %v11601_v43, 16  ;;  %v4696_v50 = vshrl.u32 %v11601_v43, 16  ;;  %v9550_v57 = vld [vmem:[#allocation3 + $0xf0] sm:$0xff]   ;;  %v5235_v5 = vrot.slane %v11601_v43, 5  ;;  %s9657_s18 = scalar_lea.vmem %s9656_s10, 2048  ;;  %p9658_p5 = scmp.lt.s32.totalorder %s12175_s27, %s9656_s10 }
 0x227   : > { %9064 = vmatpush3.bf16.msra.mxu0 %v9536_v36  ;;  %9033 = vmatprep.subr.bf16.mxu1 %v9537_v23  ;;  %v11584_v36 = vld [vmem:[#allocation2 + $0x18] sm:$0xf]  ;;  %p9659_p6 = scmp.lt.s32.totalorder %s9657_s18, %s9651_s20 }
 0x228   : > { %9065 = vmatprep.subr.bf16.mxu0 %v9538_v4  ;;  %v4659_v48 = vshrl.u32 %v11584_v36, 16  ;;  %v4652_v18 = vrot.slane %v4651_v17, 4  ;;  %v4662_v41 = vshll.u32 %v11584_v36, 16 }
 0x229   : > { %p9660_p7 = por %p9659_p6, %p9658_p5 }
 0x22a   : > { %9034 = vmatpush3.bf16.msra.mxu1 %v9537_v23  ;;  %v8071_v23 = vcombine.low %v4623_v10, %v4633_v59  ;;  %v4661_v27 = vrot.slane %v4659_v48, 4  ;;  %v4657_v0 = vsel %vm9983_vm2, %v4652_v18, %v4656_v22  ;;  %v4664_v14 = vrot.slane %v4662_v41, 5  ;;  %v9553_v41 = vld [vmem:[#allocation3 + $0xa8] sm:$0xff]  }
 0x22b   : > { %9066 = vmatpush3.bf16.msra.mxu0 %v9538_v4  ;;  %9035 = vmatprep.subr.bf16.mxu1 %v9539_v62  ;;  %v4642_v4 = vrot.slane %v4641_v24, 4  ;;  %v4685_v22 = vrot.slane %v4683_v16, 4  ;;  %v4688_v10 = vrot.slane %v4686_v56, 5  ;;  %v4702_v59 = vshll.u32 %v11603_v29, 16  ;;  %p9661_p9 = pnand %p9660_p7, %p9654_p4 }
 0x22c   : > { %9067 = vmatprep.subr.bf16.mxu0 %v9540_v46  ;;  %9041 = vmatprep.mubr.bf16.mxu1 %v8071_v23  ;;  %v4665_v2 = vor.u32 %v4664_v14, %v4661_v27  ;;  %v11622_v27 = vld [vmem:[#allocation2 + $0x34] sm:$0xf]  ;;  %v9554_v14 = vld [vmem:[#allocation3 + $0xe8] sm:$0xff]  }
 0x22d   : > { %v4647_v25 = vsel %vm9983_vm2, %v4642_v4, %v4646_v35  ;;  %v4698_v4 = vrot.slane %v4696_v50, 4  ;;  %v4689_v48 = vor.u32 %v4688_v10, %v4685_v22  ;;  %v4704_v18 = vrot.slane %v4702_v59, 5  ;;  %v11639_v50 = vld [vmem:[#allocation2 + $0x44] sm:$0x1]  ;;  %v9555_v22 = vld [vmem:[#allocation3 + $0xa0] sm:$0xff]  }
 0x22e   : > { %9036 = vmatpush3.bf16.msra.mxu1 %v9539_v62  ;;  %v9547_v62 = vld [vmem:[#allocation3 + $0xb8] sm:$0xff]   ;;  %v8072_v30 = vcombine.low %v4647_v25, %v4657_v0  ;;  %v4666_v17 = vrot.slane %v4665_v2, 4 }
 0x22f   : > { %9068 = vmatpush3.bf16.msra.mxu0 %v9540_v46  ;;  %9037 = vmatprep.subr.bf16.mxu1 %v9541_v38  ;;  %v11586_v46 = vld [vmem:[#allocation2 + $0x1c] sm:$0xf]  ;;  %v11620_v25 = vld [vmem:[#allocation2 + $0x30] sm:$0xf] }
 0x230   : > { %9069 = vmatprep.subr.bf16.mxu0 %v9542_v40  ;;  %v4668_v31 = vshll.u32 %v11586_v46, 16  ;;  %v4672_v11 = vshrl.u32 %v11586_v46, 16  ;;  %v8089_v24 = vcombine.low %v11584_v36, %v11586_v46 }
 0x232   : > { %9038 = vmatpush3.bf16.msra.mxu1 %v9541_v38  ;;  %v4678_v38 = vshll.u32 %v11588_v39, 16  ;;  %v4674_v12 = vrot.slane %v4672_v11, 4 }
 0x233   : > { %9070 = vmatpush3.bf16.msra.mxu0 %v9542_v40  ;;  %9039 = vmatprep.subr.bf16.mxu1 %v9543_v37  ;;  %v4670_v40 = vrot.slane %v4668_v31, 5 }
 0x234   : > { %9071 = vmatprep.subr.bf16.mxu0 %v9544_v15  ;;  %v4680_v3 = vrot.slane %v4678_v38, 5  ;;  %v11624_v38 = vld [vmem:[#allocation2 + $0x38] sm:$0x1] }
 0x235   : > { %v4675_v35 = vor.u32 %v4674_v12, %v4670_v40  ;;  %v4671_v36 = vsel %vm9983_vm2, %v4666_v17, %v4670_v40  ;;  %v11628_v40 = vld [vmem:[#allocation2 + $0x3c] sm:$0xf]  ;;  %v4726_v16 = vshll.u32 %v11624_v38, 16 }
 0x236   : > { %9040 = vmatpush3.bf16.msra.mxu1 %v9543_v37  ;;  %v4694_v37 = vrot.slane %v4692_v55, 5  ;;  %v8091_v55 = vcombine.low %v11620_v25, %v11622_v27 }
 0x237   : > { %9072 = vmatpush3.bf16.msra.mxu0 %v9544_v15  ;;  %9089 = vmatprep.subr.bf16.mxu1 %v9547_v62  ;;  %v4676_v23 = vrot.slane %v4675_v35, 4  ;;  %v8090_v15 = vcombine.low %v11594_v26, %v11601_v43  ;;  %v4690_v26 = vrot.slane %v4689_v48, 4  ;;  %v4728_v17 = vrot.slane %v4726_v16, 5  ;;  %v9560_v16 = vld [vmem:[#allocation3 + $0xd8] sm:$0xff]   ;;  %v9574_v43 = vld [vmem:[#allocation3 + $0x170] sm:$0xff]  }
 0x238   : > { %9121 = vmatprep.subr.bf16.mxu0 %v9548_v13  ;;  %v4699_v11 = vor.u32 %v4698_v4, %v4694_v37  ;;  %v4734_v48 = vshll.u32 %v11628_v40, 16 }
 0x239   : > { %9042 = vmatmul.mubr.bf16.vlgmr.msra.gmra.mxu1 %v8072_v30  ;;  %v4681_v31 = vsel %vm9983_vm2, %v4676_v23, %v4680_v3  ;;  %v4716_v30 = vshll.u32 %v11622_v27, 16  ;;  %v4720_v3 = vshrl.u32 %v11622_v27, 16  ;;  %v4695_v56 = vsel %vm9983_vm2, %v4690_v26, %v4694_v37 }
 0x23a   : > { %9074 = vmatmul.mubr.bf16.vlgmr.msra.gmra.mxu0 %v8088_v7  ;;  %9090 = vmatpush3.bf16.msra.mxu1 %v9547_v62  ;;  %v8073_v0 = vcombine.low %v4671_v36, %v4681_v31  ;;  %v4707_v62 = vshrl.u32 %v11620_v25, 16  ;;  %v4710_v7 = vshll.u32 %v11620_v25, 16  ;;  %v4700_v12 = vrot.slane %v4699_v11, 4  ;;  %v9556_v36 = vld [vmem:[#allocation3 + $0xe0] sm:$0xff]  }
 0x23b   : > { %9122 = vmatpush3.bf16.msra.mxu0 %v9548_v13  ;;  %9091 = vmatprep.subr.bf16.mxu1 %v9549_v52  ;;  %v11633_v13 = vld [vmem:[#allocation2 + $0x40] sm:$0xf]  ;;  %v4718_v10 = vrot.slane %v4716_v30, 5  ;;  %v4722_v59 = vrot.slane %v4720_v3, 4  ;;  %v4731_v37 = vshrl.u32 %v11628_v40, 16  ;;  %v5224_v25 = vrot.slane %v11567_v34, 5 }
 0x23c   : > { %9123 = vmatprep.subr.bf16.mxu0 %v9550_v57  ;;  %9077 = vmatprep.mubr.bf16.mxu0 %v8089_v24  ;;  %v4709_v2 = vrot.slane %v4707_v62, 4  ;;  %v4712_v35 = vrot.slane %v4710_v7, 5  ;;  %v4705_v24 = vsel %vm9983_vm2, %v4700_v12, %v4704_v18  ;;  %v4744_v11 = vshrl.u32 %v11633_v13, 16  ;;  %v9559_v3 = vld [vmem:[#allocation3 + $0x98] sm:$0xff]  }
 0x23d   : > { %9045 = vmatprep.mubr.bf16.mxu1 %v8073_v0  ;;  %v8074_v23 = vcombine.low %v4695_v56, %v4705_v24  ;;  %v4723_v31 = vor.u32 %v4722_v59, %v4718_v10  ;;  %v4750_v18 = vshll.u32 %v11639_v50, 16  ;;  %v4733_v0 = vrot.slane %v4731_v37, 4  ;;  %v4582_v24 = vld [vmem:[#allocation2 + $0x48] sm:$0xf]  ;;  %v11653_v59 = vld [vmem:[#allocation2 + $0x4c] sm:$0xf] }
 0x23e   : > { %9092 = vmatpush3.bf16.msra.mxu1 %v9549_v52  ;;  %v4713_v4 = vor.u32 %v4712_v35, %v4709_v2  ;;  %v4740_v52 = vshll.u32 %v11633_v13, 16  ;;  %v4736_v26 = vrot.slane %v4734_v48, 5  ;;  %v4746_v12 = vrot.slane %v4744_v11, 4  ;;  %v11659_v37 = vld [vmem:[#allocation2 + $0x54] sm:$0xf] }
 0x23f   : > { %9124 = vmatpush3.bf16.msra.mxu0 %v9550_v57  ;;  %9093 = vmatprep.subr.bf16.mxu1 %v9553_v41  ;;  %v4724_v62 = vrot.slane %v4723_v31, 4  ;;  %v4752_v30 = vrot.slane %v4750_v18, 5  ;;  %v8092_v35 = vcombine.low %v11628_v40, %v11633_v13  ;;  %v4764_v31 = vshll.u32 %v11653_v59, 16  ;;  %v9561_v18 = vld [vmem:[#allocation3 + $0x90] sm:$0xff]  }
 0x240   : > { %9125 = vmatprep.subr.bf16.mxu0 %v9554_v14  ;;  %v4714_v57 = vrot.slane %v4713_v4, 4  ;;  %v4742_v7 = vrot.slane %v4740_v52, 5  ;;  %v4737_v2 = vor.u32 %v4736_v26, %v4733_v0  ;;  %v4758_v4 = vshll.u32 %v4582_v24, 16  ;;  %v11663_v52 = vld [vmem:[#allocation2 + $0x58] sm:$0xf] }
 0x241   : > { %9046 = vmatmul.mubr.bf16.gmra.mxu1 %v8074_v23  ;;  %v11657_v23 = vld [vmem:[#allocation2 + $0x50] sm:$0x1]  ;;  %v4768_v40 = vshrl.u32 %v11653_v59, 16  ;;  %v11666_v26 = vld [vmem:[#allocation2 + $0x5c] sm:$0x1] }
 0x242   : > { %9078 = vmatmul.mubr.bf16.gmra.mxu0 %v8090_v15  ;;  %9094 = vmatpush3.bf16.msra.mxu1 %v9553_v41  ;;  %v4719_v56 = vsel %vm9983_vm2, %v4714_v57, %v4718_v10  ;;  %v4729_v15 = vsel %vm9983_vm2, %v4724_v62, %v4728_v17  ;;  %v4747_v41 = vor.u32 %v4746_v12, %v4742_v7  ;;  %v4738_v48 = vrot.slane %v4737_v2, 4  ;;  %v9562_v17 = vld [vmem:[#allocation3 + $0xd0] sm:$0xff]  }
 0x243   : > { %9126 = vmatpush3.bf16.msra.mxu0 %v9554_v14  ;;  %9095 = vmatprep.subr.bf16.mxu1 %v9555_v22  ;;  %v4755_v14 = vshrl.u32 %v4582_v24, 16  ;;  %v8075_v10 = vcombine.low %v4719_v56, %v4729_v15  ;;  %v4760_v57 = vrot.slane %v4758_v4, 5  ;;  %v4774_v0 = vshll.u32 %v11657_v23, 16 }
 0x244   : > { %9127 = vmatprep.subr.bf16.mxu0 %v9556_v36  ;;  %9081 = vmatprep.mubr.bf16.mxu0 %v8091_v55  ;;  %v4748_v11 = vrot.slane %v4747_v41, 4  ;;  %v4743_v62 = vsel %vm9983_vm2, %v4738_v48, %v4742_v7  ;;  %v4766_v12 = vrot.slane %v4764_v31, 5  ;;  %v4770_v56 = vrot.slane %v4768_v40, 4 }
 0x245   : > { %v4757_v55 = vrot.slane %v4755_v14, 4  ;;  %9049 = vmatprep.mubr.bf16.mxu1 %v8075_v10  ;;  %v8093_v2 = vcombine.low %v4582_v24, %v11653_v59  ;;  %v4776_v41 = vrot.slane %v4774_v0, 5  ;;  %v4779_v14 = vshrl.u32 %v11659_v37, 16 }
 0x246   : > { %9096 = vmatpush3.bf16.msra.mxu1 %v9555_v22  ;;  %v4753_v22 = vsel %vm9983_vm2, %v4748_v11, %v4752_v30  ;;  %v4771_v21 = vor.u32 %v4770_v56, %v4766_v12  ;;  %v4788_v10 = vshll.u32 %v11663_v52, 16  ;;  %v4792_v24 = vshrl.u32 %v11663_v52, 16 }
 0x247   : > { %9128 = vmatpush3.bf16.msra.mxu0 %v9556_v36  ;;  %9097 = vmatprep.subr.bf16.mxu1 %v9559_v3  ;;  %v4761_v15 = vor.u32 %v4760_v57, %v4757_v55  ;;  %v8076_v4 = vcombine.low %v4743_v62, %v4753_v22  ;;  %v4782_v36 = vshll.u32 %v11659_v37, 16  ;;  %v4781_v48 = vrot.slane %v4779_v14, 4  ;;  %v9565_v55 = vld [vmem:[#allocation3 + $0x88] sm:$0xff]  }
 0x248   : > { %9129 = vmatprep.subr.bf16.mxu0 %v9560_v16  ;;  %v4798_v30 = vshll.u32 %v11666_v26, 16  ;;  %v4772_v31 = vrot.slane %v4771_v21, 4  ;;  %v4790_v11 = vrot.slane %v4788_v10, 5  ;;  %v4794_v0 = vrot.slane %v4792_v24, 4  ;;  %v5188_v62 = vld [vmem:[#allocation2] sm:$0xe] }
 0x249   : > { %v4762_v7 = vrot.slane %v4761_v15, 4  ;;  %9050 = vmatmul.mubr.bf16.gmra.mxu1 %v8076_v4  ;;  %v4784_v40 = vrot.slane %v4782_v36, 5  ;;  %v8103_v21 = vrot.slane %v5188_v62, 9  ;;  %v5214_v22 = vrot.slane %v11555_v61, 5  ;;  %v5189_v36 = vld [vmem:[#allocation2 + $0xc] sm:$0xe] }
 0x24a   : > { %9082 = vmatmul.mubr.bf16.gmra.mxu0 %v8092_v35  ;;  %9098 = vmatpush3.bf16.msra.mxu1 %v9559_v3  ;;  %v8094_v3 = vcombine.low %v11659_v37, %v11663_v52  ;;  %v9566_v35 = vld [vmem:[#allocation3 + $0xc8] sm:$0xff]   ;;  %v4777_v56 = vsel %vm9983_vm2, %v4772_v31, %v4776_v41  ;;  %v4795_v14 = vor.u32 %v4794_v0, %v4790_v11  ;;  %v4800_v4 = vrot.slane %v4798_v30, 5  ;;  %v9567_v37 = vld [vmem:[#allocation3 + $0x80] sm:$0xff]   ;;  %v9569_v61 = vld [vmem:[#allocation2 + $0xc] sm:$0xff]  }
 0x24b   : > { %9130 = vmatpush3.bf16.msra.mxu0 %v9560_v16  ;;  %9099 = vmatprep.subr.bf16.mxu1 %v9561_v18  ;;  %v4767_v57 = vsel %vm9983_vm2, %v4762_v7, %v4766_v12  ;;  %v4785_v16 = vor.u32 %v4784_v40, %v4781_v48  ;;  %v5228_v12 = vrot.slane %v11586_v46, 5  ;;  %v9568_v7 = vld [vmem:[#allocation3 + $0xc0] sm:$0xff]   ;;  %v5215_v41 = vsel %vm10210_vm5, %v8103_v21, %v5214_v22  ;;  %v9571_v30 = vld [vmem:[#allocation3 + $0x138] sm:$0xff]  }
 0x24c   : > { %9131 = vmatprep.subr.bf16.mxu0 %v9562_v17  ;;  %9085 = vmatprep.mubr.bf16.mxu0 %v8093_v2  ;;  %v8077_v15 = vcombine.low %v4767_v57, %v4777_v56  ;;  %v5216_v2 = vrot.slane %v5214_v22, 4  ;;  %v4796_v48 = vrot.slane %v4795_v14, 4  ;;  %v9572_v57 = vld [vmem:[#allocation3 + $0x178] sm:$0xff]   ;;  %v9570_v56 = vld [vmem:[#allocation2 + $0x18] sm:$0xff]   ;;  %v9575_v22 = vld [vmem:[#allocation2 + $0x24] sm:$0xff]  }
 0x24d   : > { %v4786_v10 = vrot.slane %v4785_v16, 4  ;;  %v5230_v0 = vrot.slane %v5228_v12, 4  ;;  %v9573_v14 = vld [vmem:[#allocation3 + $0x130] sm:$0xff]  }
 0x24e   : > { %9100 = vmatpush3.bf16.msra.mxu1 %v9561_v18  ;;  %9053 = vmatprep.mubr.bf16.mxu1 %v8077_v15  ;;  %v5218_v46 = vsel %vm10210_vm5, %v5216_v2, %v5217_v1  ;;  %v4801_v31 = vsel %vm9983_vm2, %v4796_v48, %v4800_v4  ;;  %v5190_v1 = vld [vmem:[#allocation2 + $0x18] sm:$0xe]  ;;  %v9577_v48 = vld [vmem:[#allocation3 + $0x128] sm:$0xff]  }
 0x24f   : > { %9132 = vmatpush3.bf16.msra.mxu0 %v9562_v17  ;;  %9101 = vmatprep.subr.bf16.mxu1 %v9565_v55  ;;  %v4791_v18 = vsel %vm9983_vm2, %v4786_v10, %v4790_v11  ;;  %v8104_v17 = vrot.slane %v5189_v36, 9  ;;  %v8111_v40 = vcombine.low %v5215_v41, %v5218_v46  ;;  %v5231_v11 = vrot.slane %v11588_v39, 5  ;;  %v9576_v41 = vld [vmem:[#allocation2 + $0x30] sm:$0xff]  }
 0x250   : > { %9133 = vmatprep.subr.bf16.mxu0 %v9566_v35  ;;  %v8078_v62 = vcombine.low %v4791_v18, %v4801_v31  ;;  %v8105_v16 = vrot.slane %v5190_v1, 9  ;;  %v5245_v36 = vrot.slane %v11624_v38, 5  ;;  %v9580_v18 = vld [vmem:[#allocation3 + $0x160] sm:$0xff]   ;;  %v5256_v46 = vrot.slane %v11653_v59, 5  ;;  %v5194_v1 = vld [vmem:[#allocation2 + $0x48] sm:$0xe] }
 0x251   : > { %v5232_v34 = vsel %vm10210_vm5, %v5230_v0, %v5231_v11  ;;  %v5259_v0 = vrot.slane %v11657_v23, 5 }
 0x252   : > { %9086 = vmatmul.mubr.bf16.gmra.mxu0 %v8094_v3  ;;  %9102 = vmatpush3.bf16.msra.mxu1 %v9565_v55  ;;  %v5225_v55 = vsel %vm10210_vm5, %v11578_v20, %v5224_v25  ;;  %v12320_v3 = vrot.slane %v11565_v45, 5  ;;  %v5229_v21 = vsel %vm10210_vm5, %v8105_v16, %v5228_v12  ;;  %v5242_v20 = vrot.slane %v11622_v27, 5  ;;  %v9578_v27 = vld [vmem:[#allocation3 + $0x168] sm:$0xff]  }
 0x253   : > { %9134 = vmatpush3.bf16.msra.mxu0 %v9566_v35  ;;  %9103 = vmatprep.subr.bf16.mxu1 %v9567_v37  ;;  %v5191_v35 = vld [vmem:[#allocation2 + $0x24] sm:$0xe]  ;;  %v5237_v25 = vrot.slane %v5235_v5, 4  ;;  %v5238_v45 = vrot.slane %v11603_v29, 5  ;;  %v8113_v10 = vcombine.low %v5229_v21, %v5232_v34  ;;  %v5249_v12 = vrot.slane %v11633_v13, 5  ;;  %v9581_v13 = vld [vmem:[#allocation2 + $0x3c] sm:$0xff]  }
 0x254   : > { %9135 = vmatprep.subr.bf16.mxu0 %v9568_v7  ;;  %9137 = vmatprep.mubr.bf16.mxu0 %v9569_v61  ;;  %v5222_v39 = vsel %vm10210_vm5, %v8104_v17, %v12320_v3  ;;  %v8106_v4 = vrot.slane %v5191_v35, 9  ;;  %v5193_v29 = vld [vmem:[#allocation2 + $0x3c] sm:$0xe]  ;;  %v5258_v11 = vrot.slane %v5256_v46, 4  ;;  %v8109_v16 = vrot.slane %v5194_v1, 9  ;;  %v9584_v3 = vld [vmem:[#allocation3 + $0x158] sm:$0xff]  }
 0x255   : > { %9054 = vmatmul.mubr.bf16.gmra.mxu1 %v8078_v62  ;;  %v8112_v15 = vcombine.low %v5222_v39, %v5225_v55  ;;  %v5239_v61 = vsel %vm10210_vm5, %v5237_v25, %v5238_v45  ;;  %v5195_v55 = vld [vmem:[#allocation2 + $0x54] sm:$0xe] }
 0x256   : > { %9104 = vmatpush3.bf16.msra.mxu1 %v9567_v37  ;;  %9105 = vmatprep.mubr.bf16.mxu1 %v8111_v40  ;;  %v5244_v37 = vrot.slane %v5242_v20, 4  ;;  %v5236_v38 = vsel %vm10210_vm5, %v8106_v4, %v5235_v5  ;;  %v5252_v40 = vrot.slane %v11639_v50, 5  ;;  %v5263_v5 = vrot.slane %v11663_v52, 5  ;;  %v9582_v50 = vld [vmem:[#allocation2 + $0x48] sm:$0xff]   ;;  %v9583_v21 = vld [vmem:[#allocation3 + $0x118] sm:$0xff]  }
 0x257   : > { %9136 = vmatpush3.bf16.msra.mxu0 %v9568_v7  ;;  %9153 = vmatprep.subr.bf16.mxu1 %v9571_v30  ;;  %v5192_v7 = vld [vmem:[#allocation2 + $0x30] sm:$0xe]  ;;  %v8114_v62 = vcombine.low %v5236_v38, %v5239_v61  ;;  %v5266_v52 = vrot.slane %v11666_v26, 5  ;;  %v5257_v34 = vsel %vm10210_vm5, %v8109_v16, %v5256_v46  ;;  %v9587_v25 = vld [vmem:[#allocation2 + $0x54] sm:$0xff]  }
 0x258   : > { %9185 = vmatprep.subr.bf16.mxu0 %v9572_v57  ;;  %v8107_v2 = vrot.slane %v5192_v7, 9  ;;  %v5246_v31 = vsel %vm10210_vm5, %v5244_v37, %v5245_v36  ;;  %v5265_v39 = vrot.slane %v5263_v5, 4  ;;  %v5719_v36 = vld [vmem:[#allocation2 + $0xc] sm:$0xf]  ;;  %v5721_v37 = vld [vmem:[#allocation2 + $0x14] sm:$0x1] }
 0x259   : > { %v5744_v7 = vshrl.u32 %v5719_v36, 16 }
 0x25a   : > { %9138 = vmatmul.mubr.bf16.vlgmr.msra.gmra.mxu0 %v9570_v56  ;;  %v5243_v17 = vsel %vm10210_vm5, %v8107_v2, %v5242_v20  ;;  %v9579_v56 = vld [vmem:[#allocation3 + $0x120] sm:$0xff]   ;;  %v9586_v20 = vld [vmem:[#allocation3 + $0x150] sm:$0xff]   ;;  %v11742_v4 = vsel %vm10210_vm5, %v5265_v39, %v5266_v52 }
 0x25b   : > { %9186 = vmatpush3.bf16.msra.mxu0 %v9572_v57  ;;  %9141 = vmatprep.mubr.bf16.mxu0 %v9575_v22  ;;  %v8108_v57 = vrot.slane %v5193_v29, 9  ;;  %v8115_v59 = vcombine.low %v5243_v17, %v5246_v31  ;;  %v5260_v22 = vsel %vm10210_vm5, %v5258_v11, %v5259_v0  ;;  %v5763_v29 = vshll.u32 %v5721_v37, 16 }
 0x25c   : > { %9187 = vmatprep.subr.bf16.mxu0 %v9574_v43  ;;  %v8117_v26 = vcombine.low %v5257_v34, %v5260_v22  ;;  %v5746_v46 = vrot.slane %v5744_v7, 4 }
 0x25d   : > { %9106 = vmatmul.mubr.bf16.vlgmr.msra.gmra.mxu1 %v8112_v15  ;;  %v5250_v35 = vsel %vm10210_vm5, %v8108_v57, %v5249_v12  ;;  %v9585_v15 = vld [vmem:[#allocation3 + $0x110] sm:$0xff]   ;;  %v9588_v57 = vld [vmem:[#allocation2 + $0x60] sm:$0xff]   ;;  %v5765_v0 = vrot.slane %v5763_v29, 5 }
 0x25e   : > { %9154 = vmatpush3.bf16.msra.mxu1 %v9571_v30  ;;  %9109 = vmatprep.mubr.bf16.mxu1 %v8113_v10  ;;  %v5251_v30 = vrot.slane %v5249_v12, 4  ;;  %v5720_v10 = vld [vmem:[#allocation2 + $0x10] sm:$0xf]  ;;  %v9590_v12 = vld [vmem:[#allocation3 + $0x148] sm:$0xff]  }
 0x25f   : > { %9155 = vmatprep.subr.bf16.mxu1 %v9573_v14  ;;  %9188 = vmatpush3.bf16.msra.mxu0 %v9574_v43  ;;  %v8110_v43 = vrot.slane %v5195_v55, 9  ;;  %v5757_v2 = vshrl.u32 %v5720_v10, 16  ;;  %v6178_v61 = vrot.slane %v5720_v10, 5 }
 0x260   : > { %9189 = vmatprep.subr.bf16.mxu0 %v9578_v27  ;;  %v5253_v23 = vsel %vm10210_vm5, %v5251_v30, %v5252_v40  ;;  %v5723_v40 = vld [vmem:[#allocation2 + $0x1c] sm:$0xf] }
 0x261   : > { %v8116_v45 = vcombine.low %v5250_v35, %v5253_v23  ;;  %v5759_v30 = vrot.slane %v5757_v2, 4  ;;  %v6180_v11 = vrot.slane %v6178_v61, 4  ;;  %v5777_v55 = vshll.u32 %v5723_v40, 16  ;;  %v9592_v35 = vld [vmem:[#allocation3 + $0x140] sm:$0xff]   ;;  %v9594_v2 = vld [vmem:[#allocation3 + $0x1f8] sm:$0xff]  }
 0x262   : > { %9156 = vmatpush3.bf16.msra.mxu1 %v9573_v14  ;;  %9142 = vmatmul.mubr.bf16.gmra.mxu0 %v9576_v41  ;;  %v11738_v14 = vsel %vm10210_vm5, %v8110_v43, %v5263_v5  ;;  %v5747_v41 = vshll.u32 %v5719_v36, 16  ;;  %v5724_v5 = vld [vmem:[#allocation2 + $0x20] sm:$0x1]  ;;  %v5781_v43 = vshrl.u32 %v5723_v40, 16 }
 0x263   : > { %9157 = vmatprep.subr.bf16.mxu1 %v9577_v48  ;;  %9190 = vmatpush3.bf16.msra.mxu0 %v9578_v27  ;;  %v5753_v27 = vshll.u32 %v5720_v10, 16  ;;  %v5787_v52 = vshll.u32 %v5724_v5, 16  ;;  %v5779_v36 = vrot.slane %v5777_v55, 5  ;;  %v5728_v55 = vld [vmem:[#allocation2 + $0x30] sm:$0xf] }
 0x264   : > { %9191 = vmatprep.subr.bf16.mxu0 %v9580_v18  ;;  %9145 = vmatprep.mubr.bf16.mxu0 %v9581_v13  ;;  %v5722_v13 = vld [vmem:[#allocation2 + $0x18] sm:$0xf]  ;;  %v5749_v17 = vrot.slane %v5747_v41, 5  ;;  %v5783_v10 = vrot.slane %v5781_v43, 4 }
 0x265   : > { %9110 = vmatmul.mubr.bf16.gmra.mxu1 %v8114_v62  ;;  %v5755_v31 = vrot.slane %v5753_v27, 5  ;;  %v5771_v16 = vshll.u32 %v5722_v13, 16  ;;  %v6185_v27 = vrot.slane %v5723_v40, 5 }
 0x266   : > { %9158 = vmatpush3.bf16.msra.mxu1 %v9577_v48  ;;  %9113 = vmatprep.mubr.bf16.mxu1 %v8115_v59  ;;  %v6144_v48 = vld [vmem:[#allocation2 + $0xc] sm:$0xe]  ;;  %v5768_v59 = vshrl.u32 %v5722_v13, 16  ;;  %v5750_v1 = vor.u32 %v5749_v17, %v5746_v46  ;;  %v5784_v29 = vor.u32 %v5783_v10, %v5779_v36  ;;  %v5726_v13 = vld [vmem:[#allocation2 + $0x28] sm:$0xf] }
 0x267   : > { %9159 = vmatprep.subr.bf16.mxu1 %v9579_v56  ;;  %9192 = vmatpush3.bf16.msra.mxu0 %v9580_v18  ;;  %v8159_v38 = vrot.slane %v6144_v48, 9  ;;  %v6181_v18 = vrot.slane %v5721_v37, 5  ;;  %v5727_v17 = vld [vmem:[#allocation2 + $0x2c] sm:$0x1]  ;;  %v5801_v40 = vshll.u32 %v5726_v13, 16 }
 0x268   : > { %9193 = vmatprep.subr.bf16.mxu0 %v9584_v3  ;;  %v5770_v23 = vrot.slane %v5768_v59, 4  ;;  %v5751_v34 = vrot.slane %v5750_v1, 4  ;;  %v5785_v46 = vrot.slane %v5784_v29, 4 }
 0x269   : > { %v6179_v62 = vsel %vm10210_vm5, %v8159_v38, %v6178_v61  ;;  %v6182_v39 = vsel %vm10210_vm5, %v6180_v11, %v6181_v18  ;;  %v6187_v61 = vrot.slane %v6185_v27, 4  ;;  %v5725_v18 = vld [vmem:[#allocation2 + $0x24] sm:$0xf]  ;;  %v5811_v11 = vshll.u32 %v5727_v17, 16 }
 0x26a   : > { %9160 = vmatpush3.bf16.msra.mxu1 %v9579_v56  ;;  %9146 = vmatmul.mubr.bf16.gmra.mxu0 %v9582_v50  ;;  %v5760_v56 = vor.u32 %v5759_v30, %v5755_v31  ;;  %v6145_v50 = vld [vmem:[#allocation2 + $0x18] sm:$0xe]  ;;  %v5756_v37 = vsel %vm9983_vm2, %v5751_v34, %v5755_v31  ;;  %v5792_v31 = vshrl.u32 %v5725_v18, 16  ;;  %v5795_v30 = vshll.u32 %v5725_v18, 16  ;;  %v11764_v34 = vld [vmem:[#allocation2 + $0x38] sm:$0x1] }
 0x26b   : > { %9161 = vmatprep.subr.bf16.mxu1 %v9583_v21  ;;  %9194 = vmatpush3.bf16.msra.mxu0 %v9584_v3  ;;  %v9589_v3 = vld [vmem:[#allocation3 + $0x108] sm:$0xff]  }
 0x26c   : > { %9195 = vmatprep.subr.bf16.mxu0 %v9586_v20  ;;  %9149 = vmatprep.mubr.bf16.mxu0 %v9587_v25  ;;  %v5761_v22 = vrot.slane %v5760_v56, 4  ;;  %v5773_v25 = vrot.slane %v5771_v16, 5  ;;  %v5794_v56 = vrot.slane %v5792_v31, 4  ;;  %v5797_v16 = vrot.slane %v5795_v30, 5 }
 0x26d   : > { %9114 = vmatmul.mubr.bf16.gmra.mxu1 %v8116_v45  ;;  %v8118_v45 = vcombine.low %v11738_v14, %v11742_v4  ;;  %v5789_v14 = vrot.slane %v5787_v52, 5  ;;  %v6188_v4 = vrot.slane %v5724_v5, 5  ;;  %v6146_v5 = vld [vmem:[#allocation2 + $0x24] sm:$0xe]  ;;  %v5813_v52 = vrot.slane %v5811_v11, 5 }
 0x26e   : > { %9162 = vmatpush3.bf16.msra.mxu1 %v9583_v21  ;;  %9117 = vmatprep.mubr.bf16.mxu1 %v8117_v26  ;;  %v8167_v21 = vcombine.low %v6179_v62, %v6182_v39  ;;  %v9591_v26 = vld [vmem:[#allocation3 + $0x100] sm:$0xff]   ;;  %v5766_v7 = vsel %vm9983_vm2, %v5761_v22, %v5765_v0  ;;  %v5774_v41 = vor.u32 %v5773_v25, %v5770_v23  ;;  %v9593_v0 = vld [vmem:[#allocation3 + $0x1b8] sm:$0xff]   ;;  %v5805_v62 = vshrl.u32 %v5726_v13, 16  ;;  %v9596_v39 = vld [vmem:[#allocation3 + $0x1f0] sm:$0xff]  }
 0x26f   : > { %9163 = vmatprep.subr.bf16.mxu1 %v9585_v15  ;;  %9196 = vmatpush3.bf16.msra.mxu0 %v9586_v20  ;;  %v8160_v20 = vrot.slane %v6145_v50, 9  ;;  %v8143_v48 = vcombine.low %v5756_v37, %v5766_v7  ;;  %v5790_v59 = vsel %vm9983_vm2, %v5785_v46, %v5789_v14  ;;  %v11762_v50 = vld [vmem:[#allocation2 + $0x34] sm:$0xf]  ;;  %v5803_v23 = vrot.slane %v5801_v40, 5  ;;  %v9598_v14 = vld [vmem:[#allocation3 + $0x1e8] sm:$0xff]  }
 0x270   : > { %9197 = vmatprep.subr.bf16.mxu0 %v9590_v12  ;;  %v5775_v38 = vrot.slane %v5774_v41, 4  ;;  %v5807_v43 = vrot.slane %v5805_v62, 4  ;;  %v5798_v22 = vor.u32 %v5797_v16, %v5794_v56  ;;  %v6195_v25 = vrot.slane %v5727_v17, 5  ;;  %v9597_v46 = vld [vmem:[#allocation3 + $0x1a8] sm:$0xff]  }
 0x271   : > { %v5819_v37 = vshll.u32 %v5728_v55, 16  ;;  %v5825_v7 = vshll.u32 %v11762_v50, 16  ;;  %v5829_v29 = vshrl.u32 %v11762_v50, 16  ;;  %v5733_v16 = vld [vmem:[#allocation2 + $0x44] sm:$0x1] }
 0x272   : > { %9164 = vmatpush3.bf16.msra.mxu1 %v9585_v15  ;;  %9150 = vmatmul.mubr.bf16.gmra.mxu0 %v9588_v57  ;;  %v6186_v15 = vsel %vm10210_vm5, %v8160_v20, %v6185_v27  ;;  %v6189_v57 = vsel %vm10210_vm5, %v6187_v61, %v6188_v4  ;;  %v5808_v10 = vor.u32 %v5807_v43, %v5803_v23  ;;  %v5816_v20 = vshrl.u32 %v5728_v55, 16 }
 0x273   : > { %9165 = vmatprep.subr.bf16.mxu1 %v9589_v3  ;;  %9198 = vmatpush3.bf16.msra.mxu0 %v9590_v12  ;;  %v5780_v12 = vsel %vm9983_vm2, %v5775_v38, %v5779_v36  ;;  %v8168_v1 = vcombine.low %v6186_v15, %v6189_v57  ;;  %v9595_v36 = vld [vmem:[#allocation3 + $0x1b0] sm:$0xff]   ;;  %v5799_v41 = vrot.slane %v5798_v22, 4  ;;  %v5821_v38 = vrot.slane %v5819_v37, 5  ;;  %v9599_v22 = vld [vmem:[#allocation3 + $0x1a0] sm:$0xff]  }
 0x274   : > { %9199 = vmatprep.subr.bf16.mxu0 %v9592_v35  ;;  %9201 = vmatprep.mubr.bf16.mxu0 %v8167_v21  ;;  %v8161_v21 = vrot.slane %v6146_v5, 9  ;;  %v5809_v4 = vrot.slane %v5808_v10, 4  ;;  %v5827_v15 = vrot.slane %v5825_v7, 5  ;;  %v5831_v18 = vrot.slane %v5829_v29, 4  ;;  %v5734_v7 = vld [vmem:[#allocation2 + $0x48] sm:$0xf] }
 0x275   : > { %9118 = vmatmul.mubr.bf16.gmra.mxu1 %v8118_v45  ;;  %v6147_v45 = vld [vmem:[#allocation2 + $0x30] sm:$0xe]  ;;  %v5804_v61 = vsel %vm9983_vm2, %v5799_v41, %v5803_v23  ;;  %v6199_v5 = vrot.slane %v11762_v50, 5  ;;  %v5859_v37 = vshll.u32 %v5733_v16, 16 }
 0x276   : > { %9166 = vmatpush3.bf16.msra.mxu1 %v9589_v3  ;;  %9169 = vmatprep.mubr.bf16.mxu1 %v8143_v48  ;;  %v8144_v3 = vcombine.low %v5780_v12, %v5790_v59  ;;  %v5814_v17 = vsel %vm9983_vm2, %v5809_v4, %v5813_v52  ;;  %v8162_v40 = vrot.slane %v6147_v45, 9  ;;  %v9600_v12 = vld [vmem:[#allocation3 + $0x1e0] sm:$0xff]   ;;  %v5832_v62 = vor.u32 %v5831_v18, %v5827_v15  ;;  %v11787_v4 = vld [vmem:[#allocation2 + $0x50] sm:$0x1]  ;;  %v6149_v18 = vld [vmem:[#allocation2 + $0x48] sm:$0xe] }
 0x277   : > { %9167 = vmatprep.subr.bf16.mxu1 %v9591_v26  ;;  %9200 = vmatpush3.bf16.msra.mxu0 %v9592_v35  ;;  %v6192_v35 = vrot.slane %v5726_v13, 5  ;;  %v5835_v13 = vshll.u32 %v11764_v34, 16  ;;  %v8145_v57 = vcombine.low %v5804_v61, %v5814_v17  ;;  %v5731_v59 = vld [vmem:[#allocation2 + $0x3c] sm:$0xf]  ;;  %v6201_v43 = vrot.slane %v6199_v5, 4 }
 0x278   : > { %9249 = vmatprep.subr.bf16.mxu0 %v9594_v2  ;;  %v5840_v55 = vshrl.u32 %v5731_v59, 16  ;;  %v5833_v23 = vrot.slane %v5832_v62, 4  ;;  %v5864_v17 = vshrl.u32 %v5734_v7, 16 }
 0x279   : > { %v6193_v27 = vsel %vm10210_vm5, %v8161_v21, %v6192_v35  ;;  %v6194_v48 = vrot.slane %v6192_v35, 4  ;;  %v5837_v11 = vrot.slane %v5835_v13, 5 }
 0x27a   : > { %9168 = vmatpush3.bf16.msra.mxu1 %v9591_v26  ;;  %9202 = vmatmul.mubr.bf16.vlgmr.msra.gmra.mxu0 %v8168_v1  ;;  %v5818_v26 = vrot.slane %v5816_v20, 4  ;;  %v5732_v1 = vld [vmem:[#allocation2 + $0x40] sm:$0xf]  ;;  %v5842_v21 = vrot.slane %v5840_v55, 4  ;;  %v9604_v55 = vld [vmem:[#allocation3 + $0x1d0] sm:$0xff]  }
 0x27b   : > { %9217 = vmatprep.subr.bf16.mxu1 %v9593_v0  ;;  %9250 = vmatpush3.bf16.msra.mxu0 %v9594_v2  ;;  %v6196_v2 = vsel %vm10210_vm5, %v6194_v48, %v6195_v25  ;;  %v5849_v52 = vshll.u32 %v5732_v1, 16  ;;  %v5853_v25 = vshrl.u32 %v5732_v1, 16  ;;  %v5838_v45 = vsel %vm9983_vm2, %v5833_v23, %v5837_v11 }
 0x27c   : > { %9251 = vmatprep.subr.bf16.mxu0 %v9596_v39  ;;  %v8169_v31 = vcombine.low %v6193_v27, %v6196_v2  ;;  %v5822_v30 = vor.u32 %v5821_v38, %v5818_v26  ;;  %v9602_v26 = vld [vmem:[#allocation3 + $0x1d8] sm:$0xff]   ;;  %v5861_v38 = vrot.slane %v5859_v37, 5  ;;  %v6206_v61 = vrot.slane %v5732_v1, 5 }
 0x27d   : > { %9170 = vmatmul.mubr.bf16.vlgmr.msra.gmra.mxu1 %v8144_v3  ;;  %v5843_v3 = vshll.u32 %v5731_v59, 16  ;;  %v5851_v20 = vrot.slane %v5849_v52, 5  ;;  %v5855_v29 = vrot.slane %v5853_v25, 4  ;;  %v6209_v2 = vrot.slane %v5733_v16, 5  ;;  %v9603_v52 = vld [vmem:[#allocation3 + $0x190] sm:$0xff]  }
 0x27e   : > { %9218 = vmatpush3.bf16.msra.mxu1 %v9593_v0  ;;  %9205 = vmatprep.mubr.bf16.mxu0 %v8169_v31  ;;  %v5823_v56 = vrot.slane %v5822_v30, 4  ;;  %v6202_v0 = vrot.slane %v11764_v34, 5  ;;  %v6148_v34 = vld [vmem:[#allocation2 + $0x3c] sm:$0xe]  ;;  %v5867_v31 = vshll.u32 %v5734_v7, 16  ;;  %v5866_v59 = vrot.slane %v5864_v17, 4 }
 0x27f   : > { %9219 = vmatprep.subr.bf16.mxu1 %v9595_v36  ;;  %9252 = vmatpush3.bf16.msra.mxu0 %v9596_v39  ;;  %v6200_v39 = vsel %vm10210_vm5, %v8162_v40, %v6199_v5  ;;  %v5845_v35 = vrot.slane %v5843_v3, 5  ;;  %v5856_v13 = vor.u32 %v5855_v29, %v5851_v20  ;;  %v6208_v40 = vrot.slane %v6206_v61, 4  ;;  %v5739_v7 = vld [vmem:[#allocation2 + $0x5c] sm:$0x1] }
 0x280   : > { %9253 = vmatprep.subr.bf16.mxu0 %v9598_v14  ;;  %9173 = vmatprep.mubr.bf16.mxu1 %v8145_v57  ;;  %v5828_v50 = vsel %vm9983_vm2, %v5823_v56, %v5827_v15  ;;  %v6203_v10 = vsel %vm10210_vm5, %v6201_v43, %v6202_v0  ;;  %v8163_v15 = vrot.slane %v6148_v34, 9  ;;  %v5869_v1 = vrot.slane %v5867_v31, 5  ;;  %v9601_v56 = vld [vmem:[#allocation3 + $0x198] sm:$0xff]   ;;  %v5740_v31 = vld [vmem:[#allocation2 + $0x60] sm:$0xf] }
 0x281   : > { %v8146_v41 = vcombine.low %v5828_v50, %v5838_v45  ;;  %v8170_v27 = vcombine.low %v6200_v39, %v6203_v10  ;;  %v5846_v48 = vor.u32 %v5845_v35, %v5842_v21  ;;  %v5857_v5 = vrot.slane %v5856_v13, 4  ;;  %v9606_v50 = vld [vmem:[#allocation3 + $0x1c8] sm:$0xff]   ;;  %v5737_v45 = vld [vmem:[#allocation2 + $0x54] sm:$0xf]  ;;  %v5738_v10 = vld [vmem:[#allocation2 + $0x58] sm:$0xf] }
 0x282   : > { %9220 = vmatpush3.bf16.msra.mxu1 %v9595_v36  ;;  %v5735_v36 = vld [vmem:[#allocation2 + $0x4c] sm:$0xf]  ;;  %v6207_v30 = vsel %vm10210_vm5, %v8163_v15, %v6206_v61  ;;  %v6210_v0 = vsel %vm10210_vm5, %v6208_v40, %v6209_v2  ;;  %v5883_v16 = vshll.u32 %v11787_v4, 16  ;;  %v5870_v39 = vor.u32 %v5869_v1, %v5866_v59  ;;  %v6150_v2 = vld [vmem:[#allocation2 + $0x54] sm:$0xe]  ;;  %v9608_v59 = vld [vmem:[#allocation3 + $0x1c0] sm:$0xff]  }
 0x283   : > { %9221 = vmatprep.subr.bf16.mxu1 %v9597_v46  ;;  %9254 = vmatpush3.bf16.msra.mxu0 %v9598_v14  ;;  %v5847_v14 = vrot.slane %v5846_v48, 4  ;;  %v5873_v57 = vshll.u32 %v5735_v36, 16  ;;  %v5877_v62 = vshrl.u32 %v5735_v36, 16  ;;  %v5862_v3 = vsel %vm9983_vm2, %v5857_v5, %v5861_v38  ;;  %v11807_v5 = vld [vmem:[#allocation2 + $0x68] sm:$0x1] }
 0x284   : > { %9255 = vmatprep.subr.bf16.mxu0 %v9600_v12  ;;  %9206 = vmatmul.mubr.bf16.gmra.mxu0 %v8170_v27  ;;  %v8171_v23 = vcombine.low %v6207_v30, %v6210_v0  ;;  %v8164_v43 = vrot.slane %v6149_v18, 9  ;;  %v5885_v25 = vrot.slane %v5883_v16, 5  ;;  %v6213_v34 = vrot.slane %v5735_v36, 5  ;;  %v5741_v30 = vld [vmem:[#allocation2 + $0x64] sm:$0xf] }
 0x285   : > { %9174 = vmatmul.mubr.bf16.gmra.mxu1 %v8146_v41  ;;  %v5852_v11 = vsel %vm9983_vm2, %v5847_v14, %v5851_v20  ;;  %v5871_v20 = vrot.slane %v5870_v39, 4  ;;  %v6216_v37 = vrot.slane %v11787_v4, 5  ;;  %v5888_v41 = vshrl.u32 %v5737_v45, 16  ;;  %v9605_v4 = vld [vmem:[#allocation3 + $0x188] sm:$0xff]  }
 0x286   : > { %9222 = vmatpush3.bf16.msra.mxu1 %v9597_v46  ;;  %v5875_v46 = vrot.slane %v5873_v57, 5  ;;  %v8147_v21 = vcombine.low %v5852_v11, %v5862_v3  ;;  %9209 = vmatprep.mubr.bf16.mxu0 %v8171_v23  ;;  %v5891_v27 = vshll.u32 %v5737_v45, 16  ;;  %v6215_v29 = vrot.slane %v6213_v34, 4  ;;  %v6151_v16 = vld [vmem:[#allocation2 + $0x60] sm:$0xe] }
 0x287   : > { %9256 = vmatpush3.bf16.msra.mxu0 %v9600_v12  ;;  %9223 = vmatprep.subr.bf16.mxu1 %v9599_v22  ;;  %v5879_v12 = vrot.slane %v5877_v62, 4  ;;  %v5897_v38 = vshll.u32 %v5738_v10, 16  ;;  %v5901_v61 = vshrl.u32 %v5738_v10, 16  ;;  %v5907_v17 = vshll.u32 %v5739_v7, 16 }
 0x288   : > { %9257 = vmatprep.subr.bf16.mxu0 %v9602_v26  ;;  %9177 = vmatprep.mubr.bf16.mxu1 %v8147_v21  ;;  %v5876_v36 = vsel %vm9983_vm2, %v5871_v20, %v5875_v46  ;;  %v5893_v15 = vrot.slane %v5891_v27, 5  ;;  %v6217_v14 = vsel %vm10210_vm5, %v6215_v29, %v6216_v37  ;;  %v8165_v0 = vrot.slane %v6150_v2, 9  ;;  %v9607_v20 = vld [vmem:[#allocation3 + $0x180] sm:$0xff]   ;;  %v11816_v27 = vld [vmem:[#allocation3 + $0x238] sm:$0xff]  }
 0x289   : > { %v5880_v35 = vor.u32 %v5879_v12, %v5875_v46  ;;  %v5899_v13 = vrot.slane %v5897_v38, 5  ;;  %v5903_v11 = vrot.slane %v5901_v61, 4  ;;  %v5909_v1 = vrot.slane %v5907_v17, 5 }
 0x28a   : > { %9224 = vmatpush3.bf16.msra.mxu1 %v9599_v22  ;;  %v6214_v22 = vsel %vm10210_vm5, %v8164_v43, %v6213_v34  ;;  %v6220_v46 = vrot.slane %v5738_v10, 5  ;;  %v6223_v12 = vrot.slane %v5739_v7, 5  ;;  %v5912_v3 = vshrl.u32 %v5740_v31, 16 }
 0x28b   : > { %9258 = vmatpush3.bf16.msra.mxu0 %v9602_v26  ;;  %9225 = vmatprep.subr.bf16.mxu1 %v9601_v56  ;;  %v5881_v48 = vrot.slane %v5880_v35, 4  ;;  %v5890_v26 = vrot.slane %v5888_v41, 4  ;;  %v8172_v57 = vcombine.low %v6214_v22, %v6217_v14  ;;  %v5915_v23 = vshll.u32 %v5740_v31, 16  ;;  %v11821_v14 = vld [vmem:[#allocation2 + $0x1c] sm:$0xf] }
 0x28c   : > { %9259 = vmatprep.subr.bf16.mxu0 %v9604_v55  ;;  %v6221_v39 = vsel %vm10210_vm5, %v8165_v0, %v6220_v46  ;;  %v6222_v43 = vrot.slane %v6220_v46, 4  ;;  %v5921_v21 = vshll.u32 %v5741_v30, 16  ;;  %v5925_v35 = vshrl.u32 %v5741_v30, 16 }
 0x28d   : > { %v5886_v18 = vsel %vm9983_vm2, %v5881_v48, %v5885_v25  ;;  %v5894_v62 = vor.u32 %v5893_v15, %v5890_v26  ;;  %9210 = vmatmul.mubr.bf16.gmra.mxu0 %v8172_v57  ;;  %v5914_v45 = vrot.slane %v5912_v3, 4  ;;  %v5917_v10 = vrot.slane %v5915_v23, 5  ;;  %v11837_v23 = vld [vmem:[#allocation2 + $0x28] sm:$0xf] }
 0x28e   : > { %9226 = vmatpush3.bf16.msra.mxu1 %v9601_v56  ;;  %v8148_v40 = vcombine.low %v5876_v36, %v5886_v18  ;;  %v6224_v37 = vsel %vm10210_vm5, %v6222_v43, %v6223_v12  ;;  %v5927_v7 = vrot.slane %v5925_v35, 4  ;;  %v5931_v41 = vshll.u32 %v11807_v5, 16  ;;  %v6683_v18 = vld [vmem:[#allocation2 + $0x18] sm:$0xf]  ;;  %v6686_v12 = vld [vmem:[#allocation2 + $0x24] sm:$0xf] }
 0x28f   : > { %9260 = vmatpush3.bf16.msra.mxu0 %v9604_v55  ;;  %9227 = vmatprep.subr.bf16.mxu1 %v9603_v52  ;;  %v5895_v56 = vrot.slane %v5894_v62, 4  ;;  %v5904_v55 = vor.u32 %v5903_v11, %v5899_v13  ;;  %v8173_v48 = vcombine.low %v6221_v39, %v6224_v37  ;;  %v5918_v22 = vor.u32 %v5917_v10, %v5914_v45  ;;  %v11839_v39 = vld [vmem:[#allocation2 + $0x2c] sm:$0x1] }
 0x290   : > { %9261 = vmatprep.subr.bf16.mxu0 %v9606_v50  ;;  %9178 = vmatmul.mubr.bf16.gmra.mxu1 %v8148_v40  ;;  %v8166_v29 = vrot.slane %v6151_v16, 9  ;;  %v5933_v26 = vrot.slane %v5931_v41, 5  ;;  %v6227_v15 = vrot.slane %v5741_v30, 5  ;;  %v6230_v2 = vrot.slane %v11807_v5, 5  ;;  %v11825_v40 = vld [vmem:[#allocation2 + $0x20] sm:$0x1] }
 0x291   : > { %v5900_v25 = vsel %vm9983_vm2, %v5895_v56, %v5899_v13  ;;  %v5905_v34 = vrot.slane %v5904_v55, 4  ;;  %9213 = vmatprep.mubr.bf16.mxu0 %v8173_v48  ;;  %v5919_v61 = vrot.slane %v5918_v22, 4  ;;  %v6708_v57 = vshrl.u32 %v6683_v18, 16  ;;  %v9609_v30 = vld [vmem:[#allocation2 + $0x18] sm:$0xff]  }
 0x292   : > { %9228 = vmatpush3.bf16.msra.mxu1 %v9603_v52  ;;  %v5923_v52 = vrot.slane %v5921_v21, 5  ;;  %v6228_v17 = vsel %vm10210_vm5, %v8166_v29, %v6227_v15  ;;  %v6229_v31 = vrot.slane %v6227_v15, 4  ;;  %v6711_v62 = vshll.u32 %v6683_v18, 16  ;;  %v11849_v18 = vld [vmem:[#allocation2 + $0x38] sm:$0x1] }
 0x293   : > { %9262 = vmatpush3.bf16.msra.mxu0 %v9606_v50  ;;  %9229 = vmatprep.subr.bf16.mxu1 %v9605_v4  ;;  %v5910_v50 = vsel %vm9983_vm2, %v5905_v34, %v5909_v1  ;;  %v6717_v11 = vshll.u32 %v11821_v14, 16  ;;  %v6721_v5 = vshrl.u32 %v11821_v14, 16  ;;  %v6710_v0 = vrot.slane %v6708_v57, 4 }
 0x294   : > { %9263 = vmatprep.subr.bf16.mxu0 %v9608_v59  ;;  %v8149_v38 = vcombine.low %v5900_v25, %v5910_v50  ;;  %v5928_v36 = vor.u32 %v5927_v7, %v5923_v52  ;;  %v6231_v1 = vsel %vm10210_vm5, %v6229_v31, %v6230_v2  ;;  %v6727_v46 = vshll.u32 %v11825_v40, 16  ;;  %v9610_v50 = vld [vmem:[#allocation2 + $0x24] sm:$0xff]   ;;  %v11847_v2 = vld [vmem:[#allocation2 + $0x34] sm:$0xf] }
 0x295   : > { %v8174_v56 = vcombine.low %v6228_v17, %v6231_v1  ;;  %v6713_v55 = vrot.slane %v6711_v62, 5  ;;  %v6719_v3 = vrot.slane %v6717_v11, 5  ;;  %v6723_v43 = vrot.slane %v6721_v5, 4 }
 0x296   : > { %9230 = vmatpush3.bf16.msra.mxu1 %v9605_v4  ;;  %9181 = vmatprep.mubr.bf16.mxu1 %v8149_v38  ;;  %v5929_v13 = vrot.slane %v5928_v36, 4  ;;  %v5924_v4 = vsel %vm9983_vm2, %v5919_v61, %v5923_v52  ;;  %v6729_v21 = vrot.slane %v6727_v46, 5  ;;  %v6732_v35 = vshrl.u32 %v6686_v12, 16 }
 0x297   : > { %9264 = vmatpush3.bf16.msra.mxu0 %v9608_v59  ;;  %9231 = vmatprep.subr.bf16.mxu1 %v9607_v20  ;;  %v6735_v25 = vshll.u32 %v6686_v12, 16  ;;  %v6714_v34 = vor.u32 %v6713_v55, %v6710_v0  ;;  %v6741_v45 = vshll.u32 %v11837_v23, 16  ;;  %v6745_v10 = vshrl.u32 %v11837_v23, 16  ;;  %v6692_v55 = vld [vmem:[#allocation2 + $0x3c] sm:$0xf] }
 0x298   : > { %9281 = vmatprep.subr.bf16.mxu0 %v11816_v27  ;;  %v5934_v59 = vsel %vm9983_vm2, %v5929_v13, %v5933_v26  ;;  %9214 = vmatmul.mubr.bf16.gmra.mxu0 %v8174_v56  ;;  %v6724_v37 = vor.u32 %v6723_v43, %v6719_v3  ;;  %v6734_v52 = vrot.slane %v6732_v35, 4  ;;  %v6689_v26 = vld [vmem:[#allocation2 + $0x30] sm:$0xf]  ;;  %v6769_v62 = vshrl.u32 %v11847_v2, 16  ;;  %v11862_v35 = vld [vmem:[#allocation2 + $0x44] sm:$0x1] }
 0x299   : > { %v8150_v16 = vcombine.low %v5924_v4, %v5934_v59  ;;  %v6737_v7 = vrot.slane %v6735_v25, 5  ;;  %v6715_v41 = vrot.slane %v6714_v34, 4  ;;  %v6743_v48 = vrot.slane %v6741_v45, 5  ;;  %v9613_v4 = vld [vmem:[#allocation2 + $0x30] sm:$0xff]   ;;  %v9612_v59 = vld [vmem:[#allocation3 + $0x230] sm:$0xff]   ;;  %v11864_v45 = vld [vmem:[#allocation3 + $0x228] sm:$0xff]  }
 0x29a   : > { %9232 = vmatpush3.bf16.msra.mxu1 %v9607_v20  ;;  %v6751_v20 = vshll.u32 %v11839_v39, 16  ;;  %v6747_v22 = vrot.slane %v6745_v10, 4  ;;  %v6725_v29 = vrot.slane %v6724_v37, 4  ;;  %v6756_v13 = vshrl.u32 %v6689_v26, 16 }
 0x29b   : > { %9313 = vmatprep.subr.bf16.mxu1 %v11816_v27  ;;  %9182 = vmatmul.mubr.bf16.gmra.mxu1 %v8150_v16  ;;  %v6738_v38 = vor.u32 %v6737_v7, %v6734_v52  ;;  %v6720_v15 = vsel %vm9983_vm2, %v6715_v41, %v6719_v3  ;;  %v6759_v17 = vshll.u32 %v6689_v26, 16  ;;  %v6771_v16 = vrot.slane %v6769_v62, 4  ;;  %v6695_v62 = vld [vmem:[#allocation2 + $0x48] sm:$0xf] }
 0x29c   : > { %9233 = vmatprep.mubr.bf16.mxu1 %v9609_v30  ;;  %v6753_v36 = vrot.slane %v6751_v20, 5  ;;  %v6748_v61 = vor.u32 %v6747_v22, %v6743_v48  ;;  %v6730_v31 = vsel %vm9983_vm2, %v6725_v29, %v6729_v21  ;;  %v6765_v30 = vshll.u32 %v11847_v2, 16  ;;  %v11860_v21 = vld [vmem:[#allocation2 + $0x40] sm:$0xf] }
 0x29d   : > { %v6739_v57 = vrot.slane %v6738_v38, 4  ;;  %v8199_v11 = vcombine.low %v6720_v15, %v6730_v31  ;;  %v6758_v1 = vrot.slane %v6756_v13, 4  ;;  %v6761_v0 = vrot.slane %v6759_v17, 5  ;;  %v9614_v29 = vld [vmem:[#allocation2 + $0x3c] sm:$0xff]   ;;  %v9617_v17 = vld [vmem:[#allocation2 + $0x48] sm:$0xff]  }
 0x29e   : > { %v6749_v5 = vrot.slane %v6748_v61, 4  ;;  %v6767_v12 = vrot.slane %v6765_v30, 5  ;;  %v6775_v56 = vshll.u32 %v11849_v18, 16  ;;  %v6780_v25 = vshrl.u32 %v6692_v55, 16  ;;  %v11877_v30 = vld [vmem:[#allocation3 + $0x220] sm:$0xff]  }
 0x29f   : > { %v6744_v46 = vsel %vm9983_vm2, %v6739_v57, %v6743_v48  ;;  %9265 = vmatprep.mubr.bf16.mxu0 %v8199_v11  ;;  %v6762_v43 = vor.u32 %v6761_v0, %v6758_v1  ;;  %v6783_v34 = vshll.u32 %v6692_v55, 16  ;;  %v6789_v52 = vshll.u32 %v11860_v21, 16  ;;  %v11879_v11 = vld [vmem:[#allocation2 + $0x4c] sm:$0xf]  ;;  %v11882_v0 = vld [vmem:[#allocation2 + $0x50] sm:$0x1] }
 0x2a0   : > { %v6754_v3 = vsel %vm9983_vm2, %v6749_v5, %v6753_v36  ;;  %v6772_v20 = vor.u32 %v6771_v16, %v6767_v12  ;;  %v6777_v37 = vrot.slane %v6775_v56, 5  ;;  %v6782_v41 = vrot.slane %v6780_v25, 4 }
 0x2a1   : > { %v8200_v10 = vcombine.low %v6744_v46, %v6754_v3  ;;  %v6763_v7 = vrot.slane %v6762_v43, 4  ;;  %v6793_v48 = vshrl.u32 %v11860_v21, 16  ;;  %v6791_v38 = vrot.slane %v6789_v52, 5 }
 0x2a2   : > { %v6773_v22 = vrot.slane %v6772_v20, 4  ;;  %v6799_v36 = vshll.u32 %v11862_v35, 16  ;;  %v7163_v26 = vrot.slane %v11860_v21, 5  ;;  %v6804_v46 = vshrl.u32 %v6695_v62, 16 }
 0x2a3   : > { %9234 = vmatmul.mubr.bf16.vlgmr.msra.gmra.mxu1 %v9610_v50  ;;  %v6785_v50 = vrot.slane %v6783_v34, 5  ;;  %9266 = vmatmul.mubr.bf16.vlgmr.msra.gmra.mxu0 %v8200_v10  ;;  %v6768_v15 = vsel %vm9983_vm2, %v6763_v7, %v6767_v12  ;;  %v6795_v13 = vrot.slane %v6793_v48, 4  ;;  %v6807_v16 = vshll.u32 %v6695_v62, 16  ;;  %v6698_v10 = vld [vmem:[#allocation2 + $0x54] sm:$0xf] }
 0x2a4   : > { %9321 = vmatpush3.bf16.msra.mxu1 %v11816_v27  ;;  %9237 = vmatprep.mubr.bf16.mxu1 %v9613_v4  ;;  %v6778_v31 = vsel %vm9983_vm2, %v6773_v22, %v6777_v37  ;;  %v6801_v57 = vrot.slane %v6799_v36, 5  ;;  %v7166_v4 = vrot.slane %v11862_v35, 5  ;;  %v11886_v12 = vrot.slane %v7163_v26, 4  ;;  %v11894_v7 = vld [vmem:[#allocation2 + $0x58] sm:$0xf] }
 0x2a5   : > { %9314 = vmatprep.subr.bf16.mxu1 %v9612_v59  ;;  %9282 = vmatpush3.bf16.msra.mxu0 %v11816_v27  ;;  %v6786_v61 = vor.u32 %v6785_v50, %v6782_v41  ;;  %v8201_v27 = vcombine.low %v6768_v15, %v6778_v31  ;;  %v6796_v1 = vor.u32 %v6795_v13, %v6791_v38  ;;  %v6813_v56 = vshll.u32 %v11879_v11, 16  ;;  %v11899_v48 = vld [vmem:[#allocation2 + $0x5c] sm:$0x1]  ;;  %v9619_v31 = vld [vmem:[#allocation3 + $0x218] sm:$0xff]  }
 0x2a6   : > { %9283 = vmatprep.subr.bf16.mxu0 %v9612_v59  ;;  %v6817_v55 = vshrl.u32 %v11879_v11, 16  ;;  %v6806_v25 = vrot.slane %v6804_v46, 4  ;;  %v6823_v34 = vshll.u32 %v11882_v0, 16  ;;  %v6809_v20 = vrot.slane %v6807_v16, 5  ;;  %v11907_v46 = vld [vmem:[#allocation3 + $0x210] sm:$0xff]   ;;  %v9621_v16 = vld [vmem:[#allocation2 + $0x60] sm:$0xff]  }
 0x2a7   : > { %v6787_v5 = vrot.slane %v6786_v61, 4  ;;  %9269 = vmatprep.mubr.bf16.mxu0 %v8201_v27  ;;  %v6797_v43 = vrot.slane %v6796_v1, 4  ;;  %v6815_v37 = vrot.slane %v6813_v56, 5  ;;  %v6828_v41 = vshrl.u32 %v6698_v10, 16  ;;  %v9618_v61 = vld [vmem:[#allocation2 + $0x54] sm:$0xff]  }
 0x2a8   : > { %9322 = vmatpush3.bf16.msra.mxu1 %v9612_v59  ;;  %v6819_v52 = vrot.slane %v6817_v55, 4  ;;  %v6825_v50 = vrot.slane %v6823_v34, 5  ;;  %v6831_v22 = vshll.u32 %v6698_v10, 16  ;;  %v6810_v36 = vor.u32 %v6809_v20, %v6806_v25  ;;  %v11914_v34 = vld [vmem:[#allocation2 + $0x64] sm:$0xf] }
 0x2a9   : > { %9315 = vmatprep.subr.bf16.mxu1 %v11864_v45  ;;  %9284 = vmatpush3.bf16.msra.mxu0 %v9612_v59  ;;  %v6792_v3 = vsel %vm9983_vm2, %v6787_v5, %v6791_v38  ;;  %v6802_v59 = vsel %vm9983_vm2, %v6797_v43, %v6801_v57  ;;  %v6830_v13 = vrot.slane %v6828_v41, 4  ;;  %v6847_v27 = vshll.u32 %v11899_v48, 16  ;;  %v11916_v10 = vld [vmem:[#allocation2 + $0x68] sm:$0x1] }
 0x2aa   : > { %9285 = vmatprep.subr.bf16.mxu0 %v11864_v45  ;;  %v8202_v38 = vcombine.low %v6792_v3, %v6802_v59  ;;  %v6820_v15 = vor.u32 %v6819_v52, %v6815_v37  ;;  %v6833_v57 = vrot.slane %v6831_v22, 5  ;;  %v6811_v5 = vrot.slane %v6810_v36, 4 }
 0x2ab   : > { %9238 = vmatmul.mubr.bf16.gmra.mxu1 %v9614_v29  ;;  %v6837_v29 = vshll.u32 %v11894_v7, 16  ;;  %v6849_v3 = vrot.slane %v6847_v27, 5  ;;  %v6871_v36 = vshll.u32 %v11916_v10, 16  ;;  %v11933_v27 = vld [vmem:[#allocation2 + $0x74] sm:$0x1]  ;;  %v7152_v53 = vrot.slane %v11839_v39, 5 }
 0x2ac   : > { %9323 = vmatpush3.bf16.msra.mxu1 %v11864_v45  ;;  %9241 = vmatprep.mubr.bf16.mxu1 %v9617_v17  ;;  %v6841_v17 = vshrl.u32 %v11894_v7, 16  ;;  %v6821_v1 = vrot.slane %v6820_v15, 4  ;;  %v6834_v56 = vor.u32 %v6833_v57, %v6830_v13  ;;  %v6816_v43 = vsel %vm9983_vm2, %v6811_v5, %v6815_v37  ;;  %v6704_v15 = vld [vmem:[#allocation2 + $0x6c] sm:$0xf] }
 0x2ad   : > { %9316 = vmatprep.subr.bf16.mxu1 %v11877_v30  ;;  %9286 = vmatpush3.bf16.msra.mxu0 %v11864_v45  ;;  %v6839_v62 = vrot.slane %v6837_v29, 5  ;;  %v6701_v45 = vld [vmem:[#allocation2 + $0x60] sm:$0xf]  ;;  %v6861_v29 = vshll.u32 %v11914_v34, 16 }
 0x2ae   : > { %9270 = vmatmul.mubr.bf16.gmra.mxu0 %v8202_v38  ;;  %9287 = vmatprep.subr.bf16.mxu0 %v11877_v30  ;;  %v6843_v55 = vrot.slane %v6841_v17, 4  ;;  %v6826_v25 = vsel %vm9983_vm2, %v6821_v1, %v6825_v50  ;;  %v6852_v20 = vshrl.u32 %v6701_v45, 16  ;;  %v6855_v52 = vshll.u32 %v6701_v45, 16  ;;  %v11931_v17 = vld [vmem:[#allocation2 + $0x70] sm:$0xf] }
 0x2af   : > { %v8203_v41 = vcombine.low %v6816_v43, %v6826_v25  ;;  %v6835_v59 = vrot.slane %v6834_v56, 4  ;;  %v6865_v50 = vshrl.u32 %v11914_v34, 16  ;;  %v6863_v57 = vrot.slane %v6861_v29, 5 }
 0x2b0   : > { %9324 = vmatpush3.bf16.msra.mxu1 %v11877_v30  ;;  %v6844_v22 = vor.u32 %v6843_v55, %v6839_v62  ;;  %v6854_v37 = vrot.slane %v6852_v20, 4  ;;  %v6857_v38 = vrot.slane %v6855_v52, 5  ;;  %v6873_v1 = vrot.slane %v6871_v36, 5 }
 0x2b1   : > { %9317 = vmatprep.subr.bf16.mxu1 %v9619_v31  ;;  %9288 = vmatpush3.bf16.msra.mxu0 %v11877_v30  ;;  %v11927_v30 = vsel %vm10210_vm5, %v11886_v12, %v7166_v4  ;;  %v6840_v13 = vsel %vm9983_vm2, %v6835_v59, %v6839_v62  ;;  %v6867_v5 = vrot.slane %v6865_v50, 4  ;;  %v6876_v56 = vshrl.u32 %v6704_v15, 16  ;;  %v9623_v4 = vld [vmem:[#allocation3 + $0x208] sm:$0xff]   ;;  %v9622_v62 = vld [vmem:[#allocation2 + $0x6c] sm:$0xff]  }
 0x2b2   : > { %9289 = vmatprep.subr.bf16.mxu0 %v9619_v31  ;;  %9273 = vmatprep.mubr.bf16.mxu0 %v8203_v41  ;;  %v6858_v35 = vor.u32 %v6857_v38, %v6854_v37  ;;  %v6879_v55 = vshll.u32 %v6704_v15, 16  ;;  %v6885_v45 = vshll.u32 %v11931_v17, 16  ;;  %v6889_v43 = vshrl.u32 %v11931_v17, 16  ;;  %v9624_v38 = vld [vmem:[#allocation3 + $0x200] sm:$0xff]   ;;  %v7110_v15 = vld [vmem:[#allocation2 + $0x30] sm:$0xe] }
 0x2b3   : > { %9242 = vmatmul.mubr.bf16.gmra.mxu1 %v9618_v61  ;;  %v6845_v61 = vrot.slane %v6844_v22, 4  ;;  %v6878_v52 = vrot.slane %v6876_v56, 4  ;;  %v7142_v36 = vrot.slane %v11821_v14, 5  ;;  %v7109_v56 = vld [vmem:[#allocation2 + $0x24] sm:$0xe] }
 0x2b4   : > { %9325 = vmatpush3.bf16.msra.mxu1 %v9619_v31  ;;  %9245 = vmatprep.mubr.bf16.mxu1 %v9621_v16  ;;  %v6859_v20 = vrot.slane %v6858_v35, 4  ;;  %v6868_v16 = vor.u32 %v6867_v5, %v6863_v57  ;;  %v6881_v41 = vrot.slane %v6879_v55, 5  ;;  %v6887_v59 = vrot.slane %v6885_v45, 5 }
 0x2b5   : > { %9318 = vmatprep.subr.bf16.mxu1 %v11907_v46  ;;  %v6850_v12 = vsel %vm9983_vm2, %v6845_v61, %v6849_v3  ;;  %9290 = vmatpush3.bf16.msra.mxu0 %v9619_v31  ;;  %v6891_v22 = vrot.slane %v6889_v43, 4  ;;  %v6895_v3 = vshll.u32 %v11933_v27, 16  ;;  %v7108_v31 = vld [vmem:[#allocation2 + $0x18] sm:$0xe]  ;;  %v7145_v5 = vrot.slane %v11825_v40, 5 }
 0x2b6   : > { %v8204_v25 = vcombine.low %v6840_v13, %v6850_v12  ;;  %9291 = vmatprep.subr.bf16.mxu0 %v11907_v46  ;;  %v6864_v29 = vsel %vm9983_vm2, %v6859_v20, %v6863_v57  ;;  %v6869_v37 = vrot.slane %v6868_v16, 4  ;;  %v8215_v50 = vrot.slane %v7108_v31, 9  ;;  %v7111_v20 = vld [vmem:[#allocation2 + $0x3c] sm:$0xe]  ;;  %v7113_v31 = vld [vmem:[#allocation2 + $0x54] sm:$0xe] }
 0x2b7   : > { %v6882_v13 = vor.u32 %v6881_v41, %v6878_v52  ;;  %v6892_v61 = vor.u32 %v6891_v22, %v6887_v59  ;;  %v6897_v35 = vrot.slane %v6895_v3, 5  ;;  %v7144_v55 = vrot.slane %v7142_v36, 4  ;;  %v7112_v52 = vld [vmem:[#allocation2 + $0x48] sm:$0xe] }
 0x2b8   : > { %9326 = vmatpush3.bf16.msra.mxu1 %v11907_v46  ;;  %9274 = vmatmul.mubr.bf16.gmra.mxu0 %v8204_v25  ;;  %v6874_v12 = vsel %vm9983_vm2, %v6869_v37, %v6873_v1  ;;  %v7143_v57 = vsel %vm10210_vm5, %v8215_v50, %v7142_v36  ;;  %v8217_v45 = vrot.slane %v7110_v15, 9  ;;  %v7159_v1 = vrot.slane %v11849_v18, 5 }
 0x2b9   : > { %9319 = vmatprep.subr.bf16.mxu1 %v9623_v4  ;;  %9292 = vmatpush3.bf16.msra.mxu0 %v11907_v46  ;;  %v8205_v14 = vcombine.low %v6864_v29, %v6874_v12  ;;  %v6883_v43 = vrot.slane %v6882_v13, 4  ;;  %v6893_v25 = vrot.slane %v6892_v61, 4  ;;  %v7156_v46 = vrot.slane %v11847_v2, 5 }
 0x2ba   : > { %9293 = vmatprep.subr.bf16.mxu0 %v9623_v4  ;;  %v7146_v40 = vsel %vm10210_vm5, %v7144_v55, %v7145_v5  ;;  %v7149_v16 = vrot.slane %v11837_v23, 5  ;;  %v8218_v50 = vrot.slane %v7111_v20, 9  ;;  %v7170_v15 = vrot.slane %v11879_v11, 5 }
 0x2bb   : > { %9246 = vmatmul.mubr.bf16.gmra.mxu1 %v9622_v62  ;;  %v8216_v62 = vrot.slane %v7109_v56, 9  ;;  %9277 = vmatprep.mubr.bf16.mxu0 %v8205_v14  ;;  %v6888_v41 = vsel %vm9983_vm2, %v6883_v43, %v6887_v59  ;;  %v6898_v22 = vsel %vm9983_vm2, %v6893_v25, %v6897_v35  ;;  %v8223_v2 = vcombine.low %v7143_v57, %v7146_v40  ;;  %v7114_v35 = vld [vmem:[#allocation2 + $0x60] sm:$0xe] }
 0x2bc   : > { %9327 = vmatpush3.bf16.msra.mxu1 %v9623_v4  ;;  %v7158_v3 = vrot.slane %v7156_v46, 4  ;;  %v8206_v29 = vcombine.low %v6888_v41, %v6898_v22  ;;  %v7157_v18 = vsel %vm10210_vm5, %v8217_v45, %v7156_v46  ;;  %v7151_v37 = vrot.slane %v7149_v16, 4  ;;  %v7115_v46 = vld [vmem:[#allocation2 + $0x6c] sm:$0xe] }
 0x2bd   : > { %9320 = vmatprep.subr.bf16.mxu1 %v9624_v38  ;;  %9294 = vmatpush3.bf16.msra.mxu0 %v9623_v4  ;;  %v7150_v23 = vsel %vm10210_vm5, %v8216_v62, %v7149_v16  ;;  %v8219_v4 = vrot.slane %v7112_v52, 9  ;;  %v7173_v13 = vrot.slane %v11882_v0, 5  ;;  %v8220_v61 = vrot.slane %v7113_v31, 9 }
 0x2be   : > { %9295 = vmatprep.subr.bf16.mxu0 %v9624_v38  ;;  %v7160_v59 = vsel %vm10210_vm5, %v7158_v3, %v7159_v1  ;;  %v7153_v5 = vsel %vm10210_vm5, %v7151_v37, %v7152_v53  ;;  %v7164_v39 = vsel %vm10210_vm5, %v8218_v50, %v7163_v26  ;;  %v7177_v56 = vrot.slane %v11894_v7, 5 }
 0x2bf   : > { %v8225_v36 = vcombine.low %v7157_v18, %v7160_v59  ;;  %v7180_v12 = vrot.slane %v11899_v48, 5  ;;  %v8226_v11 = vcombine.low %v7164_v39, %v11927_v30  ;;  %v7171_v0 = vsel %vm10210_vm5, %v8219_v4, %v7170_v15 }
 0x2c0   : > { %9328 = vmatpush3.bf16.msra.mxu1 %v9624_v38  ;;  %9278 = vmatmul.mubr.bf16.gmra.mxu0 %v8206_v29  ;;  %v7179_v57 = vrot.slane %v7177_v56, 4  ;;  %v8221_v55 = vrot.slane %v7114_v35, 9  ;;  %v7184_v45 = vrot.slane %v11914_v34, 5  ;;  %v8224_v14 = vcombine.low %v7150_v23, %v7153_v5 }
 0x2c1   : > { %9296 = vmatpush3.bf16.msra.mxu0 %v9624_v38  ;;  %9297 = vmatprep.mubr.bf16.mxu0 %v8223_v2  ;;  %v7172_v38 = vrot.slane %v7170_v15, 4  ;;  %v7178_v26 = vsel %vm10210_vm5, %v8220_v61, %v7177_v56  ;;  %v7187_v7 = vrot.slane %v11916_v10, 5  ;;  %v7191_v25 = vrot.slane %v11931_v17, 5 }
 0x2c2   : > { %9301 = vmatprep.mubr.bf16.mxu1 %v8225_v36  ;;  %v7181_v30 = vsel %vm10210_vm5, %v7179_v57, %v7180_v12  ;;  %v7186_v43 = vrot.slane %v7184_v45, 4  ;;  %v7185_v34 = vsel %vm10210_vm5, %v8221_v55, %v7184_v45  ;;  %v8222_v62 = vrot.slane %v7115_v46, 9 }
 0x2c3   : > { %9302 = vmatmul.mubr.bf16.vlgmr.msra.gmra.mxu1 %v8226_v11  ;;  %v7174_v21 = vsel %vm10210_vm5, %v7172_v38, %v7173_v13  ;;  %v8228_v40 = vcombine.low %v7178_v26, %v7181_v30  ;;  %v7193_v10 = vrot.slane %v7191_v25, 4  ;;  %v7194_v16 = vrot.slane %v11933_v27, 5 }
 0x2c4   : > { %v8227_v48 = vcombine.low %v7171_v0, %v7174_v21  ;;  %v7188_v20 = vsel %vm10210_vm5, %v7186_v43, %v7187_v7  ;;  %v7192_v17 = vsel %vm10210_vm5, %v8222_v62, %v7191_v25 }
 0x2c5   : > { %v8229_v1 = vcombine.low %v7185_v34, %v7188_v20  ;;  %v7195_v52 = vsel %vm10210_vm5, %v7193_v10, %v7194_v16 }
 0x2c6   : > { %9305 = vmatprep.mubr.bf16.mxu1 %v8227_v48  ;;  %v8230_v41 = vcombine.low %v7192_v17, %v7195_v52 }
 0x2c8   : > { %9298 = vmatmul.mubr.bf16.vlgmr.msra.gmra.mxu0 %v8224_v14 }
 0x2cb   : > { %9306 = vmatmul.mubr.bf16.gmra.mxu1 %v8228_v40 }
 0x2cc   : > { %9309 = vmatprep.mubr.bf16.mxu1 %v8229_v1 }
 0x2d3   : > { %9310 = vmatmul.mubr.bf16.gmra.mxu1 %v8230_v41 }
 0x2f9   : > { %v9043_v22 = vpop.f32.mrf.mxu1 }
 0x2fa   : > { %v9075_v2 = vpop.f32.mrf.mxu0 }
 0x2fb   : > { %v5134_v3 = vadd.f32 %v9075_v2, %v9043_v22  ;;  %v4932_v31 = vpop.f32.mrf.mxu1 }
 0x2fc   : > { %v5125_v29 = vpop.f32.mrf.mxu0 }
 0x2fd   : > { %v5126_v18 = vadd.f32 %v5125_v29, %v4932_v31  ;;  %v9044_v23 = vpop.f32.mrf.mxu1 }
 0x2fe   : > { %v9076_v37 = vpop.f32.mrf.mxu0 }
 0x2ff   : > { %v5137_v59 = vadd.f32 %v9076_v37, %v9044_v23  ;;  %v4935_v27 = vpop.f32.mrf.mxu1 }
 0x300   : > { %v5128_v53 = vpop.f32.mrf.mxu0 }
 0x301   : > { %v5129_v50 = vadd.f32 %v5128_v53, %v4935_v27  ;;  %v9047_v4 = vpop.f32.mrf.mxu1 }
 0x302   : > { %v9079_v36 = vpop.f32.mrf.mxu0 }
 0x303   : > { %v5150_v15 = vadd.f32 %v9079_v36, %v9047_v4  ;;  %v4948_v13 = vpop.f32.mrf.mxu1 }
 0x304   : > { %v5141_v24 = vpop.f32.mrf.mxu0 }
 0x305   : > { %v5142_v61 = vadd.f32 %v5141_v24, %v4948_v13  ;;  %v9048_v35 = vpop.f32.mrf.mxu1 }
 0x306   : > { %v9080_v5 = vpop.f32.mrf.mxu0 }
 0x307   : > { %v5153_v39 = vadd.f32 %v9080_v5, %v9048_v35  ;;  %v4951_v56 = vpop.f32.mrf.mxu1 }
 0x308   : > { %v5144_v12 = vpop.f32.mrf.mxu0 }
 0x309   : > { %v5145_v11 = vadd.f32 %v5144_v12, %v4951_v56  ;;  %v9051_v38 = vpop.f32.mrf.mxu1 }
 0x30a   : > { %v9083_v0 = vpop.f32.mrf.mxu0 }
 0x30b   : > { %v5166_v57 = vadd.f32 %v9083_v0, %v9051_v38  ;;  %v4964_v45 = vpop.f32.mrf.mxu1 }
 0x30c   : > { %v5157_v55 = vpop.f32.mrf.mxu0 }
 0x30d   : > { %v5158_v14 = vadd.f32 %v5157_v55, %v4964_v45  ;;  %v9052_v26 = vpop.f32.mrf.mxu1 }
 0x30e   : > { %v9084_v21 = vpop.f32.mrf.mxu0 }
 0x30f   : > { %v5169_v7 = vadd.f32 %v9084_v21, %v9052_v26  ;;  %v4967_v30 = vpop.f32.mrf.mxu1 }
 0x310   : > { %v5160_v48 = vpop.f32.mrf.mxu0 }
 0x311   : > { %v5161_v43 = vadd.f32 %v5160_v48, %v4967_v30 }
 0x312   : > { %v9087_v25 = vpop.f32.mrf.mxu0 }
 0x314   : > { %v5173_v34 = vpop.f32.mrf.mxu0 }
 0x315   : > { %v9055_v46 = vpop.f32.mrf.mxu1 }
 0x316   : > { %v5182_v20 = vadd.f32 %v9087_v25, %v9055_v46  ;;  %v9088_v40 = vpop.f32.mrf.mxu0 }
 0x317   : > { %v4980_v1 = vpop.f32.mrf.mxu1 }
 0x318   : > { %v5174_v62 = vadd.f32 %v5173_v34, %v4980_v1  ;;  %v5176_v10 = vpop.f32.mrf.mxu0 }
 0x319   : > { %v9056_v16 = vpop.f32.mrf.mxu1 }
 0x31a   : > { %v5185_v17 = vadd.f32 %v9088_v40, %v9056_v16  ;;  %v9139_v52 = vpop.f32.mrf.mxu0 }
 0x31b   : > { %v4983_v41 = vpop.f32.mrf.mxu1 }
 0x31c   : > { %v11999_v22 = vadd.f32 %v5176_v10, %v4983_v41  ;;  %v5640_v2 = vpop.f32.mrf.mxu0 }
 0x31d   : > { %v9107_v31 = vpop.f32.mrf.mxu1 }
 0x31e   : > { %v5463_v29 = vadd.f32 %v9107_v31, %v5134_v3  ;;  %v9140_v23 = vpop.f32.mrf.mxu0 }
 0x31f   : > { %v5398_v37 = vpop.f32.mrf.mxu1 }
 0x320   : > { %v5705_v27 = vadd.f32 %v9139_v52, %v5463_v29  ;;  %v5461_v53 = vadd.f32 %v5398_v37, %v5126_v18  ;;  %v5643_v4 = vpop.f32.mrf.mxu0 }
 0x321   : > { %v9108_v36 = vpop.f32.mrf.mxu1 }
 0x322   : > { %v5703_v13 = vadd.f32 %v5640_v2, %v5461_v53  ;;  %v5464_v24 = vadd.f32 %v9108_v36, %v5137_v59  ;;  %v9143_v35 = vpop.f32.mrf.mxu0 }
 0x323   : > { %v5401_v5 = vpop.f32.mrf.mxu1 }
 0x324   : > { %v12001_v56 = vadd.f32 %v9140_v23, %v5464_v24  ;;  %v5462_v12 = vadd.f32 %v5401_v5, %v5129_v50  ;;  %v5656_v0 = vpop.f32.mrf.mxu0 }
 0x325   : > { %v9111_v38 = vpop.f32.mrf.mxu1 }
 0x326   : > { %v12003_v55 = vadd.f32 %v5643_v4, %v5462_v12  ;;  %v5467_v45 = vadd.f32 %v9111_v38, %v5150_v15  ;;  %v9144_v21 = vpop.f32.mrf.mxu0 }
 0x327   : > { %v5414_v3 = vpop.f32.mrf.mxu1 }
 0x328   : > { %v12005_v26 = vadd.f32 %v9143_v35, %v5467_v45  ;;  %v5465_v48 = vadd.f32 %v5414_v3, %v5142_v61  ;;  %v5659_v18 = vpop.f32.mrf.mxu0 }
 0x329   : > { %v9112_v30 = vpop.f32.mrf.mxu1 }
 0x32a   : > { %v12007_v25 = vadd.f32 %v5656_v0, %v5465_v48  ;;  %v5468_v59 = vadd.f32 %v9112_v30, %v5153_v39  ;;  %v9147_v34 = vpop.f32.mrf.mxu0 }
 0x32b   : > { %v5417_v46 = vpop.f32.mrf.mxu1 }
 0x32c   : > { %v12009_v40 = vadd.f32 %v9144_v21, %v5468_v59  ;;  %v5466_v50 = vadd.f32 %v5417_v46, %v5145_v11  ;;  %v5672_v1 = vpop.f32.mrf.mxu0 }
 0x32d   : > { %v9115_v10 = vpop.f32.mrf.mxu1 }
 0x32e   : > { %v12011_v16 = vadd.f32 %v5659_v18, %v5466_v50  ;;  %v5471_v15 = vadd.f32 %v9115_v10, %v5166_v57  ;;  %v9148_v52 = vpop.f32.mrf.mxu0 }
 0x32f   : > { %v5430_v41 = vpop.f32.mrf.mxu1 }
 0x330   : > { %v12013_v2 = vadd.f32 %v9147_v34, %v5471_v15  ;;  %v5469_v61 = vadd.f32 %v5430_v41, %v5158_v14  ;;  %v5675_v31 = vpop.f32.mrf.mxu0 }
 0x331   : > { %v9116_v29 = vpop.f32.mrf.mxu1 }
 0x332   : > { %v12015_v23 = vadd.f32 %v5672_v1, %v5469_v61  ;;  %v5472_v39 = vadd.f32 %v9116_v29, %v5169_v7  ;;  %v9151_v37 = vpop.f32.mrf.mxu0 }
 0x333   : > { %v5433_v53 = vpop.f32.mrf.mxu1 }
 0x334   : > { %v12017_v4 = vadd.f32 %v9148_v52, %v5472_v39  ;;  %v5470_v11 = vadd.f32 %v5433_v53, %v5161_v43  ;;  %v5688_v36 = vpop.f32.mrf.mxu0 }
 0x335   : > { %v9119_v24 = vpop.f32.mrf.mxu1 }
 0x336   : > { %v12019_v35 = vadd.f32 %v5675_v31, %v5470_v11  ;;  %v5475_v57 = vadd.f32 %v9119_v24, %v5182_v20  ;;  %v9152_v5 = vpop.f32.mrf.mxu0 }
 0x337   : > { %v5446_v12 = vpop.f32.mrf.mxu1 }
 0x338   : > { %v12021_v0 = vadd.f32 %v9151_v37, %v5475_v57  ;;  %v5473_v14 = vadd.f32 %v5446_v12, %v5174_v62  ;;  %v5691_v38 = vpop.f32.mrf.mxu0 }
 0x339   : > { %v9120_v45 = vpop.f32.mrf.mxu1 }
 0x33a   : > { %v12023_v21 = vadd.f32 %v5688_v36, %v5473_v14  ;;  %v5476_v7 = vadd.f32 %v9120_v45, %v5185_v17  ;;  %v12025_v3 = vpop.f32.mrf.mxu0 }
 0x33b   : > { %v5449_v48 = vpop.f32.mrf.mxu1 }
 0x33c   : > { %v12027_v18 = vadd.f32 %v9152_v5, %v5476_v7  ;;  %v5474_v43 = vadd.f32 %v5449_v48, %v11999_v22  ;;  %v12030_v30 = vpop.f32.mrf.mxu0 }
 0x33d   : > { %v9171_v20 = vpop.f32.mrf.mxu1 }
 0x33e   : > { %v12032_v59 = vadd.f32 %v5691_v38, %v5474_v43  ;;  %v6130_v34 = vadd.f32 %v9171_v20, %v5705_v27  ;;  %v12034_v46 = vpop.f32.mrf.mxu0 }
 0x33f   : > { %v6065_v62 = vpop.f32.mrf.mxu1 }
 0x340   : > { %v6128_v50 = vadd.f32 %v6065_v62, %v5703_v13  ;;  %v12036_v10 = vpop.f32.mrf.mxu0 }
 0x341   : > { %v9172_v1 = vpop.f32.mrf.mxu1 }
 0x343   : > { %v6068_v17 = vpop.f32.mrf.mxu1 }
 0x344   : > { %v9207_v52 = vpop.f32.mrf.mxu0 }
 0x345   : > { %v9175_v15 = vpop.f32.mrf.mxu1 }
 0x346   : > { %v6378_v61 = vpop.f32.mrf.mxu0 }
 0x347   : > { %v6081_v41 = vpop.f32.mrf.mxu1 }
 0x348   : > { %v9208_v22 = vpop.f32.mrf.mxu0 }
 0x349   : > { %v9176_v31 = vpop.f32.mrf.mxu1 }
 0x34a   : > { %v12038_v39 = vpop.f32.mrf.mxu0 }
 0x34b   : > { %v6084_v29 = vpop.f32.mrf.mxu1 }
 0x34d   : > { %v12040_v53 = vpop.f32.mrf.mxu0 }
 0x34f   : > { %v12042_v11 = vpop.f32.mrf.mxu0 }
 0x350   : > { %v9179_v37 = vpop.f32.mrf.mxu1  ;;  %12321 = vst [vmem:[#allocation11_spill] sm:$0xff] %v12042_v11  ;;  %v6425_v11 = vadd.f32 %v12030_v30, %v6128_v50 }
 0x351   : > { %v12044_v36 = vpop.f32.mrf.mxu0 }
 0x352   : > { %v6097_v27 = vpop.f32.mrf.mxu1  ;;  %12322 = vst [vmem:[#allocation12_spill] sm:$0xff] %v12044_v36  ;;  %v6133_v36 = vadd.f32 %v6084_v29, %v12011_v16 }
 0x353   : > { %v6397_v57 = vpop.f32.mrf.mxu0 }
 0x354   : > { %v9180_v13 = vpop.f32.mrf.mxu1 }
 0x356   : > { %v6100_v24 = vpop.f32.mrf.mxu1 }
 0x358   : > { %v12046_v12 = vpop.f32.mrf.mxu0 }
 0x359   : > { %12323 = vst [vmem:[#allocation29_spill] sm:$0xff] %v12046_v12 }
 0x35a   : > { %v12048_v38 = vpop.f32.mrf.mxu0 }
 0x35b   : > { %v9183_v5 = vpop.f32.mrf.mxu1  ;;  %12324 = vst [vmem:[#allocation30_spill] sm:$0xff] %v12048_v38  ;;  %v6132_v38 = vadd.f32 %v6081_v41, %v12007_v25 }
 0x35c   : > { %v12050_v7 = vpop.f32.mrf.mxu0 }
 0x35d   : > { %v6113_v14 = vpop.f32.mrf.mxu1  ;;  %12325 = vst [vmem:[#allocation31_spill] sm:$0xff] %v12050_v7  ;;  %v6134_v7 = vadd.f32 %v9175_v15, %v12005_v26  ;;  %v6137_v26 = vadd.f32 %v6100_v24, %v12019_v35  ;;  %v6429_v16 = vadd.f32 %v6378_v61, %v6132_v38 }
 0x35e   : > { %v12052_v43 = vpop.f32.mrf.mxu0 }
 0x35f   : > { %v9184_v45 = vpop.f32.mrf.mxu1  ;;  %12326 = vst [vmem:[#allocation32_spill] sm:$0xff] %v12052_v43  ;;  %v6431_v15 = vadd.f32 %v9207_v52, %v6134_v7 }
 0x360   : > { %v6143_v30 = vadd.f32 %v9184_v45, %v12027_v18 }
 0x361   : > { %v6116_v48 = vpop.f32.mrf.mxu1 }
 0x362   : > { %v6141_v41 = vadd.f32 %v6116_v48, %v12032_v59 }
 0x363   : > { %v9235_v20 = vpop.f32.mrf.mxu1  ;;  %v12054_v51 = vpop.f32.mrf.mxu0 }
 0x364   : > { %12327 = vst [vmem:[#allocation33_spill] sm:$0xff] %v12054_v51 }
 0x365   : > { %v6604_v62 = vpop.f32.mrf.mxu1  ;;  %v12056_v19 = vpop.f32.mrf.mxu0 }
 0x366   : > { %12328 = vst [vmem:[#allocation34_spill] sm:$0xff] %v12056_v19  ;;  %v6667_v18 = vadd.f32 %v6604_v62, %v6425_v11 }
 0x367   : > { %v9236_v58 = vpop.f32.mrf.mxu1  ;;  %v12058_v47 = vpop.f32.mrf.mxu0 }
 0x368   : > { %12329 = vst [vmem:[#allocation35_spill] sm:$0xff] %v12058_v47  ;;  %v6131_v47 = vadd.f32 %v9172_v1, %v12001_v56  ;;  %v6136_v56 = vadd.f32 %v6097_v27, %v12015_v23  ;;  %v12338_v27 = vld [vmem:[#allocation30_spill] sm:$0xff] }
 0x369   : > { %v6607_v32 = vpop.f32.mrf.mxu1  ;;  %v12060_v8 = vpop.f32.mrf.mxu0 }
 0x36a   : > { %12330 = vst [vmem:[#allocation36_spill] sm:$0xff] %v12060_v8  ;;  %v6129_v8 = vadd.f32 %v6068_v17, %v12003_v55  ;;  %v6139_v55 = vadd.f32 %v9180_v13, %v12017_v4  ;;  %v6430_v4 = vadd.f32 %v12038_v39, %v6133_v36  ;;  %v12339_v13 = vld [vmem:[#allocation31_spill] sm:$0xff]  ;;  %v12340_v36 = vld [vmem:[#allocation32_spill] sm:$0xff] }
 0x36b   : > { %v9239_v60 = vpop.f32.mrf.mxu1  ;;  %v6438_v24 = vadd.f32 %v12340_v36, %v6141_v41 }
 0x36c   : > { %v6426_v17 = vadd.f32 %v12036_v10, %v6129_v8  ;;  %v12336_v10 = vld [vmem:[#allocation12_spill] sm:$0xff] }
 0x36d   : > { %v6620_v6 = vpop.f32.mrf.mxu1  ;;  %v6436_v52 = vadd.f32 %v12336_v10, %v6139_v55 }
 0x36e   : > { %v9271_v28 = vpop.f32.mrf.mxu0 }
 0x36f   : > { %v9240_v54 = vpop.f32.mrf.mxu1 }
 0x370   : > { %v12062_v9 = vpop.f32.mrf.mxu0 }
 0x371   : > { %12331 = vst [vmem:[#allocation37_spill] sm:$0xff] %v12062_v9  ;;  %v6623_v49 = vpop.f32.mrf.mxu1  ;;  %v6135_v9 = vadd.f32 %v9176_v31, %v12009_v40  ;;  %v6428_v40 = vadd.f32 %v12034_v46, %v6131_v47  ;;  %v6673_v47 = vadd.f32 %v9239_v60, %v6431_v15  ;;  %v12335_v46 = vld [vmem:[#allocation11_spill] sm:$0xff] }
 0x372   : > { %v12064_v44 = vpop.f32.mrf.mxu0  ;;  %v6433_v8 = vadd.f32 %v12335_v46, %v6136_v56  ;;  %v12345_v56 = vld [vmem:[#allocation36_spill] sm:$0xff] }
 0x373   : > { %12332 = vst [vmem:[#allocation38_spill] sm:$0xff] %v12064_v44  ;;  %v9243_v63 = vpop.f32.mrf.mxu1  ;;  %v6670_v29 = vadd.f32 %v9236_v58, %v6428_v40 }
 0x374   : > { %v12066_v42 = vpop.f32.mrf.mxu0 }
 0x375   : > { %12333 = vst [vmem:[#allocation39_spill] sm:$0xff] %v12066_v42  ;;  %v6636_v33 = vpop.f32.mrf.mxu1  ;;  %v6427_v42 = vadd.f32 %v12025_v3, %v6130_v34  ;;  %v6142_v3 = vadd.f32 %v9183_v5, %v12021_v0  ;;  %v6432_v34 = vadd.f32 %v9208_v22, %v6135_v9  ;;  %v6434_v0 = vadd.f32 %v6397_v57, %v6137_v26 }
 0x376   : > { %v7098_v5 = vadd.f32 %v9271_v28, %v6673_v47  ;;  %v6675_v45 = vadd.f32 %v6636_v33, %v6433_v8 }
 0x377   : > { %v9244_v51 = vpop.f32.mrf.mxu1  ;;  %v6669_v61 = vadd.f32 %v9235_v20, %v6427_v42  ;;  %v6674_v59 = vadd.f32 %v9240_v54, %v6432_v34  ;;  %v12341_v42 = vld [vmem:[#allocation33_spill] sm:$0xff]  ;;  %v12342_v54 = vld [vmem:[#allocation34_spill] sm:$0xff]  ;;  %v12343_v20 = vld [vmem:[#allocation35_spill] sm:$0xff] }
 0x378   : > { %v12068_v19 = vpop.f32.mrf.mxu0  ;;  %v6678_v7 = vadd.f32 %v9244_v51, %v6436_v52  ;;  %v7092_v58 = vadd.f32 %v12342_v54, %v6667_v18  ;;  %v7095_v62 = vadd.f32 %v12343_v20, %v6670_v29  ;;  %v12344_v28 = vld [vmem:[#allocation37_spill] sm:$0xff] }
 0x379   : > { %12334 = vst [vmem:[#allocation40_spill] sm:$0xff] %v12068_v19  ;;  %v6639_v43 = vpop.f32.mrf.mxu1  ;;  %v6138_v19 = vadd.f32 %v9179_v37, %v12013_v2  ;;  %v6140_v2 = vadd.f32 %v6113_v14, %v12023_v21  ;;  %v12337_v21 = vld [vmem:[#allocation29_spill] sm:$0xff]  ;;  %v6671_v37 = vadd.f32 %v6620_v6, %v6429_v16  ;;  %v6672_v14 = vadd.f32 %v6623_v49, %v6430_v4  ;;  %v12104_v6 = vld [vmem:[%s12241_s4] ss:$0 sm:$0xff] }
 0x37a   : > { %v12075_v12 = vpop.f32.mrf.mxu0  ;;  %v6439_v22 = vadd.f32 %v12337_v21, %v6142_v3  ;;  %v7094_v38 = vadd.f32 %v12341_v42, %v6669_v61  ;;  %v6676_v48 = vadd.f32 %v6639_v43, %v6434_v0  ;;  %v12346_v33 = vld [vmem:[#allocation38_spill] sm:$0xff]  ;;  %v12349_v18 = vld [vmem:[#allocation17_spill] sm:$0xff] }
 0x37b   : > { %v9247_v44 = vpop.f32.mrf.mxu1  ;;  %v6435_v35 = vadd.f32 %v12040_v53, %v6138_v19  ;;  %v6437_v39 = vadd.f32 %v12338_v27, %v6140_v2  ;;  %v6440_v19 = vadd.f32 %v12339_v13, %v6143_v30  ;;  %v6668_v53 = vadd.f32 %v6607_v32, %v6426_v17  ;;  %v12350_v42 = vld [vmem:[#allocation18_spill] sm:$0xff] }
 0x37c   : > { %v9276_v25 = vpop.f32.mrf.mxu0  ;;  %v7096_v49 = vadd.f32 %v12344_v28, %v6671_v37  ;;  %v7099_v51 = vadd.f32 %v12346_v33, %v6674_v59  ;;  %v6681_v43 = vadd.f32 %v9247_v44, %v6439_v22  ;;  %v12347_v15 = vld [vmem:[#allocation39_spill] sm:$0xff]  ;;  %v7100_v4 = vadd.f32 %v12075_v12, %v6675_v45  ;;  %v12351_v45 = vld [vmem:[#allocation13_spill] sm:$0xff] }
 0x37d   : > { %v6652_v1 = vpop.f32.mrf.mxu1  ;;  %v6677_v57 = vadd.f32 %v9243_v63, %v6435_v35  ;;  %v7093_v55 = vadd.f32 %v12345_v56, %v6668_v53  ;;  %v7097_v3 = vadd.f32 %v12347_v15, %v6672_v14  ;;  %v12117_v35 = vadd.f32 %v9276_v25, %v6678_v7 }
 0x37e   : > { %v7064_v23 = vpop.f32.mrf.mxu0  ;;  %v6679_v26 = vadd.f32 %v6652_v1, %v6437_v39 }
 0x37f   : > { %v9248_v50 = vpop.f32.mrf.mxu1  ;;  %v12119_v41 = vadd.f32 %v7064_v23, %v6676_v48 }
 0x380   : > { %v9279_v9 = vpop.f32.mrf.mxu0  ;;  %v12348_v16 = vld [vmem:[#allocation40_spill] sm:$0xff]  ;;  %v12121_v47 = vadd.f32 %v9248_v50, %v6440_v19 }
 0x381   : > { %v6655_v31 = vpop.f32.mrf.mxu1  ;;  %v7102_v34 = vadd.f32 %v12348_v16, %v6677_v57  ;;  %v7106_v52 = vadd.f32 %v9279_v9, %v6681_v43 }
 0x382   : > { %v7077_v60 = vpop.f32.mrf.mxu0  ;;  %v12126_v61 = vadd.f32 %v6655_v31, %v6438_v24 }
 0x383   : > { %v9303_v32 = vpop.f32.mrf.mxu1  ;;  %v12124_v0 = vadd.f32 %v7077_v60, %v6679_v26 }
 0x384   : > { %v12099_v11 = vpop.f32.mrf.mxu0  ;;  %v7395_v63 = vadd.f32 %v9303_v32, %v7098_v5 }
 0x385   : > { %v7342_v17 = vpop.f32.mrf.mxu1 }
 0x386   : > { %v12111_v40 = vpop.f32.mrf.mxu0  ;;  %v7418_v2 = vadd.f32 %v12104_v6, %v7395_v63  ;;  %v7393_v30 = vadd.f32 %v7342_v17, %v7096_v49  ;;  %v12353_v63 = vld [vmem:[#allocation14_spill] sm:$0xff] }
 0x387   : > { %v9304_v1 = vpop.f32.mrf.mxu1 }
 0x388   : > { %v9299_v44 = vpop.f32.mrf.mxu0  ;;  %vm7434_vm2 = vcmp.ge.f32.partialorder %v7418_v2, 0.0  ;;  %v7450_v8 = vmul.f32 0.2, %v7418_v2  ;;  %v7416_v10 = vadd.f32 %v12104_v6, %v7393_v30  ;;  %v7396_v12 = vadd.f32 %v9304_v1, %v7099_v51  ;;  %v12355_v1 = vld [vmem:[#allocation15_spill] sm:$0xff] }
 0x389   : > { %v7391_v46 = vadd.f32 %v9299_v44, %v7094_v38  ;;  %v7345_v25 = vpop.f32.mrf.mxu1 }
 0x38a   : > { %v7326_v21 = vpop.f32.mrf.mxu0  ;;  %v7466_v22 = vsel %vm7434_vm2, %v7418_v2, %v7450_v8  ;;  %vm7432_vm5 = vcmp.ge.f32.partialorder %v7416_v10, 0.0  ;;  %v7448_v37 = vmul.f32 0.2, %v7416_v10  ;;  %v7419_v39 = vadd.f32 %v12104_v6, %v7396_v12  ;;  %v12354_v2 = vld [vmem:[#allocation20_spill] sm:$0xff] }
 0x38b   : > { %v7414_v23 = vadd.f32 %v12104_v6, %v7391_v46  ;;  %v7389_v50 = vadd.f32 %v7326_v21, %v7092_v58  ;;  %v7482_v29 = vadd.f32 %v7466_v22, %v12349_v18  ;;  %v7394_v13 = vadd.f32 %v7345_v25, %v7097_v3  ;;  %v9307_v9 = vpop.f32.mrf.mxu1 }
 0x38c   : > { %v9300_v27 = vpop.f32.mrf.mxu0  ;;  %v7464_v59 = vsel %vm7432_vm5, %v7416_v10, %v7448_v37  ;;  %vm7435_vm1 = vcmp.ge.f32.partialorder %v7419_v39, 0.0  ;;  %v7451_v60 = vmul.f32 0.2, %v7419_v39  ;;  %v7399_v15 = vadd.f32 %v9307_v9, %v7102_v34 }
 0x38d   : > { %vm7430_vm14 = vcmp.ge.f32.partialorder %v7414_v23, 0.0  ;;  %v7446_v19 = vmul.f32 0.2, %v7414_v23  ;;  %v7412_v31 = vadd.f32 %v12104_v6, %v7389_v50  ;;  %v7392_v53 = vadd.f32 %v9300_v27, %v7095_v62  ;;  %v7358_v5 = vpop.f32.mrf.mxu1  ;;  %v12352_v62 = vld [vmem:[#allocation19_spill] sm:$0xff]  ;;  %v12356_v50 = vld [vmem:[#allocation16_spill] sm:$0xff] }
 0x38e   : > { %v7329_v36 = vpop.f32.mrf.mxu0  ;;  %v7417_v24 = vadd.f32 %v12104_v6, %v7394_v13  ;;  %v7480_v38 = vadd.f32 %v7464_v59, %v12350_v42  ;;  %v7467_v32 = vsel %vm7435_vm1, %v7419_v39, %v7451_v60  ;;  %v7397_v3 = vadd.f32 %v7358_v5, %v7100_v4 }
 0x38f   : > { %v7462_v14 = vsel %vm7430_vm14, %v7414_v23, %v7446_v19  ;;  %vm7428_vm3 = vcmp.ge.f32.partialorder %v7412_v31, 0.0  ;;  %v7444_v57 = vmul.f32 0.2, %v7412_v31  ;;  %v7415_v48 = vadd.f32 %v12104_v6, %v7392_v53  ;;  %v9308_v58 = vpop.f32.mrf.mxu1 }
 0x390   : > { %v7478_v7 = vadd.f32 %v7462_v14, %v12351_v45  ;;  %v7390_v54 = vadd.f32 %v7329_v36, %v7093_v55  ;;  %v7483_v28 = vadd.f32 %v7467_v32, %v12352_v62  ;;  %vm7433_vm8 = vcmp.ge.f32.partialorder %v7417_v24, 0.0 }
 0x391   : > { %v7460_v20 = vsel %vm7428_vm3, %v7412_v31, %v7444_v57  ;;  %v7449_v49 = vmul.f32 0.2, %v7417_v24  ;;  %vm7431_vm11 = vcmp.ge.f32.partialorder %v7415_v48, 0.0  ;;  %v7447_v33 = vmul.f32 0.2, %v7415_v48  ;;  %v7361_v43 = vpop.f32.mrf.mxu1 }
 0x392   : > { %v7476_v56 = vadd.f32 %v7460_v20, %v12353_v63  ;;  %v7413_v51 = vadd.f32 %v12104_v6, %v7390_v54  ;;  %v8318_v26 = vpack.c.bf16 %v7483_v28, %v7482_v29  ;;  %v7422_v8 = vadd.f32 %v12104_v6, %v7399_v15  ;;  %v12363_v15 = vld [vmem:[#allocation26_spill] sm:$0xff] }
 0x393   : > { %v7465_v17 = vsel %vm7433_vm8, %v7417_v24, %v7449_v49  ;;  %v7463_v16 = vsel %vm7431_vm11, %v7415_v48, %v7447_v33  ;;  %v9311_v44 = vpop.f32.mrf.mxu1  ;;  %v7420_v10 = vadd.f32 %v12104_v6, %v7397_v3  ;;  %v7400_v21 = vadd.f32 %v9308_v58, %v12117_v35  ;;  %v12357_v24 = vld [vmem:[#allocation21_spill] sm:$0xff] }
 0x394   : > { %vm7429_vm12 = vcmp.ge.f32.partialorder %v7413_v51, 0.0  ;;  %v7445_v55 = vmul.f32 0.2, %v7413_v51  ;;  %v7481_v30 = vadd.f32 %v7465_v17, %v12354_v2  ;;  %v7479_v46 = vadd.f32 %v7463_v16, %v12355_v1  ;;  %8342 = vst [vmem:[%s11551_s19 + $0x18] sm:$0xff] %v8318_v26   ;;  %v12362_v26 = vld [vmem:[#allocation27_spill] sm:$0xff]  ;;  %v12364_v16 = vld [vmem:[#allocation28_spill] sm:$0xff] }
 0x395   : > { %v7398_v4 = vadd.f32 %v7361_v43, %v12119_v41  ;;  %v7403_v25 = vadd.f32 %v9311_v44, %v7106_v52  ;;  %v7374_v23 = vpop.f32.mrf.mxu1  ;;  %vm7438_vm13 = vcmp.ge.f32.partialorder %v7422_v8, 0.0  ;;  %v7454_v29 = vmul.f32 0.2, %v7422_v8 }
 0x396   : > { %v7461_v12 = vsel %vm7429_vm12, %v7413_v51, %v7445_v55  ;;  %v8313_v34 = vpack.c.bf16 %v7481_v30, %v7480_v38  ;;  %v8308_v22 = vpack.c.bf16 %v7479_v46, %v7478_v7  ;;  %vm7436_vm15 = vcmp.ge.f32.partialorder %v7420_v10, 0.0  ;;  %v12360_v7 = vld [vmem:[#allocation24_spill] sm:$0xff]  ;;  %v12361_v51 = vld [vmem:[#allocation25_spill] sm:$0xff] }
 0x397   : > { %v7477_v18 = vadd.f32 %v7461_v12, %v12356_v50  ;;  %v7452_v37 = vmul.f32 0.2, %v7420_v10  ;;  %v7423_v27 = vadd.f32 %v12104_v6, %v7400_v21  ;;  %v7421_v35 = vadd.f32 %v12104_v6, %v7398_v4  ;;  %v9312_v39 = vpop.f32.mrf.mxu1 }
 0x398   : > { %8341 = vst [vmem:[%s11551_s19 + $0x10] sm:$0xff] %v8313_v34   ;;  %8340 = vst [vmem:[%s11551_s19 + $0x8] sm:$0xff] %v8308_v22   ;;  %v7470_v9 = vsel %vm7438_vm13, %v7422_v8, %v7454_v29  ;;  %v7426_v41 = vadd.f32 %v12104_v6, %v7403_v25  ;;  %v7401_v52 = vadd.f32 %v7374_v23, %v12124_v0 }
 0x399   : > { %v8303_v13 = vpack.c.bf16 %v7477_v18, %v7476_v56  ;;  %v7107_v19 = vadd.f32 %v12099_v11, %v12121_v47  ;;  %vm7439_vm0 = vcmp.ge.f32.partialorder %v7423_v27, 0.0  ;;  %v7455_v31 = vmul.f32 0.2, %v7423_v27  ;;  %v7377_v53 = vpop.f32.mrf.mxu1  ;;  %v12358_v11 = vld [vmem:[#allocation23_spill] sm:$0xff] }
 0x39a   : > { %v7105_v59 = vadd.f32 %v12111_v40, %v12126_v61  ;;  %v7468_v60 = vsel %vm7436_vm15, %v7420_v10, %v7452_v37  ;;  %vm7437_vm4 = vcmp.ge.f32.partialorder %v7421_v35, 0.0  ;;  %v7453_v36 = vmul.f32 0.2, %v7421_v35  ;;  %v12359_v40 = vld [vmem:[#allocation22_spill] sm:$0xff] }
 0x39b   : > { %8304 = vst [vmem:[%s11551_s19] sm:$0xff] %v8303_v13   ;;  %v7486_v5 = vadd.f32 %v7470_v9, %v12357_v24  ;;  %v7471_v14 = vsel %vm7439_vm0, %v7423_v27, %v7455_v31  ;;  %v7424_v0 = vadd.f32 %v12104_v6, %v7401_v52  ;;  %v7404_v57 = vadd.f32 %v9312_v39, %v7107_v19 }
 0x39c   : > { %v7487_v47 = vadd.f32 %v7471_v14, %v12358_v11  ;;  %v7469_v42 = vsel %vm7437_vm4, %v7421_v35, %v7453_v36  ;;  %v7458_v38 = vmul.f32 0.2, %v7426_v41  ;;  %v7402_v45 = vadd.f32 %v7377_v53, %v7105_v59 }
 0x39d   : > { %v7484_v61 = vadd.f32 %v7468_v60, %v12359_v40  ;;  %v7485_v48 = vadd.f32 %v7469_v42, %v12360_v7  ;;  %vm7442_vm6 = vcmp.ge.f32.partialorder %v7426_v41, 0.0  ;;  %v7456_v32 = vmul.f32 0.2, %v7424_v0 }
 0x39e   : > { %v8328_v54 = vpack.c.bf16 %v7487_v47, %v7486_v5  ;;  %vm7440_vm9 = vcmp.ge.f32.partialorder %v7424_v0, 0.0  ;;  %v7427_v58 = vadd.f32 %v12104_v6, %v7404_v57  ;;  %v7425_v20 = vadd.f32 %v12104_v6, %v7402_v45 }
 0x39f   : > { %v8323_v62 = vpack.c.bf16 %v7485_v48, %v7484_v61  ;;  %v7474_v28 = vsel %vm7442_vm6, %v7426_v41, %v7458_v38  ;;  %v7472_v63 = vsel %vm7440_vm9, %v7424_v0, %v7456_v32 }
 0x3a0   : > { %8344 = vst [vmem:[%s11551_s19 + $0x28] sm:$0xff] %v8328_v54   ;;  %vm7443_vm7 = vcmp.ge.f32.partialorder %v7427_v58, 0.0  ;;  %v7459_v49 = vmul.f32 0.2, %v7427_v58  ;;  %vm7441_vm10 = vcmp.ge.f32.partialorder %v7425_v20, 0.0  ;;  %v7490_v43 = vadd.f32 %v7474_v28, %v12361_v51 }
 0x3a1   : > { %8343 = vst [vmem:[%s11551_s19 + $0x20] sm:$0xff] %v8323_v62   ;;  %v7457_v56 = vmul.f32 0.2, %v7425_v20  ;;  %v7488_v3 = vadd.f32 %v7472_v63, %v12363_v15 }
 0x3a2   : > { %v7475_v33 = vsel %vm7443_vm7, %v7427_v58, %v7459_v49 }
 0x3a3   : > { %v7491_v6 = vadd.f32 %v7475_v33, %v12362_v26  ;;  %v7473_v17 = vsel %vm7441_vm10, %v7425_v20, %v7457_v56 }
 0x3a4   : > { %v7489_v55 = vadd.f32 %v7473_v17, %v12364_v16 }
 0x3a5   : > { %v8338_v2 = vpack.c.bf16 %v7491_v6, %v7490_v43 }
 0x3a6   : > { %v8333_v30 = vpack.c.bf16 %v7489_v55, %v7488_v3 }
 0x3a7   : > { %8346 = vst [vmem:[%s11551_s19 + $0x38] sm:$0xff] %v8338_v2  }
 0x3a8   : > { %8345 = vst [vmem:[%s11551_s19 + $0x30] sm:$0xff] %v8333_v30  }
 0x3a9   : > { %9664 = shalt.err (!%p9661_p9)
}
 0x3aa   : > { %s9665_s19 = scalar_lea.hbm %s12180_s3, 1024  ;;  %s9669_s23 = scalar_lea.hbm %s12244_s7, 4096 }
 0x3ab   : > { %p9666_p11 = scmp.ne.s32.totalorder %s12180_s3, %s9665_s19  ;;  %p9670_p10 = scmp.lt.s32.totalorder %s12180_s3, %s12244_s7 }
 0x3ac   : > { %p9671_p12 = scmp.lt.s32.totalorder %s9669_s23, %s9665_s19 }
 0x3ad   : > { %p9667_p13 = pnand %p9666_p11, %p9849_p3 }
 0x3ae   : > { %p9672_p1 = por %p9671_p12, %p9670_p10 }
 0x3af   : > { %p9668_p0 = pneg %p9667_p13 }
 0x3b1   : > { %p9673_p2 = pnand %p9672_p1, %p9668_p0 }
 0x3b3   : > { %9676 = shalt.err (!%p9673_p2)
}
 0x3b4   : > { %s9755_s13 = smov 64   ;;  %s9756_s17 = smov 4  }
 0x3b5   : > { %9335 = dma.vmem_to_hbm [thread:$0]  (%p9849_p3), %s12175_s27, 1024, %s12180_s3, %s12186_s11, %s9755_s13, %s9755_s13, %s9756_s17  }
 0x3b6 PF: > { %p9347_p4 = scmp.ge.s32.totalorder %s9747_s8, 2  ;;  %s7604_s20 = sand.u32 1, %s9719_s24  }
 0x3b7   : > { %s7605_s14 = scalar_lea.sflag [#allocation5], %s7604_s20 }
 0x3b8   : > { %p9342_p5 = pnand %p9347_p4, %p9858_p8 }
 0x3ba   : > { %p9343_p6 = pneg %p9342_p5 }
 0x3bc   : > { %9714 = dma.done.wait (%p9343_p6), %s7605_s14, 1024  }
 0x3bd   : > { %9716 = vsyncadd (%p9343_p6), %s7605_s14, 4294966272  ;;  %s21_s8 = sadd.s32 1, %s9747_s8   ;;  %s12366_s15 = sld [smem:[#allocation9_spill]] }
 0x3be   : > { %p18_p7 = scmp.ge.s32.totalorder %s21_s8, 6   ;;  %s12367_s3 = sld [smem:[#allocation10_spill]] }
 0x3bf   : > { %s12368_s24 = smov %s9723_s25  ;;  %s12369_s25 = smov %s9727_s26 }
 0x3c0   : > { %s12370_s26 = smov %s9876_s21  ;;  %s12371_s27 = smov %s9739_s29 }
 0x3c1   : > { %s12372_s28 = smov %s9743_s30  ;;  %20 = sbr.rel (!%p18_p7) target bundleno = 8 (0x8), region = 101 }
 0x3c3   : > { %s12373_s29 = smov %s12366_s15 }
 0x3c4   : > { %s12374_s30 = smov %s12367_s3 }
 0x3c6   :  { %7610 = vsyncpa [#allocation4], 1 }
 0x3c7   :  { %7612 = vsyncpa [#allocation4 + $0x1], 1 }
 0x3c8   :  { %7613 = vsyncpa [#allocation5], 1 }
 0x3c9   :  { %7615 = vsyncpa [#allocation5 + $0x1], 1 }

</bundles_post_ra>
